<compile_context>
chip_gen: v6e
topology: v6e:2x2x1
jax: 0.10.0
libtpu: 0.0.40
codegen_flags: <defaults>
</compile_context>

<pallas_src>
import functools

import jax
import jax.numpy as jnp
from jax import lax
from jax.experimental import pallas as pl
from jax.experimental.pallas import tpu as pltpu


def compute_pad(dim_size, kernel_size, stride):
    """Identical semantics to the PyTorch helper (F.pad ordering: w,h,t)."""
    pads = []
    for i in range(len(dim_size) - 1, -1, -1):
        if dim_size[i] % stride[i] == 0:
            pad = max(kernel_size[i] - stride[i], 0)
        else:
            pad = max(kernel_size[i] - dim_size[i] % stride[i], 0)
        pads.append(pad // 2)
        pads.append(pad - pad // 2)
    return pads


def _round_up(x, m):
    return (x + m - 1) // m * m


def _pick_vmem_limit():
    """~75% of physical VMEM, capped at 96 MiB (v5e/v6e -> 96, v7x -> 48)."""
    default = 48 * 1024 * 1024
    try:
        cap = int(getattr(pltpu.get_tpu_info(), "vmem_capacity_bytes", 0))
    except Exception:
        cap = 0
    if cap <= 0:
        return default
    return int(min(96 * 1024 * 1024, cap * 3 // 4))


def _conv3d_bn_relu_kernel(x_ref, w_ref, shift_ref, o_ref, *,
                           kernel_size, stride, out_hw, c_in, c_out_pad,
                           use_relu):
    """One grid step = one (batch, output-depth) slab; all kt*kh*kw taps fused.

    x_ref     : (D_p, H_p, W_p, C_in)        padded volume of batch b (bf16),
                                             resident in VMEM (fetched once/batch)
    w_ref     : (kt*kh*kw*C_in, C_out_pad)   fused weights, BN scale folded (bf16)
    shift_ref : (1, C_out_pad)               folded BN shift (+ conv bias), f32
    o_ref     : (H_out*W_out, C_out_pad)     lane-dense output block (bf16)
    """
    kt, kh, kw = kernel_size
    st, sh, sw = stride
    h_out, w_out = out_hw
    hw = h_out * w_out

    d0 = pl.program_id(1) * st          # first padded input depth of this slab

    def spatial_taps(plane):
        # kh*kw strided spatial taps of one depth plane, kept in bf16
        # (no f32 round-trip through the VPU).
        taps = []
        for ih in range(kh):
            for iw in range(kw):
                taps.append(lax.slice(
                    plane,
                    (ih, iw, 0),
                    (ih + (h_out - 1) * sh + 1,
                     iw + (w_out - 1) * sw + 1,
                     c_in),
                    (sh, sw, 1)))
        return taps

    if c_in < 128:
        # Small-channel path: fuse ALL kt*kh*kw taps into ONE im2col matmul so
        # the MXU contraction is K = kt*kh*kw*C_in.
        # NOTE: the (H_out, W_out, K) -> (H_out*W_out, K) merge is layout-free
        # only when w_out is sublane-aligned; otherwise Mosaic inserts a relayout.
        pieces = []
        for it in range(kt):
            plane = x_ref[d0 + it]                       # (H_p, W_p, C_in) bf16
            pieces += spatial_taps(plane)
        patch = jnp.concatenate(pieces, axis=-1)
        patch = patch.reshape(hw, kt * kh * kw * c_in)
        acc = jnp.dot(patch, w_ref[...], preferred_element_type=jnp.float32)
    else:
        # Large-channel fast path: K = C_in is already MXU-native; skip the
        # lane-axis concatenation (it would materialize a kt*kh*kw-times copy
        # of the plane in VMEM) and issue accumulating dots per tap instead.
        acc = jnp.zeros((hw, c_out_pad), jnp.float32)
        tap = 0
        for it in range(kt):
            plane = x_ref[d0 + it]
            for piece in spatial_taps(plane):
                acc = acc + jnp.dot(
                    piece.reshape(hw, c_in),
                    w_ref[tap * c_in:(tap + 1) * c_in, :],
                    preferred_element_type=jnp.float32)
                tap += 1

    y = acc + shift_ref[...]                 # f32 epilogue: BN shift (+ bias)
    if use_relu:
        y = jnp.maximum(y, 0.0)
    o_ref[...] = y.astype(o_ref.dtype)       # bf16, lane-dense store


def conv3d_forward(x_ncdhw, weight, *, kernel_size, stride=(1, 1, 1),
                   padding='SAME', activation=True, use_BN=True,
                   bn_eps=0.001, bias=None,
                   bn_gamma=None, bn_beta=None,
                   bn_running_mean=None, bn_running_var=None,
                   compute_dtype=jnp.bfloat16):
    """Forward pass matching the PyTorch Conv3D module (inference-mode BN).

    x_ncdhw : (N, C_in, D, H, W)
    weight  : (C_out, C_in, KT, KH, KW)   (PyTorch Conv3d layout)
    returns : (N, C_out, D_out, H_out, W_out)  (f32)
    """
    n, c_in, d, h, w = x_ncdhw.shape
    c_out = weight.shape[0]
    kt, kh, kw = kernel_size
    st, sh, sw = stride

    # Narrow to bf16 BEFORE the NCDHW->NDHWC transpose (half the relayout bytes).
    x = jnp.transpose(x_ncdhw.astype(compute_dtype), (0, 2, 3, 4, 1))

    if padding == 'SAME':
        # pads order from compute_pad: [wL, wR, hL, hR, tL, tR]
        wl, wr, hl, hr, tl, tr = compute_pad((d, h, w), kernel_size, stride)
        x = jnp.pad(x, ((0, 0), (tl, tr), (hl, hr), (wl, wr), (0, 0)))

    _, d_p, h_p, w_p, _ = x.shape
    d_out = (d_p - kt) // st + 1
    h_out = (h_p - kh) // sh + 1
    w_out = (w_p - kw) // sw + 1
    hw = h_out * w_out
    k_dim = kt * kh * kw * c_in

    # Lane-dense output / weight blocks (256-aligned for big C_out on v6e/v7x).
    c_out_pad = _round_up(c_out, 256 if c_out > 128 else 128)

    # Fold BN (inference form) + conv bias into per-channel scale/shift.
    ones = jnp.ones((c_out,), jnp.float32)
    zeros = jnp.zeros((c_out,), jnp.float32)
    bn_gamma = ones if bn_gamma is None else bn_gamma.astype(jnp.float32)
    bn_beta = zeros if bn_beta is None else bn_beta.astype(jnp.float32)
    bn_running_mean = (zeros if bn_running_mean is None
                       else bn_running_mean.astype(jnp.float32))
    bn_running_var = (ones if bn_running_var is None
                      else bn_running_var.astype(jnp.float32))
    bias = zeros if bias is None else bias.astype(jnp.float32)

    if use_BN:
        scale = bn_gamma / jnp.sqrt(bn_running_var + bn_eps)
        shift = bn_beta + (bias - bn_running_mean) * scale
    else:
        scale = ones
        shift = bias

    # (C_out, C_in, KT, KH, KW) -> (KT*KH*KW*C_in, C_out); fold BN scale; pad
    # C_out; narrow to bf16.  Row order (it, ih, iw, c) matches the kernel taps.
    w_flat = jnp.transpose(weight.astype(jnp.float32), (2, 3, 4, 1, 0)).reshape(
        k_dim, c_out)
    w_flat = w_flat * scale[None, :]
    w_flat = jnp.pad(w_flat, ((0, 0), (0, c_out_pad - c_out))).astype(compute_dtype)

    shift_pad = jnp.pad(shift, (0, c_out_pad - c_out)).reshape(
        1, c_out_pad).astype(jnp.float32)

    kernel = functools.partial(
        _conv3d_bn_relu_kernel,
        kernel_size=(kt, kh, kw),
        stride=(st, sh, sw),
        out_hw=(h_out, w_out),
        c_in=c_in,
        c_out_pad=c_out_pad,
        use_relu=bool(activation),
    )

    flops = 2 * n * d_out * hw * c_out * k_dim
    bytes_accessed = (n * d_p * h_p * w_p * c_in * x.dtype.itemsize    # read once
                      + w_flat.size * w_flat.dtype.itemsize
                      + n * d_out * hw * c_out_pad * x.dtype.itemsize)  # bf16 out

    out_flat = pl.pallas_call(
        kernel,
        out_shape=jax.ShapeDtypeStruct((n, d_out, hw, c_out_pad), compute_dtype),
        grid_spec=pltpu.PrefetchScalarGridSpec(
            num_scalar_prefetch=0,
            grid=(n, d_out),
            in_specs=[
                # Whole padded volume of batch b; block index constant along od
                # -> fetched from HBM once per batch, no kt-fold re-read.
                pl.BlockSpec((None, d_p, h_p, w_p, c_in),
                             lambda b, od: (b, 0, 0, 0, 0)),
                # Small fused weight stays resident in VMEM.
                pl.BlockSpec((k_dim, c_out_pad), lambda b, od: (0, 0)),
                pl.BlockSpec((1, c_out_pad), lambda b, od: (0, 0)),
            ],
            out_specs=pl.BlockSpec((None, None, hw, c_out_pad),
                                   lambda b, od: (b, od, 0, 0)),
        ),
        compiler_params=pltpu.CompilerParams(
            dimension_semantics=("parallel", "parallel"),
            vmem_limit_bytes=_pick_vmem_limit()),
        cost_estimate=pl.CostEstimate(flops=int(flops), transcendentals=0,
                                      bytes_accessed=int(bytes_accessed)),
    )(x, w_flat, shift_pad)

    # Drop channel padding while still bf16, un-merge spatial dims, then
    # NDHWC -> NCDHW and cast to f32 (the module's output dtype).
    out = out_flat[..., :c_out].reshape(n, d_out, h_out, w_out, c_out)
    return jnp.transpose(out, (0, 4, 1, 2, 3)).astype(jnp.float32)


if __name__ == "__main__":
    # Small deterministic example consistent with the module:
    # in_planes=4, out_planes=8, kernel=(3,3,3), stride=(1,1,1), SAME padding.
    key = jax.random.PRNGKey(0)
    k_x, k_w = jax.random.split(key)

    N, C_IN, D, H, W = 2, 4, 8, 16, 16
    C_OUT = 8
    KERNEL = (3, 3, 3)
    STRIDE = (1, 1, 1)

    x = jax.random.normal(k_x, (N, C_IN, D, H, W), jnp.float32)
    # Deterministic synthetic weights (Conv3d weight layout: O, I, Kt, Kh, Kw).
    weight = jax.random.normal(k_w, (C_OUT, C_IN) + KERNEL, jnp.float32) * 0.1

    out = conv3d_forward(
        x, weight,
        kernel_size=KERNEL, stride=STRIDE, padding='SAME',
        activation=True, use_BN=True, bn_eps=0.001,
    )
    jax.block_until_ready(out)
    assert out.shape == (N, C_OUT, D, H, W), out.shape

    # Loose numerical sanity check against an XLA reference (bf16 matmul and
    # bf16 output in the Pallas path vs f32 reference -> generous tolerance).
    wl, wr, hl, hr, tl, tr = compute_pad((D, H, W), KERNEL, STRIDE)
    ref = lax.conv_general_dilated(
        x, weight, window_strides=STRIDE,
        padding=[(tl, tr), (hl, hr), (wl, wr)],
        dimension_numbers=('NCDHW', 'OIDHW', 'NCDHW'),
        precision=lax.Precision.HIGHEST)
    ref = jnp.maximum(ref * (1.0 / jnp.sqrt(1.0 + 0.001)), 0.0)
    max_err = float(jnp.max(jnp.abs(out - ref)))
    assert max_err < 0.15, f"max abs err {max_err}"

    print("KERNEL_OK")
</pallas_src>

<mosaic_0001>
module attributes {stable_mosaic.version = 11 : i64} {
  func.func @_conv3d_bn_relu_kernel(%arg0: i32, %arg1: i32, %arg2: memref<1x10x18x18x4xbf16, #tpu.memory_space<vmem>>, %arg3: memref<108x128xbf16, #tpu.memory_space<vmem>>, %arg4: memref<1x128xf32, #tpu.memory_space<vmem>>, %arg5: memref<1x1x256x128xbf16, #tpu.memory_space<vmem>>) attributes {dimension_semantics = [#tpu.dimension_semantics<parallel>, #tpu.dimension_semantics<parallel>], iteration_bounds = array<i64: 2, 8>, scalar_prefetch = 0 : i64, scratch_operands = 0 : i64, tpu.core_type = #tpu.core_type<tc>, window_params = [{transform_indices = @transform_0, window_bounds = array<i64: 1, 10, 18, 18, 4>}, {pipeline_mode = #tpu.pipeline_mode<synchronous>, transform_indices = @transform_1, window_bounds = array<i64: 108, 128>}, {pipeline_mode = #tpu.pipeline_mode<synchronous>, transform_indices = @transform_2, window_bounds = array<i64: 1, 128>}, {transform_indices = @transform_3, window_bounds = array<i64: 1, 1, 256, 128>}]} {
    %c1_i32 = arith.constant 1 : i32
    %0 = arith.muli %arg1, %c1_i32 : i32
    %c0_i32 = arith.constant 0 : i32
    %1 = arith.addi %0, %c0_i32 : i32
    %c0 = arith.constant 0 : index
    %2 = arith.index_cast %1 : i32 to index
    %c0_0 = arith.constant 0 : index
    %c0_1 = arith.constant 0 : index
    %c0_2 = arith.constant 0 : index
    %3 = vector.load %arg2[%c0, %2, %c0_0, %c0_1, %c0_2] : memref<1x10x18x18x4xbf16, #tpu.memory_space<vmem>>, vector<1x1x18x18x4xbf16>
    %4 = vector.shape_cast %3 : vector<1x1x18x18x4xbf16> to vector<18x18x4xbf16>
    %5 = vector.extract_strided_slice %4 {offsets = [0, 0, 0], sizes = [16, 16, 4], strides = [1, 1, 1]} : vector<18x18x4xbf16> to vector<16x16x4xbf16>
    %6 = vector.extract_strided_slice %4 {offsets = [0, 1, 0], sizes = [16, 16, 4], strides = [1, 1, 1]} : vector<18x18x4xbf16> to vector<16x16x4xbf16>
    %7 = vector.extract_strided_slice %4 {offsets = [0, 2, 0], sizes = [16, 16, 4], strides = [1, 1, 1]} : vector<18x18x4xbf16> to vector<16x16x4xbf16>
    %8 = vector.extract_strided_slice %4 {offsets = [1, 0, 0], sizes = [16, 16, 4], strides = [1, 1, 1]} : vector<18x18x4xbf16> to vector<16x16x4xbf16>
    %9 = vector.extract_strided_slice %4 {offsets = [1, 1, 0], sizes = [16, 16, 4], strides = [1, 1, 1]} : vector<18x18x4xbf16> to vector<16x16x4xbf16>
    %10 = vector.extract_strided_slice %4 {offsets = [1, 2, 0], sizes = [16, 16, 4], strides = [1, 1, 1]} : vector<18x18x4xbf16> to vector<16x16x4xbf16>
    %11 = vector.extract_strided_slice %4 {offsets = [2, 0, 0], sizes = [16, 16, 4], strides = [1, 1, 1]} : vector<18x18x4xbf16> to vector<16x16x4xbf16>
    %12 = vector.extract_strided_slice %4 {offsets = [2, 1, 0], sizes = [16, 16, 4], strides = [1, 1, 1]} : vector<18x18x4xbf16> to vector<16x16x4xbf16>
    %13 = vector.extract_strided_slice %4 {offsets = [2, 2, 0], sizes = [16, 16, 4], strides = [1, 1, 1]} : vector<18x18x4xbf16> to vector<16x16x4xbf16>
    %c1_i32_3 = arith.constant 1 : i32
    %14 = arith.addi %0, %c1_i32_3 : i32
    %c0_4 = arith.constant 0 : index
    %15 = arith.index_cast %14 : i32 to index
    %c0_5 = arith.constant 0 : index
    %c0_6 = arith.constant 0 : index
    %c0_7 = arith.constant 0 : index
    %16 = vector.load %arg2[%c0_4, %15, %c0_5, %c0_6, %c0_7] : memref<1x10x18x18x4xbf16, #tpu.memory_space<vmem>>, vector<1x1x18x18x4xbf16>
    %17 = vector.shape_cast %16 : vector<1x1x18x18x4xbf16> to vector<18x18x4xbf16>
    %18 = vector.extract_strided_slice %17 {offsets = [0, 0, 0], sizes = [16, 16, 4], strides = [1, 1, 1]} : vector<18x18x4xbf16> to vector<16x16x4xbf16>
    %19 = vector.extract_strided_slice %17 {offsets = [0, 1, 0], sizes = [16, 16, 4], strides = [1, 1, 1]} : vector<18x18x4xbf16> to vector<16x16x4xbf16>
    %20 = vector.extract_strided_slice %17 {offsets = [0, 2, 0], sizes = [16, 16, 4], strides = [1, 1, 1]} : vector<18x18x4xbf16> to vector<16x16x4xbf16>
    %21 = vector.extract_strided_slice %17 {offsets = [1, 0, 0], sizes = [16, 16, 4], strides = [1, 1, 1]} : vector<18x18x4xbf16> to vector<16x16x4xbf16>
    %22 = vector.extract_strided_slice %17 {offsets = [1, 1, 0], sizes = [16, 16, 4], strides = [1, 1, 1]} : vector<18x18x4xbf16> to vector<16x16x4xbf16>
    %23 = vector.extract_strided_slice %17 {offsets = [1, 2, 0], sizes = [16, 16, 4], strides = [1, 1, 1]} : vector<18x18x4xbf16> to vector<16x16x4xbf16>
    %24 = vector.extract_strided_slice %17 {offsets = [2, 0, 0], sizes = [16, 16, 4], strides = [1, 1, 1]} : vector<18x18x4xbf16> to vector<16x16x4xbf16>
    %25 = vector.extract_strided_slice %17 {offsets = [2, 1, 0], sizes = [16, 16, 4], strides = [1, 1, 1]} : vector<18x18x4xbf16> to vector<16x16x4xbf16>
    %26 = vector.extract_strided_slice %17 {offsets = [2, 2, 0], sizes = [16, 16, 4], strides = [1, 1, 1]} : vector<18x18x4xbf16> to vector<16x16x4xbf16>
    %c2_i32 = arith.constant 2 : i32
    %27 = arith.addi %0, %c2_i32 : i32
    %c0_8 = arith.constant 0 : index
    %28 = arith.index_cast %27 : i32 to index
    %c0_9 = arith.constant 0 : index
    %c0_10 = arith.constant 0 : index
    %c0_11 = arith.constant 0 : index
    %29 = vector.load %arg2[%c0_8, %28, %c0_9, %c0_10, %c0_11] : memref<1x10x18x18x4xbf16, #tpu.memory_space<vmem>>, vector<1x1x18x18x4xbf16>
    %30 = vector.shape_cast %29 : vector<1x1x18x18x4xbf16> to vector<18x18x4xbf16>
    %31 = vector.extract_strided_slice %30 {offsets = [0, 0, 0], sizes = [16, 16, 4], strides = [1, 1, 1]} : vector<18x18x4xbf16> to vector<16x16x4xbf16>
    %32 = vector.extract_strided_slice %30 {offsets = [0, 1, 0], sizes = [16, 16, 4], strides = [1, 1, 1]} : vector<18x18x4xbf16> to vector<16x16x4xbf16>
    %33 = vector.extract_strided_slice %30 {offsets = [0, 2, 0], sizes = [16, 16, 4], strides = [1, 1, 1]} : vector<18x18x4xbf16> to vector<16x16x4xbf16>
    %34 = vector.extract_strided_slice %30 {offsets = [1, 0, 0], sizes = [16, 16, 4], strides = [1, 1, 1]} : vector<18x18x4xbf16> to vector<16x16x4xbf16>
    %35 = vector.extract_strided_slice %30 {offsets = [1, 1, 0], sizes = [16, 16, 4], strides = [1, 1, 1]} : vector<18x18x4xbf16> to vector<16x16x4xbf16>
    %36 = vector.extract_strided_slice %30 {offsets = [1, 2, 0], sizes = [16, 16, 4], strides = [1, 1, 1]} : vector<18x18x4xbf16> to vector<16x16x4xbf16>
    %37 = vector.extract_strided_slice %30 {offsets = [2, 0, 0], sizes = [16, 16, 4], strides = [1, 1, 1]} : vector<18x18x4xbf16> to vector<16x16x4xbf16>
    %38 = vector.extract_strided_slice %30 {offsets = [2, 1, 0], sizes = [16, 16, 4], strides = [1, 1, 1]} : vector<18x18x4xbf16> to vector<16x16x4xbf16>
    %39 = vector.extract_strided_slice %30 {offsets = [2, 2, 0], sizes = [16, 16, 4], strides = [1, 1, 1]} : vector<18x18x4xbf16> to vector<16x16x4xbf16>
    %40 = tpu.concatenate %5, %6, %7, %8, %9, %10, %11, %12, %13, %18, %19, %20, %21, %22, %23, %24 in 2 : vector<16x16x4xbf16>, vector<16x16x4xbf16>, vector<16x16x4xbf16>, vector<16x16x4xbf16>, vector<16x16x4xbf16>, vector<16x16x4xbf16>, vector<16x16x4xbf16>, vector<16x16x4xbf16>, vector<16x16x4xbf16>, vector<16x16x4xbf16>, vector<16x16x4xbf16>, vector<16x16x4xbf16>, vector<16x16x4xbf16>, vector<16x16x4xbf16>, vector<16x16x4xbf16>, vector<16x16x4xbf16> -> vector<16x16x64xbf16>
    %41 = tpu.concatenate %25, %26, %31, %32, %33, %34, %35, %36, %37, %38, %39 in 2 : vector<16x16x4xbf16>, vector<16x16x4xbf16>, vector<16x16x4xbf16>, vector<16x16x4xbf16>, vector<16x16x4xbf16>, vector<16x16x4xbf16>, vector<16x16x4xbf16>, vector<16x16x4xbf16>, vector<16x16x4xbf16>, vector<16x16x4xbf16>, vector<16x16x4xbf16> -> vector<16x16x44xbf16>
    %42 = tpu.concatenate %40, %41 in 2 : vector<16x16x64xbf16>, vector<16x16x44xbf16> -> vector<16x16x108xbf16>
    %43 = vector.shape_cast %42 : vector<16x16x108xbf16> to vector<256x108xbf16>
    %c0_12 = arith.constant 0 : index
    %c0_13 = arith.constant 0 : index
    %44 = vector.load %arg3[%c0_12, %c0_13] : memref<108x128xbf16, #tpu.memory_space<vmem>>, vector<108x128xbf16>
    %cst = arith.constant dense<0.000000e+00> : vector<256x128xf32>
    %45 = tpu.matmul %43, %44, %cst {dimension_numbers = #tpu.dot_dimension_numbers<[1], [0], [0], [1], [0, 0, 1, 1], [], []>} : vector<256x108xbf16>, vector<108x128xbf16>, vector<256x128xf32> -> vector<256x128xf32>
    %c0_14 = arith.constant 0 : index
    %c0_15 = arith.constant 0 : index
    %46 = vector.load %arg4[%c0_14, %c0_15] : memref<1x128xf32, #tpu.memory_space<vmem>>, vector<1x128xf32>
    %47 = vector.broadcast %46 : vector<1x128xf32> to vector<256x128xf32>
    %48 = arith.addf %45, %47 : vector<256x128xf32>
    %cst_16 = arith.constant 0.000000e+00 : f32
    %49 = vector.broadcast %cst_16 : f32 to vector<256x128xf32>
    %50 = arith.maximumf %48, %49 : vector<256x128xf32>
    %51 = arith.truncf %50 : vector<256x128xf32> to vector<256x128xbf16>
    %c0_17 = arith.constant 0 : index
    %c0_18 = arith.constant 0 : index
    %c0_19 = arith.constant 0 : index
    %c0_20 = arith.constant 0 : index
    %52 = vector.load %arg5[%c0_17, %c0_18, %c0_19, %c0_20] : memref<1x1x256x128xbf16, #tpu.memory_space<vmem>>, vector<1x1x256x128xbf16>
    %53 = vector.shape_cast %52 : vector<1x1x256x128xbf16> to vector<256x128xbf16>
    %54 = vector.shape_cast %51 : vector<256x128xbf16> to vector<1x1x256x128xbf16>
    tpu.vector_store %arg5[%c0_17, %c0_18, %c0_19, %c0_20], %54 {strides = array<i32>} : memref<1x1x256x128xbf16, #tpu.memory_space<vmem>>, vector<1x1x256x128xbf16>,
    return
  }
  func.func @transform_0(%arg0: i32, %arg1: i32) -> (i32, i32, i32, i32, i32) {
    %c0_i32 = arith.constant 0 : i32
    %c0_i32_0 = arith.constant 0 : i32
    %c0_i32_1 = arith.constant 0 : i32
    %c0_i32_2 = arith.constant 0 : i32
    %c0_i32_3 = arith.constant 0 : i32
    return %arg0, %c0_i32, %c0_i32_0, %c0_i32_1, %c0_i32_2 : i32, i32, i32, i32, i32
  }
  func.func @transform_1(%arg0: i32, %arg1: i32) -> (i32, i32) {
    %c0_i32 = arith.constant 0 : i32
    %c0_i32_0 = arith.constant 0 : i32
    %c0_i32_1 = arith.constant 0 : i32
    return %c0_i32, %c0_i32_0 : i32, i32
  }
  func.func @transform_2(%arg0: i32, %arg1: i32) -> (i32, i32) {
    %c0_i32 = arith.constant 0 : i32
    %c0_i32_0 = arith.constant 0 : i32
    %c0_i32_1 = arith.constant 0 : i32
    return %c0_i32, %c0_i32_0 : i32, i32
  }
  func.func @transform_3(%arg0: i32, %arg1: i32) -> (i32, i32, i32, i32) {
    %c0_i32 = arith.constant 0 : i32
    %c0_i32_0 = arith.constant 0 : i32
    %c0_i32_1 = arith.constant 0 : i32
    return %arg0, %arg1, %c0_i32, %c0_i32_0 : i32, i32, i32, i32
  }
}

</mosaic_0001>

<bundles_post_ra>
// kernel: tpu_custom_call.1
= control target key start
LH: loop header
LB: loop body
LE: loop exit
PB: predicated region body
PF: predicated region fallthrough
CT: control target
= control target key end

     0   :  { %8 = vsyncpa [#allocation3], 0  ;;  %s10332_s0 = inlined_call_operand.vmem [shape: bf16[2,10,18,18,4], index: 0, kind: input, shape index: {}]   ;;  %s10333_s1 = inlined_call_operand.vmem [shape: bf16[108,128], index: 1, kind: input, shape index: {}]   ;;  %s10334_s2 = inlined_call_operand.vmem [shape: f32[1,128], index: 2, kind: input, shape index: {}]   ;;  %s10335_s3 = inlined_call_operand.hbm [shape: bf16[2,8,256,128], index: 3, kind: output, shape index: {}]  }
   0x1   :  { %10 = vsyncpa [#allocation3 + $0x1], 0  ;;  %s5573_s12 = smov 0   ;;  %s5575_s13 = smov 0  }
   0x2   :  { %s5577_s14 = smov 0   ;;  %s5579_s15 = smov 0  }
   0x3   :  { %s5581_s16 = smov 0   ;;  %s5583_s17 = smov 0  }
   0x4   :  { %s5585_s18 = smov 0   ;;  %s5587_s19 = smov 0  }
   0x5 LB: > { %s4680_s20 = sadd.s32 4294967295, %s5534_s19   ;;  %s4681_s21 = sadd.s32 4294967294, %s5534_s19   ;;  %s5534_s19 = sphi %s5587_s19, %s16_s19   ;;  %s5530_s18 = sphi %s5585_s18, %s11487_s18   ;;  %s5526_s17 = sphi %s5583_s17, %s11486_s17   ;;  %s5522_s16 = sphi %s5581_s16, %s11485_s16   ;;  %s5518_s15 = sphi %s5579_s15, %s11484_s15   ;;  %s5514_s14 = sphi %s5577_s14, %s11483_s14   ;;  %s5510_s13 = sphi %s5575_s13, %s11482_s13   ;;  %s5506_s12 = sphi %s5573_s12, %s11481_s12  }
   0x6   : > { %s25_s22 = sadd.s32 1, %s5526_s17  ;;  %s28_s23 = sadd.s32 1, %s5530_s18 }
   0x7   : > { %p26_p0 = scmp.ge.s32.totalorder %s25_s22, 8  ;;  %p115_p1 = scmp.ne.s32.totalorder %s5514_s14, %s5510_s13 }
   0x8   : > { %p116_p2 = scmp.eq.s32.totalorder %s4680_s20, 15  ;;  %p121_p5 = scmp.ne.s32.totalorder %s5510_s13, %s5506_s12 }
   0x9   : > { %s11489_s22 = smov (%p26_p0, %s25_s22), 0  ;;  %s11491_s23 = smov (!%p26_p0, %s28_s23), %s5530_s18 }
   0xa   : > { %s101_s24 = ssub.s32 %s5526_s17, %s11489_s22  ;;  %p5624_p3 = por %p116_p2, %p115_p1 }
   0xb   : > { %p30_p4 = scmp.ge.s32.totalorder %s11491_s23, 2  ;;  %p122_p6 = scmp.eq.s32.totalorder %s4681_s21, 15 }
   0xc   : > { %p4684_p7 = scmp.ge.s32.totalorder %s5534_s19, 1  ;;  %p154_p9 = scmp.lt.s32.totalorder %s5534_s19, 17 }
   0xd   : > { %s11493_s23 = smov (%p30_p4, %s11491_s23), 0  ;;  %p5633_p8 = por %p122_p6, %p121_p5 }
   0xe   : > { %s100_s27 = ssub.s32 %s5530_s18, %s11493_s23  ;;  %s105_s28 = sadd.s32 1, %s5514_s14 }
   0xf   : > { %s102_s29 = sor.u32 %s101_s24, %s100_s27  ;;  %p155_p10 = pnand %p4684_p7, %p154_p9 }
  0x10   : > { %p103_p11 = scmp.eq.s32.totalorder %s102_s29, 0 }
  0x11   : > { %158 = sbr.rel (%p155_p10) target bundleno = 1620 (0x654), region = 32 }
  0x12   : > { %s5642_s30 = scalar_select %p103_p11, %s5514_s14, %s105_s28  }
  0x16   : > { %p178_p12 = scmp.lt.s32.totalorder %s5522_s16, 1  ;;  %s4966_s5 = smul.u32 216, %s5518_s15  ;;  %vm485_vm0 = vsmask.f32 7424  ;;  %vm710_vm1 = vcmask 1046528   ;;  %vm1649_vm2 = vcmask 31744  }
  0x17   : > { %s5536_s11 = smov 4   ;;  %s5537_s20 = smov 8   ;;  %vm1682_vm3 = vcmask 64512   ;;  %vm1715_vm4 = vcmask 97280   ;;  %vm1748_vm5 = vcmask 130048   ;;  %vm1781_vm6 = vcmask 162816  }
  0x18   : > { %s179_s4 = scalar_select %p178_p12, %s5522_s16, 1  ;;  %vm1814_vm7 = vcmask 195584   ;;  %vm10447_vm8 = vcmask 228352   ;;  %vm10446_vm9 = vcmask 261120   ;;  %vm1913_vm10 = vcmask 293888  }
  0x19   : > { %s5538_s21 = smov 12   ;;  %s5539_s24 = smov 16   ;;  %vm1946_vm11 = vcmask 326656   ;;  %vm1979_vm12 = vcmask 359424   ;;  %vm2012_vm13 = vcmask 392192   ;;  %vm2045_vm14 = vcmask 424960  }
  0x1a   : > { %s5179_s6 = smul.u32 2160, %s179_s4  ;;  %s5540_s27 = smov 20   ;;  %vm2078_vm15 = vcmask 457728  }
  0x1b   : > { %s5541_s28 = smov 24   ;;  %s5542_s29 = smov 28  }
  0x1c   : > { %s182_s9 = scalar_lea.vmem %s10332_s0, %s5179_s6  ;;  %s5543_s4 = smov 32  }
  0x1d   : > { %s5650_s10 = scalar_lea.vmem %s182_s9, %s4966_s5  ;;  %s5544_s5 = smov 36  }
  0x1e   : > { %v5653_v0 = vld [vmem:[%s5650_s10 + $0x18] sm:$0xff]   ;;  %v5656_v1 = vld [vmem:[%s5650_s10 + $0x20] ss:$0 sps:$4 sm:$0x11]   ;;  %v5671_v12 = vld [vmem:[%s5650_s10 + $0x24] sm:$0xff]   ;;  %s5545_s6 = smov 40  }
  0x1f   : > { %v5659_v2 = vld [vmem:[%s5650_s10] sm:$0xff]   ;;  %v511_v3 = vshrl.u32 %v5653_v0, 16  ;;  %v513_v4 = vshll.u32 %v5653_v0, 16  ;;  %v518_v5 = vshll.u32 %v5656_v1, 16  ;;  %v523_v17 = vshrl.u32 %v5671_v12, 16  ;;  %v5679_v19 = vld [vmem:[%s5650_s10 + $0xc] sm:$0xff]  }
  0x20   : > { %v5665_v6 = vld [vmem:[%s5650_s10 + $0x8] ss:$0 sps:$4 sm:$0x11]   ;;  %v487_v7 = vshrl.u32 %v5659_v2, 16  ;;  %v489_v8 = vshll.u32 %v5659_v2, 16  ;;  %v525_v18 = vshll.u32 %v5671_v12, 16 }
  0x21   : > { %v515_v9 = vrot.slane %v513_v4, 1  ;;  %v520_v10 = vrot.slane %v518_v5, 1  ;;  %v494_v11 = vshll.u32 %v5665_v6, 16  ;;  %v5674_v14 = vld [vmem:[%s5650_s10 + $0x2c] ss:$0 sps:$4 sm:$0x11]  }
  0x22   : > { %v491_v13 = vrot.slane %v489_v8, 1  ;;  %v530_v21 = vshll.u32 %v5674_v14, 16  ;;  %v5683_v22 = vld [vmem:[%s5650_s10 + $0x14] ss:$0 sps:$4 sm:$0x11]   ;;  %v527_v24 = vrot.slane %v525_v18, 1 }
  0x23   : > { %v516_v15 = vor.u32 %v515_v9, %v511_v3  ;;  %v496_v16 = vrot.slane %v494_v11, 1  ;;  %v499_v25 = vshrl.u32 %v5679_v19, 16  ;;  %v501_v26 = vshll.u32 %v5679_v19, 16  ;;  %v5691_v27 = vld [vmem:[%s5650_s10 + $0x3c] sm:$0xff]   ;;  %v5704_v37 = vld [vmem:[%s5650_s10 + $0x30] sm:$0xff]   ;;  %v5724_v49 = vld [vmem:[%s5650_s10 + $0x48] sm:$0xff]  }
  0x24   : > { %v492_v20 = vor.u32 %v491_v13, %v487_v7  ;;  %v532_v29 = vrot.slane %v530_v21, 1  ;;  %v506_v30 = vshll.u32 %v5683_v22, 16  ;;  %v528_v31 = vor.u32 %v527_v24, %v523_v17  ;;  %v5699_v33 = vld [vmem:[%s5650_s10 + $0x44] ss:$0 sps:$4 sm:$0x11]   ;;  %v5718_v45 = vld [vmem:[%s5650_s10 + $0x54] sm:$0xff]  }
  0x25   : > { %v5686_v23 = vsel %vm485_vm0, %v516_v15, %v520_v10  ;;  %v503_v32 = vrot.slane %v501_v26, 1  ;;  %v547_v34 = vshrl.u32 %v5691_v27, 16  ;;  %v549_v35 = vshll.u32 %v5691_v27, 16  ;;  %v5713_v42 = vld [vmem:[%s5650_s10 + $0x38] ss:$0 sps:$4 sm:$0x11]  }
  0x26   : > { %682 = vrot.lane.b32.xlu1 %v5686_v23, %s5536_s11  ;;  %v497_v28 = vsel %vm485_vm0, %v492_v20, %v496_v16  ;;  %v508_v36 = vrot.slane %v506_v30, 1  ;;  %v5707_v38 = vsel %vm485_vm0, %v528_v31, %v532_v29  ;;  %v554_v41 = vshll.u32 %v5699_v33, 16  ;;  %v5730_v52 = vld [vmem:[%s5650_s10 + $0x5c] ss:$0 sps:$4 sm:$0x11]   ;;  %v5743_v61 = vld [vmem:[%s5650_s10 + $0x6c] sm:$0xff]  }
  0x27   : > { %678 = vrot.lane.b32.xlu0 %v497_v28, %s5536_s11  ;;  %v504_v39 = vor.u32 %v503_v32, %v499_v25  ;;  %v551_v40 = vrot.slane %v549_v35, 1  ;;  %v535_v43 = vshrl.u32 %v5704_v37, 16  ;;  %v537_v44 = vshll.u32 %v5704_v37, 16  ;;  %v5746_v63 = vld [vmem:[%s5650_s10 + $0x50] ss:$0 sps:$4 sm:$0x11]  }
  0x28   : > { %v556_v48 = vrot.slane %v554_v41, 1  ;;  %v542_v51 = vshll.u32 %v5713_v42, 16  ;;  %v571_v53 = vshrl.u32 %v5718_v45, 16  ;;  %v573_v55 = vshll.u32 %v5718_v45, 16  ;;  %v5764_v20 = vld [vmem:[%s5650_s10 + $0x60] sm:$0xff]   ;;  %s5546_s7 = smov 44  }
  0x29   : > { %v5721_v46 = vsel %vm485_vm0, %v504_v39, %v508_v36  ;;  %v552_v47 = vor.u32 %v551_v40, %v547_v34  ;;  %v539_v50 = vrot.slane %v537_v44, 1  ;;  %v559_v56 = vshrl.u32 %v5724_v49, 16  ;;  %v5755_v9 = vld [vmem:[%s5650_s10 + $0x74] ss:$0 sps:$4 sm:$0x11]   ;;  %v5772_v24 = vld [vmem:[%s5650_s10 + $0x84] sm:$0xff]  }
  0x2a   : > { %684 = vrot.lane.b32.xlu1 %v5707_v38, %s5536_s11  ;;  %v544_v58 = vrot.slane %v542_v51, 1  ;;  %v578_v59 = vshll.u32 %v5730_v52, 16  ;;  %v561_v60 = vshll.u32 %v5724_v49, 16  ;;  %v575_v62 = vrot.slane %v573_v55, 1  ;;  %v5791_v39 = vld [vmem:[%s5650_s10 + $0x78] sm:$0xff]   ;;  %s5547_s8 = smov 48  }
  0x2b   : > { %680 = vrot.lane.b32.xlu0 %v5721_v46, %s5536_s11  ;;  %v5734_v54 = vsel %vm485_vm0, %v552_v47, %v556_v48  ;;  %v540_v57 = vor.u32 %v539_v50, %v535_v43  ;;  %v566_v8 = vshll.u32 %v5746_v63, 16  ;;  %v595_v10 = vshrl.u32 %v5743_v61, 16  ;;  %v5769_v21 = vld [vmem:[%s5650_s10 + $0x68] ss:$0 sps:$4 sm:$0x11]   ;;  %v5802_v51 = vld [vmem:[%s5650_s10 + $0x9c] sm:$0xff]  }
  0x2c   : > { %v580_v4 = vrot.slane %v578_v59, 1  ;;  %v563_v5 = vrot.slane %v561_v60, 1  ;;  %v576_v7 = vor.u32 %v575_v62, %v571_v53  ;;  %v597_v11 = vshll.u32 %v5743_v61, 16  ;;  %v5783_v32 = vld [vmem:[%s5650_s10 + $0x8c] ss:$0 sps:$4 sm:$0x11]  }
  0x2d   : > { %v5749_v3 = vsel %vm485_vm0, %v540_v57, %v544_v58  ;;  %v568_v16 = vrot.slane %v566_v8, 1  ;;  %v602_v18 = vshll.u32 %v5755_v9, 16  ;;  %v583_v29 = vshrl.u32 %v5764_v20, 16  ;;  %v5797_v44 = vld [vmem:[%s5650_s10 + $0x80] ss:$0 sps:$4 sm:$0x11]  }
  0x2e   : > { %688 = vrot.lane.b32.xlu1 %v5734_v54, %s5536_s11  ;;  %v564_v13 = vor.u32 %v563_v5, %v559_v56  ;;  %v5760_v15 = vsel %vm485_vm0, %v576_v7, %v580_v4  ;;  %v599_v17 = vrot.slane %v597_v11, 1  ;;  %v585_v30 = vshll.u32 %v5764_v20, 16  ;;  %v5806_v59 = vld [vmem:[%s5650_s10 + $0xa4] ss:$0 sps:$4 sm:$0x11]   ;;  %v5814_v7 = vld [vmem:[%s5650_s10 + $0x90] sm:$0xff]  }
  0x2f   : > { %686 = vrot.lane.b32.xlu0 %v5749_v3, %s5536_s11  ;;  %v604_v28 = vrot.slane %v602_v18, 1  ;;  %v590_v31 = vshll.u32 %v5769_v21, 16  ;;  %v619_v34 = vshrl.u32 %v5772_v24, 16  ;;  %v621_v36 = vshll.u32 %v5772_v24, 16  ;;  %s5548_s9 = smov 52  }
  0x30   : > { %v5775_v25 = vsel %vm485_vm0, %v564_v13, %v568_v16  ;;  %v600_v26 = vor.u32 %v599_v17, %v595_v10  ;;  %v587_v40 = vrot.slane %v585_v30, 1  ;;  %v626_v43 = vshll.u32 %v5783_v32, 16  ;;  %v5825_v16 = vld [vmem:[%s5650_s10 + $0x98] ss:$0 sps:$4 sm:$0x11]  }
  0x31   : > { %v592_v41 = vrot.slane %v590_v31, 1  ;;  %v623_v47 = vrot.slane %v621_v36, 1  ;;  %v607_v48 = vshrl.u32 %v5791_v39, 16  ;;  %v609_v50 = vshll.u32 %v5791_v39, 16  ;;  %v5836_v31 = vld [vmem:[%s5650_s10 + $0xa8] sm:$0xff]  }
  0x32   : > { %692 = vrot.lane.b32.xlu1 %v5760_v15, %s5536_s11  ;;  %v5787_v35 = vsel %vm485_vm0, %v600_v26, %v604_v28  ;;  %v588_v53 = vor.u32 %v587_v40, %v583_v29  ;;  %v628_v55 = vrot.slane %v626_v43, 1  ;;  %v614_v56 = vshll.u32 %v5797_v44, 16  ;;  %v5830_v26 = vld [vmem:[%s5650_s10 + $0xb4] sm:$0xff]   ;;  %v5840_v40 = vld [vmem:[%s5650_s10 + $0xbc] ss:$0 sps:$4 sm:$0x11]  }
  0x33   : > { %690 = vrot.lane.b32.xlu0 %v5775_v25, %s5536_s11  ;;  %v624_v57 = vor.u32 %v623_v47, %v619_v34  ;;  %v611_v58 = vrot.slane %v609_v50, 1  ;;  %v643_v60 = vshrl.u32 %v5802_v51, 16  ;;  %v645_v62 = vshll.u32 %v5802_v51, 16 }
  0x34   : > { %v5811_v4 = vsel %vm485_vm0, %v588_v53, %v592_v41  ;;  %v616_v5 = vrot.slane %v614_v56, 1  ;;  %v650_v13 = vshll.u32 %v5806_v59, 16  ;;  %v631_v17 = vshrl.u32 %v5814_v7, 16 }
  0x35   : > { %v5819_v8 = vsel %vm485_vm0, %v624_v57, %v628_v55  ;;  %v612_v10 = vor.u32 %v611_v58, %v607_v48  ;;  %v647_v11 = vrot.slane %v645_v62, 1  ;;  %v633_v18 = vshll.u32 %v5814_v7, 16  ;;  %v5855_v58 = vld [vmem:[%s5650_s10 + $0xb0] ss:$0 sps:$4 sm:$0x11]  }
  0x36   : > { %696 = vrot.lane.b32.xlu1 %v5787_v35, %s5536_s11  ;;  %v652_v30 = vrot.slane %v650_v13, 1  ;;  %v638_v36 = vshll.u32 %v5825_v16, 16  ;;  %v667_v41 = vshrl.u32 %v5830_v26, 16  ;;  %v669_v47 = vshll.u32 %v5830_v26, 16 }
  0x37   : > { %694 = vrot.lane.b32.xlu0 %v5811_v4, %s5536_s11  ;;  %v5833_v28 = vsel %vm485_vm0, %v612_v10, %v616_v5  ;;  %v648_v29 = vor.u32 %v647_v11, %v643_v60  ;;  %v635_v34 = vrot.slane %v633_v18, 1  ;;  %v655_v48 = vshrl.u32 %v5836_v31, 16 }
  0x38   : > { %v640_v53 = vrot.slane %v638_v36, 1  ;;  %v674_v55 = vshll.u32 %v5840_v40, 16  ;;  %v657_v56 = vshll.u32 %v5836_v31, 16  ;;  %v671_v57 = vrot.slane %v669_v47, 1 }
  0x39   : > { %v5846_v43 = vsel %vm485_vm0, %v648_v29, %v652_v30  ;;  %v636_v50 = vor.u32 %v635_v34, %v631_v17  ;;  %v714_v10 = vrot.slane %v5679_v19, 1  ;;  %v662_v13 = vshll.u32 %v5855_v58, 16 }
  0x3a   : > { %700 = vrot.lane.b32.xlu1 %v5819_v8, %s5536_s11  ;;  %v676_v62 = vrot.slane %v674_v55, 1  ;;  %v659_v5 = vrot.slane %v657_v56, 1  ;;  %v672_v11 = vor.u32 %v671_v57, %v667_v41  ;;  %v715_v17 = vrot.slane %v5683_v22, 1 }
  0x3b   : > { %698 = vrot.lane.b32.xlu0 %v5833_v28, %s5536_s11  ;;  %v5858_v60 = vsel %vm485_vm0, %v636_v50, %v640_v53  ;;  %v711_v29 = vrot.slane %v5659_v2, 1  ;;  %v664_v34 = vrot.slane %v662_v13, 1  ;;  %v712_v36 = vrot.slane %v5665_v6, 1 }
  0x3c   : > { %v660_v18 = vor.u32 %v659_v5, %v655_v48  ;;  %v5867_v30 = vsel %vm485_vm0, %v672_v11, %v676_v62  ;;  %v5876_v41 = vsel %vm710_vm1, %v714_v10, %v715_v17  ;;  %v720_v22 = vrot.slane %v5671_v12, 1 }
  0x3d   : > { %v721_v48 = vrot.slane %v5674_v14, 1  ;;  %v717_v2 = vrot.slane %v5653_v0, 1  ;;  %v713_v6 = vsel %vm710_vm1, %v711_v29, %v712_v36  ;;  %v718_v50 = vrot.slane %v5656_v1, 1 }
  0x3e   : > { %704 = vrot.lane.b32.xlu1 %v5846_v43, %s5536_s11  ;;  %v5873_v47 = vsel %vm485_vm0, %v660_v18, %v664_v34  ;;  %v726_v53 = vrot.slane %v5691_v27, 1  ;;  %v727_v55 = vrot.slane %v5699_v33, 1  ;;  %v723_v14 = vrot.slane %v5704_v37, 1 }
  0x3f   : > { %702 = vrot.lane.b32.xlu0 %v5858_v60, %s5536_s11  ;;  %v5890_v56 = vsel %vm710_vm1, %v720_v22, %v721_v48  ;;  %v724_v57 = vrot.slane %v5713_v42, 1  ;;  %v732_v62 = vrot.slane %v5718_v45, 1  ;;  %v733_v1 = vrot.slane %v5730_v52, 1 }
  0x40   : > { %v5898_v5 = vsel %vm710_vm1, %v717_v2, %v718_v50  ;;  %v5901_v33 = vsel %vm710_vm1, %v726_v53, %v727_v55  ;;  %v729_v10 = vrot.slane %v5724_v49, 1  ;;  %v730_v11 = vrot.slane %v5746_v63, 1 }
  0x41   : > { %v738_v13 = vrot.slane %v5743_v61, 1  ;;  %v739_v42 = vrot.slane %v5755_v9, 1  ;;  %v735_v17 = vrot.slane %v5764_v20, 1  ;;  %v736_v52 = vrot.slane %v5769_v21, 1 }
  0x42   : > { %708 = vrot.lane.b32.xlu1 %v5867_v30, %s5536_s11  ;;  %v744_v18 = vrot.slane %v5772_v24, 1  ;;  %v745_v29 = vrot.slane %v5783_v32, 1  ;;  %v741_v34 = vrot.slane %v5791_v39, 1  ;;  %v742_v36 = vrot.slane %v5797_v44, 1 }
  0x43   : > { %706 = vrot.lane.b32.xlu0 %v5873_v47, %s5536_s11  ;;  %v5918_v63 = vsel %vm710_vm1, %v723_v14, %v724_v57  ;;  %v750_v9 = vrot.slane %v5802_v51, 1  ;;  %v751_v22 = vrot.slane %v5806_v59, 1  ;;  %v747_v21 = vrot.slane %v5814_v7, 1 }
  0x44   : > { %v748_v48 = vrot.slane %v5825_v16, 1  ;;  %v756_v32 = vrot.slane %v5830_v26, 1  ;;  %v757_v2 = vrot.slane %v5840_v40, 1  ;;  %v5929_v44 = vsel %vm710_vm1, %v732_v62, %v733_v1 }
  0x45   : > { %v5939_v59 = vsel %vm710_vm1, %v738_v13, %v739_v42  ;;  %v5944_v16 = vsel %vm710_vm1, %v735_v17, %v736_v52  ;;  %v5949_v40 = vsel %vm710_vm1, %v744_v18, %v745_v29  ;;  %v753_v50 = vrot.slane %v5836_v31, 1 }
  0x46   : > { %761 = vrot.lane.b32.xlu1 %v5876_v41, %s5537_s20  ;;  %v754_v53 = vrot.slane %v5855_v58, 1  ;;  %v5956_v55 = vsel %vm710_vm1, %v741_v34, %v742_v36  ;;  %v5961_v14 = vsel %vm710_vm1, %v750_v9, %v751_v22  ;;  %v5966_v57 = vsel %vm710_vm1, %v747_v21, %v748_v48 }
  0x47   : > { %759 = vrot.lane.b32.xlu0 %v713_v6, %s5537_s20  ;;  %v5934_v6 = vsel %vm710_vm1, %v729_v10, %v730_v11  ;;  %v5971_v58 = vsel %vm710_vm1, %v756_v32, %v757_v2 }
  0x48   : > { %v5976_v62 = vsel %vm710_vm1, %v753_v50, %v754_v53 }
  0x4a   : > { %765 = vrot.lane.b32.xlu1 %v5890_v56, %s5537_s20 }
  0x4b   : > { %763 = vrot.lane.b32.xlu0 %v5898_v5, %s5537_s20 }
  0x4e   : > { %769 = vrot.lane.b32.xlu1 %v5901_v33, %s5537_s20 }
  0x4f   : > { %767 = vrot.lane.b32.xlu0 %v5918_v63, %s5537_s20 }
  0x52   : > { %773 = vrot.lane.b32.xlu1 %v5929_v44, %s5537_s20 }
  0x53   : > { %771 = vrot.lane.b32.xlu0 %v5934_v6, %s5537_s20 }
  0x56   : > { %777 = vrot.lane.b32.xlu1 %v5939_v59, %s5537_s20 }
  0x57   : > { %775 = vrot.lane.b32.xlu0 %v5944_v16, %s5537_s20 }
  0x5a   : > { %781 = vrot.lane.b32.xlu1 %v5949_v40, %s5537_s20 }
  0x5b   : > { %779 = vrot.lane.b32.xlu0 %v5956_v55, %s5537_s20 }
  0x5e   : > { %785 = vrot.lane.b32.xlu1 %v5961_v14, %s5537_s20 }
  0x5f   : > { %783 = vrot.lane.b32.xlu0 %v5966_v57, %s5537_s20 }
  0x62   : > { %789 = vrot.lane.b32.xlu1 %v5971_v58, %s5537_s20 }
  0x63   : > { %787 = vrot.lane.b32.xlu0 %v5976_v62, %s5537_s20 }
  0x66   : > { %798 = vrot.lane.b32.xlu1 %v5653_v0, %s5538_s21 }
  0x67   : > { %796 = vrot.lane.b32.xlu0 %v5679_v19, %s5538_s21  ;;  %v6009_v19 = vld [vmem:[%s5650_s10 + $0xc0] sm:$0xff]  }
  0x68   : > { %v834_v11 = vshll.u32 %v6009_v19, 16  ;;  %v832_v42 = vshrl.u32 %v6009_v19, 16 }
  0x6a   : > { %802 = vrot.lane.b32.xlu1 %v5704_v37, %s5538_s21  ;;  %v836_v17 = vrot.slane %v834_v11, 1 }
  0x6b   : > { %800 = vrot.lane.b32.xlu0 %v5671_v12, %s5538_s21 }
  0x6c   : > { %v837_v34 = vor.u32 %v836_v17, %v832_v42 }
  0x6e   : > { %806 = vrot.lane.b32.xlu1 %v5724_v49, %s5538_s21 }
  0x6f   : > { %804 = vrot.lane.b32.xlu0 %v5691_v27, %s5538_s21 }
  0x72   : > { %810 = vrot.lane.b32.xlu1 %v5764_v20, %s5538_s21 }
  0x73   : > { %808 = vrot.lane.b32.xlu0 %v5718_v45, %s5538_s21 }
  0x76   : > { %814 = vrot.lane.b32.xlu1 %v5791_v39, %s5538_s21 }
  0x77   : > { %812 = vrot.lane.b32.xlu0 %v5743_v61, %s5538_s21 }
  0x7a   : > { %818 = vrot.lane.b32.xlu1 %v5814_v7, %s5538_s21 }
  0x7b   : > { %816 = vrot.lane.b32.xlu0 %v5772_v24, %s5538_s21 }
  0x7e   : > { %822 = vrot.lane.b32.xlu1 %v5836_v31, %s5538_s21 }
  0x7f   : > { %820 = vrot.lane.b32.xlu0 %v5802_v51, %s5538_s21 }
  0x82   : > { %826 = vrot.lane.b32.xlu1 %v6009_v19, %s5538_s21 }
  0x83   : > { %824 = vrot.lane.b32.xlu0 %v5830_v26, %s5538_s21 }
  0x86   : > { %845 = vrot.lane.b32.xlu1 %v5686_v23, %s5539_s24 }
  0x87   : > { %843 = vrot.lane.b32.xlu0 %v5721_v46, %s5539_s24  ;;  %v5300_v46 = vld [vmem:[%s5650_s10 + $0xc8] ss:$0 sps:$4 sm:$0x11]  }
  0x88   : > { %v839_v52 = vshll.u32 %v5300_v46, 16 }
  0x8a   : > { %849 = vrot.lane.b32.xlu1 %v5749_v3, %s5539_s24  ;;  %v841_v36 = vrot.slane %v839_v52, 1 }
  0x8b   : > { %847 = vrot.lane.b32.xlu0 %v5707_v38, %s5539_s24 }
  0x8c   : > { %v6059_v22 = vsel %vm485_vm0, %v837_v34, %v841_v36  ;;  %v875_v36 = vrot.slane %v6009_v19, 1 }
  0x8e   : > { %853 = vrot.lane.b32.xlu1 %v5775_v25, %s5539_s24 }
  0x8f   : > { %851 = vrot.lane.b32.xlu0 %v5734_v54, %s5539_s24 }
  0x92   : > { %857 = vrot.lane.b32.xlu1 %v5811_v4, %s5539_s24 }
  0x93   : > { %855 = vrot.lane.b32.xlu0 %v5760_v15, %s5539_s24 }
  0x96   : > { %861 = vrot.lane.b32.xlu1 %v5833_v28, %s5539_s24 }
  0x97   : > { %859 = vrot.lane.b32.xlu0 %v5787_v35, %s5539_s24 }
  0x98   : > { %v6031_v1 = vpop.permute.xlu1 %682 }
  0x99   : > { %10451 = vst [vmem:[#allocation5_spill] sm:$0xff] %v6031_v1  ;;  %v6033_v10 = vpop.permute.xlu0 %678 }
  0x9a   : > { %10452 = vst [vmem:[#allocation6_spill] sm:$0xff] %v6033_v10  ;;  %865 = vrot.lane.b32.xlu1 %v5858_v60, %s5539_s24 }
  0x9b   : > { %863 = vrot.lane.b32.xlu0 %v5819_v8, %s5539_s24 }
  0x9c   : > { %v6041_v13 = vpop.permute.xlu1 %684 }
  0x9d   : > { %10453 = vst [vmem:[#allocation7_spill] sm:$0xff] %v6041_v13  ;;  %v6046_v18 = vpop.permute.xlu0 %680 }
  0x9e   : > { %10454 = vst [vmem:[#allocation8_spill] sm:$0xff] %v6046_v18  ;;  %869 = vrot.lane.b32.xlu1 %v5873_v47, %s5539_s24 }
  0x9f   : > { %867 = vrot.lane.b32.xlu0 %v5846_v43, %s5539_s24 }
  0xa0   : > { %v6050_v29 = vpop.permute.xlu1 %688 }
  0xa1   : > { %10455 = vst [vmem:[#allocation9_spill] sm:$0xff] %v6050_v29  ;;  %v6054_v9 = vpop.permute.xlu0 %686 }
  0xa2   : > { %10456 = vst [vmem:[#allocation10_spill] sm:$0xff] %v6054_v9  ;;  %873 = vrot.lane.b32.xlu1 %v6059_v22, %s5539_s24 }
  0xa3   : > { %871 = vrot.lane.b32.xlu0 %v5867_v30, %s5539_s24 }
  0xa4   : > { %v6063_v21 = vpop.permute.xlu1 %692 }
  0xa5   : > { %v6067_v48 = vpop.permute.xlu0 %690 }
  0xa6   : > { %10457 = vst [vmem:[#allocation11_spill] sm:$0xff] %v6067_v48  ;;  %880 = vrot.lane.b32.xlu1 %v5898_v5, %s5540_s27 }
  0xa7   : > { %878 = vrot.lane.b32.xlu0 %v5876_v41, %s5540_s27 }
  0xa8   : > { %v6071_v32 = vpop.permute.xlu1 %696 }
  0xa9   : > { %10458 = vst [vmem:[#allocation12_spill] sm:$0xff] %v6071_v32  ;;  %v6077_v2 = vpop.permute.xlu0 %694 }
  0xaa   : > { %10459 = vst [vmem:[#allocation13_spill] sm:$0xff] %v6077_v2  ;;  %884 = vrot.lane.b32.xlu1 %v5918_v63, %s5540_s27 }
  0xab   : > { %882 = vrot.lane.b32.xlu0 %v5890_v56, %s5540_s27 }
  0xac   : > { %v6081_v50 = vpop.permute.xlu1 %700 }
  0xad   : > { %10460 = vst [vmem:[#allocation14_spill] sm:$0xff] %v6081_v50  ;;  %v6085_v53 = vpop.permute.xlu0 %698 }
  0xae   : > { %10461 = vst [vmem:[#allocation15_spill] sm:$0xff] %v6085_v53  ;;  %888 = vrot.lane.b32.xlu1 %v5934_v6, %s5540_s27 }
  0xaf   : > { %886 = vrot.lane.b32.xlu0 %v5901_v33, %s5540_s27 }
  0xb0   : > { %v6089_v11 = vpop.permute.xlu1 %704 }
  0xb1   : > { %10462 = vst [vmem:[#allocation16_spill] sm:$0xff] %v6089_v11  ;;  %v6093_v41 = vpop.permute.xlu0 %702  ;;  %v876_v11 = vrot.slane %v5300_v46, 1 }
  0xb2   : > { %10463 = vst [vmem:[#allocation17_spill] sm:$0xff] %v6093_v41  ;;  %892 = vrot.lane.b32.xlu1 %v5944_v16, %s5540_s27 }
  0xb3   : > { %890 = vrot.lane.b32.xlu0 %v5929_v44, %s5540_s27  ;;  %v6123_v41 = vsel %vm710_vm1, %v875_v36, %v876_v11 }
  0xb4   : > { %v6099_v42 = vpop.permute.xlu1 %708 }
  0xb5   : > { %10464 = vst [vmem:[#allocation18_spill] sm:$0xff] %v6099_v42  ;;  %v6101_v17 = vpop.permute.xlu0 %706 }
  0xb6   : > { %10465 = vst [vmem:[#allocation19_spill] sm:$0xff] %v6101_v17  ;;  %896 = vrot.lane.b32.xlu1 %v5956_v55, %s5540_s27 }
  0xb7   : > { %894 = vrot.lane.b32.xlu0 %v5939_v59, %s5540_s27 }
  0xb8   : > { %v6107_v52 = vpop.permute.xlu1 %761 }
  0xb9   : > { %10466 = vst [vmem:[#allocation20_spill] sm:$0xff] %v6107_v52  ;;  %v6109_v34 = vpop.permute.xlu0 %759 }
  0xba   : > { %10467 = vst [vmem:[#allocation21_spill] sm:$0xff] %v6109_v34  ;;  %900 = vrot.lane.b32.xlu1 %v5966_v57, %s5540_s27 }
  0xbb   : > { %898 = vrot.lane.b32.xlu0 %v5949_v40, %s5540_s27 }
  0xbc   : > { %v6116_v29 = vpop.permute.xlu1 %765 }
  0xbd   : > { %10468 = vst [vmem:[#allocation22_spill] sm:$0xff] %v6116_v29  ;;  %v6118_v9 = vpop.permute.xlu0 %763  ;;  %v6464_v29 = vld [vmem:[%s5650_s10 + $0x180] sm:$0xff]  }
  0xbe   : > { %10469 = vst [vmem:[#allocation23_spill] sm:$0xff] %v6118_v9  ;;  %904 = vrot.lane.b32.xlu1 %v5976_v62, %s5540_s27 }
  0xbf   : > { %902 = vrot.lane.b32.xlu0 %v5961_v14, %s5540_s27 }
  0xc0   : > { %v6127_v34 = vpop.permute.xlu1 %769 }
  0xc1   : > { %10470 = vst [vmem:[#allocation24_spill] sm:$0xff] %v6127_v34  ;;  %v6129_v52 = vpop.permute.xlu0 %767 }
  0xc2   : > { %10471 = vst [vmem:[#allocation25_spill] sm:$0xff] %v6129_v52  ;;  %908 = vrot.lane.b32.xlu1 %v6123_v41, %s5540_s27 }
  0xc3   : > { %906 = vrot.lane.b32.xlu0 %v5971_v58, %s5540_s27 }
  0xc4   : > { %v6135_v46 = vpop.permute.xlu1 %773 }
  0xc5   : > { %10472 = vst [vmem:[#allocation26_spill] sm:$0xff] %v6135_v46  ;;  %v6137_v9 = vpop.permute.xlu0 %771 }
  0xc6   : > { %10473 = vst [vmem:[#allocation27_spill] sm:$0xff] %v6137_v9  ;;  %917 = vrot.lane.b32.xlu1 %v5671_v12, %s5541_s28  ;;  %v1360_v9 = vshll.u32 %v6464_v29, 16 }
  0xc7   : > { %915 = vrot.lane.b32.xlu0 %v5653_v0, %s5541_s28 }
  0xc8   : > { %v6143_v11 = vpop.permute.xlu1 %777 }
  0xc9   : > { %10474 = vst [vmem:[#allocation28_spill] sm:$0xff] %v6143_v11  ;;  %v6145_v36 = vpop.permute.xlu0 %775 }
  0xca   : > { %10475 = vst [vmem:[#allocation29_spill] sm:$0xff] %v6145_v36  ;;  %921 = vrot.lane.b32.xlu1 %v5691_v27, %s5541_s28 }
  0xcb   : > { %919 = vrot.lane.b32.xlu0 %v5704_v37, %s5541_s28 }
  0xcc   : > { %v6151_v34 = vpop.permute.xlu1 %781 }
  0xcd   : > { %10476 = vst [vmem:[#allocation30_spill] sm:$0xff] %v6151_v34  ;;  %v6153_v52 = vpop.permute.xlu0 %779 }
  0xce   : > { %10477 = vst [vmem:[#allocation31_spill] sm:$0xff] %v6153_v52  ;;  %925 = vrot.lane.b32.xlu1 %v5718_v45, %s5541_s28 }
  0xcf   : > { %923 = vrot.lane.b32.xlu0 %v5724_v49, %s5541_s28 }
  0xd0   : > { %v6159_v0 = vpop.permute.xlu1 %785 }
  0xd1   : > { %10478 = vst [vmem:[#allocation32_spill] sm:$0xff] %v6159_v0  ;;  %v6161_v12 = vpop.permute.xlu0 %783 }
  0xd2   : > { %10479 = vst [vmem:[#allocation33_spill] sm:$0xff] %v6161_v12  ;;  %929 = vrot.lane.b32.xlu1 %v5743_v61, %s5541_s28 }
  0xd3   : > { %927 = vrot.lane.b32.xlu0 %v5764_v20, %s5541_s28 }
  0xd4   : > { %v6167_v27 = vpop.permute.xlu1 %789 }
  0xd5   : > { %10480 = vst [vmem:[#allocation34_spill] sm:$0xff] %v6167_v27  ;;  %v6169_v37 = vpop.permute.xlu0 %787 }
  0xd6   : > { %10481 = vst [vmem:[#allocation35_spill] sm:$0xff] %v6169_v37  ;;  %933 = vrot.lane.b32.xlu1 %v5772_v24, %s5541_s28  ;;  %v6190_v24 = vld [vmem:[%s5650_s10 + $0xcc] sm:$0xff]  }
  0xd7   : > { %931 = vrot.lane.b32.xlu0 %v5791_v39, %s5541_s28 }
  0xd8   : > { %v6175_v45 = vpop.permute.xlu1 %798 }
  0xd9   : > { %10482 = vst [vmem:[#allocation36_spill] sm:$0xff] %v6175_v45  ;;  %v6177_v49 = vpop.permute.xlu0 %796  ;;  %v6454_v45 = vld [vmem:[%s5650_s10 + $0x11c] ss:$0 sps:$4 sm:$0x11]  }
  0xda   : > { %10483 = vst [vmem:[#allocation37_spill] sm:$0xff] %v6177_v49  ;;  %937 = vrot.lane.b32.xlu1 %v5802_v51, %s5541_s28  ;;  %v6451_v49 = vld [vmem:[%s5650_s10 + $0x18c] sm:$0xff]  }
  0xdb   : > { %935 = vrot.lane.b32.xlu0 %v5814_v7, %s5541_s28 }
  0xdc   : > { %v6183_v61 = vpop.permute.xlu1 %802 }
  0xdd   : > { %10484 = vst [vmem:[#allocation38_spill] sm:$0xff] %v6183_v61  ;;  %v6185_v20 = vpop.permute.xlu0 %800 }
  0xde   : > { %10485 = vst [vmem:[#allocation39_spill] sm:$0xff] %v6185_v20  ;;  %941 = vrot.lane.b32.xlu1 %v5830_v26, %s5541_s28 }
  0xdf   : > { %939 = vrot.lane.b32.xlu0 %v5836_v31, %s5541_s28 }
  0xe0   : > { %v6194_v39 = vpop.permute.xlu1 %806 }
  0xe1   : > { %10486 = vst [vmem:[#allocation40_spill] sm:$0xff] %v6194_v39  ;;  %v6196_v0 = vpop.permute.xlu0 %804 }
  0xe2   : > { %10487 = vst [vmem:[#allocation41_spill] sm:$0xff] %v6196_v0  ;;  %945 = vrot.lane.b32.xlu1 %v6190_v24, %s5541_s28 }
  0xe3   : > { %943 = vrot.lane.b32.xlu0 %v6009_v19, %s5541_s28 }
  0xe4   : > { %v6202_v51 = vpop.permute.xlu1 %810 }
  0xe5   : > { %10488 = vst [vmem:[#allocation42_spill] sm:$0xff] %v6202_v51  ;;  %v6204_v7 = vpop.permute.xlu0 %808 }
  0xe6   : > { %10489 = vst [vmem:[#allocation43_spill] sm:$0xff] %v6204_v7  ;;  %964 = vrot.lane.b32.xlu1 %v5707_v38, %s5542_s29 }
  0xe7   : > { %962 = vrot.lane.b32.xlu0 %v5686_v23, %s5542_s29 }
  0xe8   : > { %v6210_v26 = vpop.permute.xlu1 %814 }
  0xe9   : > { %10490 = vst [vmem:[#allocation44_spill] sm:$0xff] %v6210_v26  ;;  %v6212_v31 = vpop.permute.xlu0 %812  ;;  %v6443_v26 = vld [vmem:[%s5650_s10 + $0xf8] ss:$0 sps:$4 sm:$0x11]  }
  0xea   : > { %10491 = vst [vmem:[#allocation45_spill] sm:$0xff] %v6212_v31  ;;  %968 = vrot.lane.b32.xlu1 %v5734_v54, %s5542_s29  ;;  %v5302_v54 = vld [vmem:[%s5650_s10 + $0xd4] ss:$0 sps:$4 sm:$0x11]  }
  0xeb   : > { %966 = vrot.lane.b32.xlu0 %v5749_v3, %s5542_s29  ;;  %v953_v3 = vshll.u32 %v6190_v24, 16 }
  0xec   : > { %v6218_v19 = vpop.permute.xlu1 %818 }
  0xed   : > { %10492 = vst [vmem:[#allocation46_spill] sm:$0xff] %v6218_v19  ;;  %v6220_v39 = vpop.permute.xlu0 %816 }
  0xee   : > { %10493 = vst [vmem:[#allocation47_spill] sm:$0xff] %v6220_v39  ;;  %972 = vrot.lane.b32.xlu1 %v5760_v15, %s5542_s29  ;;  %v951_v15 = vshrl.u32 %v6190_v24, 16 }
  0xef   : > { %970 = vrot.lane.b32.xlu0 %v5775_v25, %s5542_s29  ;;  %v955_v25 = vrot.slane %v953_v3, 1 }
  0xf0   : > { %v6226_v23 = vpop.permute.xlu1 %822 }
  0xf1   : > { %10494 = vst [vmem:[#allocation48_spill] sm:$0xff] %v6226_v23  ;;  %v6228_v38 = vpop.permute.xlu0 %820  ;;  %v958_v23 = vshll.u32 %v5302_v54, 16 }
  0xf2   : > { %10495 = vst [vmem:[#allocation49_spill] sm:$0xff] %v6228_v38  ;;  %976 = vrot.lane.b32.xlu1 %v5787_v35, %s5542_s29 }
  0xf3   : > { %974 = vrot.lane.b32.xlu0 %v5811_v4, %s5542_s29  ;;  %v956_v4 = vor.u32 %v955_v25, %v951_v15  ;;  %v960_v39 = vrot.slane %v958_v23, 1 }
  0xf4   : > { %v6236_v0 = vpop.permute.xlu1 %826 }
  0xf5   : > { %10496 = vst [vmem:[#allocation50_spill] sm:$0xff] %v6236_v0  ;;  %v6238_v12 = vpop.permute.xlu0 %824 }
  0xf6   : > { %10497 = vst [vmem:[#allocation51_spill] sm:$0xff] %v6238_v12  ;;  %980 = vrot.lane.b32.xlu1 %v5819_v8, %s5542_s29 }
  0xf7   : > { %978 = vrot.lane.b32.xlu0 %v5833_v28, %s5542_s29  ;;  %v961_v28 = vsel %vm485_vm0, %v956_v4, %v960_v39 }
  0xf8   : > { %v6245_v35 = vpop.permute.xlu1 %845 }
  0xf9   : > { %10498 = vst [vmem:[#allocation52_spill] sm:$0xff] %v6245_v35  ;;  %v6247_v38 = vpop.permute.xlu0 %843 }
  0xfa   : > { %10499 = vst [vmem:[#allocation53_spill] sm:$0xff] %v6247_v38  ;;  %984 = vrot.lane.b32.xlu1 %v5846_v43, %s5542_s29  ;;  %v6438_v38 = vld [vmem:[%s5650_s10 + $0x168] sm:$0xff]  }
  0xfb   : > { %982 = vrot.lane.b32.xlu0 %v5858_v60, %s5542_s29 }
  0xfc   : > { %v6253_v8 = vpop.permute.xlu1 %849 }
  0xfd   : > { %10500 = vst [vmem:[#allocation54_spill] sm:$0xff] %v6253_v8  ;;  %v6255_v19 = vpop.permute.xlu0 %847 }
  0xfe   : > { %10501 = vst [vmem:[#allocation55_spill] sm:$0xff] %v6255_v19  ;;  %988 = vrot.lane.b32.xlu1 %v5867_v30, %s5542_s29  ;;  %v6430_v19 = vld [vmem:[%s5650_s10 + $0x104] ss:$0 sps:$4 sm:$0x11]  }
  0xff   : > { %986 = vrot.lane.b32.xlu0 %v5873_v47, %s5542_s29  ;;  %v1233_v11 = vshll.u32 %v6430_v19, 16 }
 0x100   : > { %v6262_v3 = vpop.permute.xlu1 %853 }
 0x101   : > { %10502 = vst [vmem:[#allocation56_spill] sm:$0xff] %v6262_v3  ;;  %v6264_v43 = vpop.permute.xlu0 %851 }
 0x102   : > { %10503 = vst [vmem:[#allocation57_spill] sm:$0xff] %v6264_v43  ;;  %992 = vrot.lane.b32.xlu1 %v961_v28, %s5542_s29 }
 0x103   : > { %990 = vrot.lane.b32.xlu0 %v6059_v22, %s5542_s29 }
 0x104   : > { %v6269_v60 = vpop.permute.xlu1 %857 }
 0x105   : > { %10504 = vst [vmem:[#allocation58_spill] sm:$0xff] %v6269_v60  ;;  %v6271_v23 = vpop.permute.xlu0 %855 }
 0x106   : > { %10505 = vst [vmem:[#allocation59_spill] sm:$0xff] %v6271_v23  ;;  %999 = vrot.lane.b32.xlu1 %v5890_v56, %s5543_s4 }
 0x107   : > { %997 = vrot.lane.b32.xlu0 %v5898_v5, %s5543_s4 }
 0x108   : > { %v6277_v30 = vpop.permute.xlu1 %861 }
 0x109   : > { %10506 = vst [vmem:[#allocation60_spill] sm:$0xff] %v6277_v30  ;;  %v6279_v47 = vpop.permute.xlu0 %859 }
 0x10a   : > { %10507 = vst [vmem:[#allocation61_spill] sm:$0xff] %v6279_v47  ;;  %1003 = vrot.lane.b32.xlu1 %v5901_v33, %s5543_s4 }
 0x10b   : > { %1001 = vrot.lane.b32.xlu0 %v5918_v63, %s5543_s4 }
 0x10c   : > { %v6285_v22 = vpop.permute.xlu1 %865 }
 0x10d   : > { %10508 = vst [vmem:[#allocation62_spill] sm:$0xff] %v6285_v22  ;;  %v6287_v39 = vpop.permute.xlu0 %863  ;;  %v6425_v22 = vld [vmem:[%s5650_s10 + $0x174] sm:$0xff]  }
 0x10e   : > { %10509 = vst [vmem:[#allocation63_spill] sm:$0xff] %v6287_v39  ;;  %1007 = vrot.lane.b32.xlu1 %v5929_v44, %s5543_s4 }
 0x10f   : > { %1005 = vrot.lane.b32.xlu0 %v5934_v6, %s5543_s4 }
 0x110   : > { %v6293_v56 = vpop.permute.xlu1 %869 }
 0x111   : > { %10510 = vst [vmem:[#allocation64_spill] sm:$0xff] %v6293_v56  ;;  %v6295_v5 = vpop.permute.xlu0 %867 }
 0x112   : > { %10511 = vst [vmem:[#allocation65_spill] sm:$0xff] %v6295_v5  ;;  %1011 = vrot.lane.b32.xlu1 %v5939_v59, %s5543_s4  ;;  %v994_v59 = vrot.slane %v6190_v24, 1  ;;  %v6389_v5 = vld [vmem:[%s5650_s10 + $0x144] sm:$0xff]  }
 0x113   : > { %1009 = vrot.lane.b32.xlu0 %v5944_v16, %s5543_s4  ;;  %v995_v16 = vrot.slane %v5302_v54, 1  ;;  %v6340_v54 = vld [vmem:[%s5650_s10 + $0xd8] sm:$0xff]  }
 0x114   : > { %v6301_v33 = vpop.permute.xlu1 %873  ;;  %v1190_v35 = vshrl.u32 %v6340_v54, 16 }
 0x115   : > { %10512 = vst [vmem:[#allocation66_spill] sm:$0xff] %v6301_v33  ;;  %v6303_v63 = vpop.permute.xlu0 %871 }
 0x116   : > { %10513 = vst [vmem:[#allocation67_spill] sm:$0xff] %v6303_v63  ;;  %1015 = vrot.lane.b32.xlu1 %v5949_v40, %s5543_s4 }
 0x117   : > { %1013 = vrot.lane.b32.xlu0 %v5956_v55, %s5543_s4  ;;  %v996_v55 = vsel %vm710_vm1, %v994_v59, %v995_v16  ;;  %v6361_v59 = vld [vmem:[%s5650_s10 + $0x114] sm:$0xff]  }
 0x118   : > { %v6309_v44 = vpop.permute.xlu1 %880 }
 0x119   : > { %10514 = vst [vmem:[#allocation68_spill] sm:$0xff] %v6309_v44  ;;  %v6311_v6 = vpop.permute.xlu0 %878  ;;  %v6418_v44 = vld [vmem:[%s5650_s10 + $0xe0] ss:$0 sps:$4 sm:$0x11]  }
 0x11a   : > { %10515 = vst [vmem:[#allocation69_spill] sm:$0xff] %v6311_v6  ;;  %1019 = vrot.lane.b32.xlu1 %v5961_v14, %s5543_s4  ;;  %v1192_v6 = vshll.u32 %v6340_v54, 16 }
 0x11b   : > { %1017 = vrot.lane.b32.xlu0 %v5966_v57, %s5543_s4  ;;  %v6333_v57 = vld [vmem:[%s5650_s10 + $0xe4] sm:$0xff]  }
 0x11c   : > { %v6318_v40 = vpop.permute.xlu1 %884  ;;  %v1202_v47 = vshrl.u32 %v6333_v57, 16  ;;  %v1194_v31 = vrot.slane %v1192_v6, 1  ;;  %v1252_v6 = vshll.u32 %v6361_v59, 16 }
 0x11d   : > { %10516 = vst [vmem:[#allocation70_spill] sm:$0xff] %v6318_v40  ;;  %v6320_v15 = vpop.permute.xlu0 %882  ;;  %v6414_v40 = vld [vmem:[%s5650_s10 + $0x150] sm:$0xff]  }
 0x11e   : > { %10517 = vst [vmem:[#allocation71_spill] sm:$0xff] %v6320_v15  ;;  %1023 = vrot.lane.b32.xlu1 %v5971_v58, %s5543_s4  ;;  %v1195_v53 = vor.u32 %v1194_v31, %v1190_v35  ;;  %v1254_v18 = vrot.slane %v1252_v6, 1  ;;  %v1257_v31 = vshll.u32 %v6454_v45, 16  ;;  %v6479_v35 = vld [vmem:[%s5650_s10 + $0x134] ss:$0 sps:$4 sm:$0x11]  }
 0x11f   : > { %1021 = vrot.lane.b32.xlu0 %v5976_v62, %s5543_s4  ;;  %v6347_v62 = vld [vmem:[%s5650_s10 + $0xfc] sm:$0xff]   ;;  %10536 = vst [vmem:[#allocation90_spill] sm:$0xff] %v6479_v35  ;;  %v1281_v12 = vshll.u32 %v6479_v35, 16  ;;  %v1312_v27 = vshll.u32 %v6414_v40, 16 }
 0x120   : > { %v6327_v14 = vpop.permute.xlu1 %888  ;;  %v1228_v8 = vshll.u32 %v6347_v62, 16  ;;  %v1226_v34 = vshrl.u32 %v6347_v62, 16 }
 0x121   : > { %10518 = vst [vmem:[#allocation72_spill] sm:$0xff] %v6327_v14  ;;  %v6329_v24 = vpop.permute.xlu0 %886  ;;  %v6375_v14 = vld [vmem:[%s5650_s10 + $0x12c] sm:$0xff]  }
 0x122   : > { %10519 = vst [vmem:[#allocation73_spill] sm:$0xff] %v6329_v24  ;;  %1027 = vrot.lane.b32.xlu1 %v996_v55, %s5543_s4  ;;  %v6368_v55 = vld [vmem:[%s5650_s10 + $0x108] sm:$0xff]   ;;  %v6382_v24 = vld [vmem:[%s5650_s10 + $0x120] sm:$0xff]   ;;  %v1230_v36 = vrot.slane %v1228_v8, 1  ;;  %v1221_v8 = vshll.u32 %v6443_v26, 16  ;;  %v1276_v10 = vshll.u32 %v6375_v14, 16 }
 0x123   : > { %1025 = vrot.lane.b32.xlu0 %v6123_v41, %s5543_s4  ;;  %v6354_v41 = vld [vmem:[%s5650_s10 + $0xf0] sm:$0xff]   ;;  %v1238_v1 = vshrl.u32 %v6368_v55, 16  ;;  %v1264_v63 = vshll.u32 %v6382_v24, 16 }
 0x124   : > { %v6337_v58 = vpop.permute.xlu1 %892  ;;  %v1216_v20 = vshll.u32 %v6354_v41, 16  ;;  %v1231_v13 = vor.u32 %v1230_v36, %v1226_v34  ;;  %v1223_v34 = vrot.slane %v1221_v8, 1 }
 0x125   : > { %10520 = vst [vmem:[#allocation74_spill] sm:$0xff] %v6337_v58  ;;  %v6342_v25 = vpop.permute.xlu0 %890  ;;  %v1266_v37 = vrot.slane %v1264_v63, 1  ;;  %v6529_v63 = vld [vmem:[%s5650_s10 + $0x164] ss:$0 sps:$4 sm:$0x11]   ;;  %v1336_v58 = vshll.u32 %v6438_v38, 16 }
 0x126   : > { %10521 = vst [vmem:[#allocation75_spill] sm:$0xff] %v6342_v25  ;;  %1111 = vrot.lane.b32.xlu1 %v6333_v57, %s5544_s5  ;;  %v1218_v2 = vrot.slane %v1216_v20, 1  ;;  %v1235_v20 = vrot.slane %v1233_v11, 1  ;;  %v6494_v11 = vld [vmem:[%s5650_s10 + $0x128] ss:$0 sps:$4 sm:$0x11]  }
 0x127   : > { %1109 = vrot.lane.b32.xlu0 %v6340_v54, %s5544_s5  ;;  %10538 = vst [vmem:[#allocation92_spill] sm:$0xff] %v6494_v11  ;;  %10545 = vst [vmem:[#allocation99_spill] sm:$0xff] %v6529_v63  ;;  %v1348_v25 = vshll.u32 %v6425_v22, 16 }
 0x128   : > { %v6351_v4 = vpop.permute.xlu1 %896  ;;  %v6502_v33 = vsel %vm485_vm0, %v1231_v13, %v1235_v20  ;;  %v1269_v20 = vshll.u32 %v6494_v11, 16 }
 0x129   : > { %10522 = vst [vmem:[#allocation76_spill] sm:$0xff] %v6351_v4  ;;  %v6356_v28 = vpop.permute.xlu0 %894  ;;  %v6407_v4 = vld [vmem:[%s5650_s10 + $0xec] ss:$0 sps:$4 sm:$0x11]  }
 0x12a   : > { %10523 = vst [vmem:[#allocation77_spill] sm:$0xff] %v6356_v28  ;;  %1115 = vrot.lane.b32.xlu1 %v6347_v62, %s5544_s5 }
 0x12b   : > { %1113 = vrot.lane.b32.xlu0 %v6354_v41, %s5544_s5 }
 0x12c   : > { %v6365_v16 = vpop.permute.xlu1 %900 }
 0x12d   : > { %10524 = vst [vmem:[#allocation78_spill] sm:$0xff] %v6365_v16  ;;  %v6370_v56 = vpop.permute.xlu0 %898  ;;  %v6396_v16 = vld [vmem:[%s5650_s10 + $0x138] sm:$0xff]  }
 0x12e   : > { %10525 = vst [vmem:[#allocation79_spill] sm:$0xff] %v6370_v56  ;;  %1119 = vrot.lane.b32.xlu1 %v6361_v59, %s5544_s5  ;;  %v1288_v0 = vshll.u32 %v6396_v16, 16 }
 0x12f   : > { %1117 = vrot.lane.b32.xlu0 %v6368_v55, %s5544_s5 }
 0x130   : > { %v6379_v3 = vpop.permute.xlu1 %904 }
 0x131   : > { %10526 = vst [vmem:[#allocation80_spill] sm:$0xff] %v6379_v3  ;;  %v6384_v43 = vpop.permute.xlu0 %902  ;;  %v6403_v3 = vld [vmem:[%s5650_s10 + $0x15c] sm:$0xff]  }
 0x132   : > { %10527 = vst [vmem:[#allocation81_spill] sm:$0xff] %v6384_v43  ;;  %1123 = vrot.lane.b32.xlu1 %v6375_v14, %s5544_s5  ;;  %v1204_v43 = vshll.u32 %v6333_v57, 16 }
 0x133   : > { %1121 = vrot.lane.b32.xlu0 %v6382_v24, %s5544_s5 }
 0x134   : > { %v6393_v56 = vpop.permute.xlu1 %908  ;;  %v1206_v30 = vrot.slane %v1204_v43, 1  ;;  %v1197_v43 = vshll.u32 %v6418_v44, 16 }
 0x135   : > { %10528 = vst [vmem:[#allocation82_spill] sm:$0xff] %v6393_v56  ;;  %v6398_v28 = vpop.permute.xlu0 %906 }
 0x136   : > { %10529 = vst [vmem:[#allocation83_spill] sm:$0xff] %v6398_v28  ;;  %1127 = vrot.lane.b32.xlu1 %v6389_v5, %s5544_s5  ;;  %v1199_v50 = vrot.slane %v1197_v43, 1 }
 0x137   : > { %1125 = vrot.lane.b32.xlu0 %v6396_v16, %s5544_s5 }
 0x138   : > { %v6411_v15 = vpop.permute.xlu1 %917 }
 0x139   : > { %10530 = vst [vmem:[#allocation84_spill] sm:$0xff] %v6411_v15  ;;  %v6420_v39 = vpop.permute.xlu0 %915  ;;  %v1209_v15 = vshll.u32 %v6407_v4, 16 }
 0x13a   : > { %10531 = vst [vmem:[#allocation85_spill] sm:$0xff] %v6420_v39  ;;  %1131 = vrot.lane.b32.xlu1 %v6403_v3, %s5544_s5 }
 0x13b   : > { %1129 = vrot.lane.b32.xlu0 %v6414_v40, %s5544_s5  ;;  %v1211_v52 = vrot.slane %v1209_v15, 1  ;;  %v1214_v15 = vshrl.u32 %v6354_v41, 16 }
 0x13c   : > { %v6435_v39 = vpop.permute.xlu1 %921 }
 0x13d   : > { %10532 = vst [vmem:[#allocation86_spill] sm:$0xff] %v6435_v39  ;;  %v6446_v61 = vpop.permute.xlu0 %919  ;;  %v1207_v39 = vor.u32 %v1206_v30, %v1202_v47  ;;  %v6467_v30 = vld [vmem:[%s5650_s10 + $0x110] ss:$0 sps:$4 sm:$0x11]   ;;  %v1240_v47 = vshll.u32 %v6368_v55, 16 }
 0x13e   : > { %10533 = vst [vmem:[#allocation87_spill] sm:$0xff] %v6446_v61  ;;  %1135 = vrot.lane.b32.xlu1 %v6425_v22, %s5544_s5  ;;  %v1245_v28 = vshll.u32 %v6467_v30, 16 }
 0x13f   : > { %1133 = vrot.lane.b32.xlu0 %v6438_v38, %s5544_s5  ;;  %v6482_v43 = vsel %vm485_vm0, %v1207_v39, %v1211_v52  ;;  %v1242_v6 = vrot.slane %v1240_v47, 1  ;;  %v1200_v52 = vsel %vm485_vm0, %v1195_v53, %v1199_v50  ;;  %v1219_v39 = vor.u32 %v1218_v2, %v1214_v15  ;;  %v6506_v53 = vld [vmem:[%s5650_s10 + $0x14c] ss:$0 sps:$4 sm:$0x11]  }
 0x140   : > { %v6461_v61 = vpop.permute.xlu1 %925  ;;  %v1259_v47 = vrot.slane %v1257_v31, 1  ;;  %v1274_v50 = vshrl.u32 %v6375_v14, 16  ;;  %v1278_v2 = vrot.slane %v1276_v10, 1  ;;  %10540 = vst [vmem:[#allocation94_spill] sm:$0xff] %v6506_v53  ;;  %v1300_v15 = vshll.u32 %v6389_v5, 16 }
 0x141   : > { %10534 = vst [vmem:[#allocation88_spill] sm:$0xff] %v6461_v61  ;;  %v6472_v32 = vpop.permute.xlu0 %923  ;;  %v1250_v61 = vshrl.u32 %v6361_v59, 16  ;;  %v1262_v31 = vshrl.u32 %v6382_v24, 16  ;;  %v6514_v13 = vsel %vm485_vm0, %v1219_v39, %v1223_v34  ;;  %v6518_v10 = vld [vmem:[%s5650_s10 + $0x140] ss:$0 sps:$4 sm:$0x11]  }
 0x142   : > { %10535 = vst [vmem:[#allocation89_spill] sm:$0xff] %v6472_v32  ;;  %1139 = vrot.lane.b32.xlu1 %v6451_v49, %s5544_s5  ;;  %10542 = vst [vmem:[#allocation96_spill] sm:$0xff] %v6518_v10  ;;  %v1298_v39 = vshrl.u32 %v6389_v5, 16  ;;  %v1302_v34 = vrot.slane %v1300_v15, 1  ;;  %v1290_v15 = vrot.slane %v1288_v0, 1  ;;  %v1293_v42 = vshll.u32 %v6518_v10, 16 }
 0x143   : > { %1137 = vrot.lane.b32.xlu0 %v6464_v29, %s5544_s5  ;;  %v1255_v56 = vor.u32 %v1254_v18, %v1250_v61  ;;  %v1243_v18 = vor.u32 %v1242_v6, %v1238_v1  ;;  %v1247_v61 = vrot.slane %v1245_v28, 1  ;;  %v1283_v28 = vrot.slane %v1281_v12, 1 }
 0x144   : > { %v6487_v32 = vpop.permute.xlu1 %929  ;;  %v1324_v6 = vshll.u32 %v6403_v3, 16  ;;  %v1267_v12 = vor.u32 %v1266_v37, %v1262_v31  ;;  %v1329_v37 = vshll.u32 %v6529_v63, 16 }
 0x145   : > { %10537 = vst [vmem:[#allocation91_spill] sm:$0xff] %v6487_v32  ;;  %v6496_v36 = vpop.permute.xlu0 %927  ;;  %v6526_v1 = vsel %vm485_vm0, %v1255_v56, %v1259_v47  ;;  %v6539_v56 = vsel %vm485_vm0, %v1243_v18, %v1247_v61  ;;  %v6542_v47 = vld [vmem:[%s5650_s10 + $0x158] ss:$0 sps:$4 sm:$0x11]   ;;  %v1310_v32 = vshrl.u32 %v6414_v40, 16 }
 0x146   : > { %10539 = vst [vmem:[#allocation93_spill] sm:$0xff] %v6496_v36  ;;  %1383 = vrot.lane.b32.xlu1 %v6482_v43, %s5545_s6  ;;  %10544 = vst [vmem:[#allocation98_spill] sm:$0xff] %v6526_v1  ;;  %v1326_v18 = vrot.slane %v1324_v6, 1  ;;  %v6554_v61 = vld [vmem:[%s5650_s10 + $0x17c] ss:$0 sps:$4 sm:$0x11]  }
 0x147   : > { %1381 = vrot.lane.b32.xlu0 %v1200_v52, %s5545_s6  ;;  %v1279_v52 = vor.u32 %v1278_v2, %v1274_v50  ;;  %10547 = vst [vmem:[#allocation101_spill] sm:$0xff] %v6542_v47  ;;  %v1271_v50 = vrot.slane %v1269_v20, 1  ;;  %v1286_v2 = vshrl.u32 %v6396_v16, 16  ;;  %10549 = vst [vmem:[#allocation103_spill] sm:$0xff] %v6554_v61  ;;  %v1303_v20 = vor.u32 %v1302_v34, %v1298_v39 }
 0x148   : > { %v6510_v8 = vpop.permute.xlu1 %933  ;;  %v1314_v6 = vrot.slane %v1312_v27, 1  ;;  %v1317_v23 = vshll.u32 %v6542_v47, 16  ;;  %v6571_v39 = vld [vmem:[%s5650_s10 + $0x170] ss:$0 sps:$4 sm:$0x11]   ;;  %v1331_v7 = vrot.slane %v1329_v37, 1 }
 0x149   : > { %10541 = vst [vmem:[#allocation95_spill] sm:$0xff] %v6510_v8  ;;  %v6521_v17 = vpop.permute.xlu0 %931  ;;  %v1305_v8 = vshll.u32 %v6506_v53, 16  ;;  %v6557_v31 = vsel %vm485_vm0, %v1279_v52, %v1283_v28  ;;  %v6568_v28 = vsel %vm485_vm0, %v1267_v12, %v1271_v50  ;;  %v1291_v52 = vor.u32 %v1290_v15, %v1286_v2  ;;  %10553 = vst [vmem:[#allocation107_spill] sm:$0xff] %v6571_v39  ;;  %v6583_v2 = vld [vmem:[%s5650_s10 + $0x194] ss:$0 sps:$4 sm:$0x11]  }
 0x14a   : > { %10543 = vst [vmem:[#allocation97_spill] sm:$0xff] %v6521_v17  ;;  %1387 = vrot.lane.b32.xlu1 %v6502_v33, %s5545_s6  ;;  %10550 = vst [vmem:[#allocation104_spill] sm:$0xff] %v6557_v31  ;;  %v1353_v27 = vshll.u32 %v6554_v61, 16  ;;  %v1346_v12 = vshrl.u32 %v6425_v22, 16  ;;  %v1350_v50 = vrot.slane %v1348_v25, 1  ;;  %v1334_v37 = vshrl.u32 %v6438_v38, 16 }
 0x14b   : > { %1385 = vrot.lane.b32.xlu0 %v6514_v13, %s5545_s6  ;;  %v1307_v0 = vrot.slane %v1305_v8, 1  ;;  %10552 = vst [vmem:[#allocation106_spill] sm:$0xff] %v6568_v28  ;;  %v1295_v8 = vrot.slane %v1293_v42, 1  ;;  %10556 = vst [vmem:[#allocation110_spill] sm:$0xff] %v6583_v2  ;;  %v1372_v42 = vshll.u32 %v6451_v49, 16 }
 0x14c   : > { %v6536_v17 = vpop.permute.xlu1 %937  ;;  %v6596_v25 = vld [vmem:[%s5650_s10 + $0x188] ss:$0 sps:$4 sm:$0x11]  }
 0x14d   : > { %10546 = vst [vmem:[#allocation100_spill] sm:$0xff] %v6536_v17  ;;  %v6547_v36 = vpop.permute.xlu0 %935  ;;  %v1322_v17 = vshrl.u32 %v6403_v3, 16  ;;  %v6579_v60 = vsel %vm485_vm0, %v1303_v20, %v1307_v0  ;;  %v6592_v20 = vsel %vm485_vm0, %v1291_v52, %v1295_v8  ;;  %v1341_v0 = vshll.u32 %v6571_v39, 16  ;;  %10559 = vst [vmem:[#allocation113_spill] sm:$0xff] %v6596_v25 }
 0x14e   : > { %10548 = vst [vmem:[#allocation102_spill] sm:$0xff] %v6547_v36  ;;  %1391 = vrot.lane.b32.xlu1 %v6526_v1, %s5545_s6  ;;  %10555 = vst [vmem:[#allocation109_spill] sm:$0xff] %v6579_v60  ;;  %v1374_v52 = vrot.slane %v1372_v42, 1  ;;  %v1377_v8 = vshll.u32 %v6583_v2, 16 }
 0x14f   : > { %1389 = vrot.lane.b32.xlu0 %v6539_v56, %s5545_s6  ;;  %10558 = vst [vmem:[#allocation112_spill] sm:$0xff] %v6592_v20  ;;  %v1343_v46 = vrot.slane %v1341_v0, 1 }
 0x150   : > { %v6562_v36 = vpop.permute.xlu1 %941 }
 0x151   : > { %10551 = vst [vmem:[#allocation105_spill] sm:$0xff] %v6562_v36  ;;  %v6573_v34 = vpop.permute.xlu0 %939  ;;  %v1327_v36 = vor.u32 %v1326_v18, %v1322_v17  ;;  %v1315_v17 = vor.u32 %v1314_v6, %v1310_v32  ;;  %v1319_v18 = vrot.slane %v1317_v23, 1  ;;  %v1355_v23 = vrot.slane %v1353_v27, 1 }
 0x152   : > { %10554 = vst [vmem:[#allocation108_spill] sm:$0xff] %v6573_v34  ;;  %1395 = vrot.lane.b32.xlu1 %v6557_v31, %s5545_s6  ;;  %v1338_v34 = vrot.slane %v1336_v58, 1  ;;  %v1351_v6 = vor.u32 %v1350_v50, %v1346_v12  ;;  %v1370_v58 = vshrl.u32 %v6451_v49, 16  ;;  %v1365_v27 = vshll.u32 %v6596_v25, 16 }
 0x153   : > { %1393 = vrot.lane.b32.xlu0 %v6568_v28, %s5545_s6  ;;  %v6604_v32 = vsel %vm485_vm0, %v1327_v36, %v1331_v7  ;;  %v1358_v7 = vshrl.u32 %v6464_v29, 16  ;;  %v1362_v36 = vrot.slane %v1360_v9, 1 }
 0x154   : > { %v6588_v15 = vpop.permute.xlu1 %945  ;;  %v1339_v48 = vor.u32 %v1338_v34, %v1334_v37  ;;  %v6622_v50 = vsel %vm485_vm0, %v1351_v6, %v1355_v23  ;;  %v1375_v42 = vor.u32 %v1374_v52, %v1370_v58  ;;  %v1416_v23 = vrot.slane %v6333_v57, 1 }
 0x155   : > { %10557 = vst [vmem:[#allocation111_spill] sm:$0xff] %v6588_v15  ;;  %v6599_v51 = vpop.permute.xlu0 %943  ;;  %v1363_v9 = vor.u32 %v1362_v36, %v1358_v7  ;;  %v1417_v6 = vrot.slane %v6407_v4, 1  ;;  %v1414_v52 = vrot.slane %v6418_v44, 1  ;;  %v1422_v4 = vrot.slane %v6347_v62, 1 }
 0x156   : > { %10560 = vst [vmem:[#allocation114_spill] sm:$0xff] %v6599_v51  ;;  %1399 = vrot.lane.b32.xlu1 %v6579_v60, %s5545_s6  ;;  %v6613_v51 = vsel %vm485_vm0, %v1315_v17, %v1319_v18  ;;  %v6629_v17 = vsel %vm485_vm0, %v1339_v48, %v1343_v46  ;;  %v1367_v18 = vrot.slane %v1365_v27, 1  ;;  %v1413_v46 = vrot.slane %v6340_v54, 1 }
 0x157   : > { %1397 = vrot.lane.b32.xlu0 %v6592_v20, %s5545_s6  ;;  %10562 = vst [vmem:[#allocation116_spill] sm:$0xff] %v6613_v51  ;;  %v1423_v7 = vrot.slane %v6430_v19, 1  ;;  %v1419_v44 = vrot.slane %v6354_v41, 1  ;;  %v1420_v27 = vrot.slane %v6443_v26, 1 }
 0x158   : > { %v6610_v15 = vpop.permute.xlu1 %964  ;;  %v6645_v48 = vsel %vm485_vm0, %v1363_v9, %v1367_v18  ;;  %v1415_v54 = vsel %vm710_vm1, %v1413_v46, %v1414_v52  ;;  %v1428_v18 = vrot.slane %v6361_v59, 1  ;;  %v1425_v52 = vrot.slane %v6368_v55, 1 }
 0x159   : > { %10561 = vst [vmem:[#allocation115_spill] sm:$0xff] %v6610_v15  ;;  %v6617_v12 = vpop.permute.xlu0 %962  ;;  %v1379_v15 = vrot.slane %v1377_v8, 1  ;;  %v6670_v9 = vsel %vm710_vm1, %v1422_v4, %v1423_v7  ;;  %v6678_v46 = vsel %vm710_vm1, %v1419_v44, %v1420_v27  ;;  %v1434_v7 = vrot.slane %v6375_v14, 1 }
 0x15a   : > { %10563 = vst [vmem:[#allocation117_spill] sm:$0xff] %v6617_v12  ;;  %1403 = vrot.lane.b32.xlu1 %v6604_v32, %s5545_s6 }
 0x15b   : > { %1401 = vrot.lane.b32.xlu0 %v6613_v51, %s5545_s6  ;;  %v6636_v0 = vsel %vm485_vm0, %v1375_v42, %v1379_v15  ;;  %v6654_v15 = vsel %vm710_vm1, %v1416_v23, %v1417_v6  ;;  %v1429_v23 = vrot.slane %v6454_v45, 1 }
 0x15c   : > { %v6626_v34 = vpop.permute.xlu1 %968 }
 0x15d   : > { %10564 = vst [vmem:[#allocation118_spill] sm:$0xff] %v6626_v34  ;;  %v6631_v37 = vpop.permute.xlu0 %966  ;;  %v6687_v4 = vsel %vm710_vm1, %v1428_v18, %v1429_v23  ;;  %v1440_v23 = vrot.slane %v6389_v5, 1  ;;  %v1441_v34 = vrot.slane %v6506_v53, 1  ;;  %v1447_v53 = vrot.slane %v6529_v63, 1 }
 0x15e   : > { %10565 = vst [vmem:[#allocation119_spill] sm:$0xff] %v6631_v37  ;;  %1407 = vrot.lane.b32.xlu1 %v6622_v50, %s5545_s6  ;;  %v1453_v63 = vrot.slane %v6554_v61, 1  ;;  %v1459_v61 = vrot.slane %v6583_v2, 1 }
 0x15f   : > { %1405 = vrot.lane.b32.xlu0 %v6629_v17, %s5545_s6 }
 0x160   : > { %v6642_v58 = vpop.permute.xlu1 %972 }
 0x161   : > { %10566 = vst [vmem:[#allocation120_spill] sm:$0xff] %v6642_v58  ;;  %v6649_v8 = vpop.permute.xlu0 %970  ;;  %v1426_v58 = vrot.slane %v6467_v30, 1 }
 0x162   : > { %10567 = vst [vmem:[#allocation121_spill] sm:$0xff] %v6649_v8  ;;  %1411 = vrot.lane.b32.xlu1 %v6636_v0, %s5545_s6 }
 0x163   : > { %1409 = vrot.lane.b32.xlu0 %v6645_v48, %s5545_s6  ;;  %v6696_v27 = vsel %vm710_vm1, %v1425_v52, %v1426_v58 }
 0x164   : > { %v6660_v36 = vpop.permute.xlu1 %976 }
 0x165   : > { %v6665_v42 = vpop.permute.xlu0 %974 }
 0x166   : > { %1463 = vrot.lane.b32.xlu1 %v6654_v15, %s5546_s7 }
 0x167   : > { %1461 = vrot.lane.b32.xlu0 %v1415_v54, %s5546_s7  ;;  %v1435_v54 = vrot.slane %v6479_v35, 1  ;;  %v1450_v35 = vrot.slane %v6571_v39, 1 }
 0x168   : > { %v6675_v6 = vpop.permute.xlu1 %980 }
 0x169   : > { %10568 = vst [vmem:[#allocation122_spill] sm:$0xff] %v6675_v6  ;;  %v6682_v8 = vpop.permute.xlu0 %978  ;;  %v1432_v6 = vrot.slane %v6494_v11, 1  ;;  %v6705_v18 = vsel %vm710_vm1, %v1434_v7, %v1435_v54  ;;  %v6723_v7 = vsel %vm710_vm1, %v1440_v23, %v1441_v34  ;;  %v1446_v54 = vrot.slane %v6403_v3, 1 }
 0x16a   : > { %10569 = vst [vmem:[#allocation123_spill] sm:$0xff] %v6682_v8  ;;  %1467 = vrot.lane.b32.xlu1 %v6670_v9, %s5546_s7  ;;  %v1431_v8 = vrot.slane %v6382_v24, 1  ;;  %v1452_v23 = vrot.slane %v6425_v22, 1 }
 0x16b   : > { %1465 = vrot.lane.b32.xlu0 %v6678_v46, %s5546_s7  ;;  %v6741_v34 = vsel %vm710_vm1, %v1446_v54, %v1447_v53  ;;  %v1458_v54 = vrot.slane %v6451_v49, 1 }
 0x16c   : > { %v6693_v44 = vpop.permute.xlu1 %984  ;;  %v6714_v52 = vsel %vm710_vm1, %v1431_v8, %v1432_v6  ;;  %v6759_v53 = vsel %vm710_vm1, %v1452_v23, %v1453_v63 }
 0x16d   : > { %10570 = vst [vmem:[#allocation124_spill] sm:$0xff] %v6693_v44  ;;  %v6700_v37 = vpop.permute.xlu0 %982  ;;  %v1438_v44 = vrot.slane %v6518_v10, 1  ;;  %v6777_v63 = vsel %vm710_vm1, %v1458_v54, %v1459_v61 }
 0x16e   : > { %10571 = vst [vmem:[#allocation125_spill] sm:$0xff] %v6700_v37  ;;  %1471 = vrot.lane.b32.xlu1 %v6687_v4, %s5546_s7  ;;  %v1437_v37 = vrot.slane %v6396_v16, 1 }
 0x16f   : > { %1469 = vrot.lane.b32.xlu0 %v6696_v27, %s5546_s7 }
 0x170   : > { %v6711_v58 = vpop.permute.xlu1 %988  ;;  %v6732_v6 = vsel %vm710_vm1, %v1437_v37, %v1438_v44 }
 0x171   : > { %10572 = vst [vmem:[#allocation126_spill] sm:$0xff] %v6711_v58  ;;  %v6718_v12 = vpop.permute.xlu0 %986  ;;  %v1443_v58 = vrot.slane %v6414_v40, 1 }
 0x172   : > { %10573 = vst [vmem:[#allocation127_spill] sm:$0xff] %v6718_v12  ;;  %1475 = vrot.lane.b32.xlu1 %v6705_v18, %s5546_s7  ;;  %v1444_v12 = vrot.slane %v6542_v47, 1  ;;  %v1449_v47 = vrot.slane %v6438_v38, 1 }
 0x173   : > { %1473 = vrot.lane.b32.xlu0 %v6714_v52, %s5546_s7 }
 0x174   : > { %v6729_v8 = vpop.permute.xlu1 %992  ;;  %v6750_v44 = vsel %vm710_vm1, %v1443_v58, %v1444_v12  ;;  %v6768_v58 = vsel %vm710_vm1, %v1449_v47, %v1450_v35 }
 0x175   : > { %v6736_v10 = vpop.permute.xlu0 %990 }
 0x176   : > { %1479 = vrot.lane.b32.xlu1 %v6723_v7, %s5546_s7 }
 0x177   : > { %1477 = vrot.lane.b32.xlu0 %v6732_v6, %s5546_s7 }
 0x178   : > { %v6747_v37 = vpop.permute.xlu1 %999 }
 0x179   : > { %10574 = vst [vmem:[#allocation128_spill] sm:$0xff] %v6747_v37  ;;  %v6754_v11 = vpop.permute.xlu0 %997  ;;  %v1456_v37 = vrot.slane %v6596_v25, 1 }
 0x17a   : > { %10575 = vst [vmem:[#allocation129_spill] sm:$0xff] %v6754_v11  ;;  %1483 = vrot.lane.b32.xlu1 %v6741_v34, %s5546_s7  ;;  %v1455_v11 = vrot.slane %v6464_v29, 1 }
 0x17b   : > { %1481 = vrot.lane.b32.xlu0 %v6750_v44, %s5546_s7 }
 0x17c   : > { %v6765_v12 = vpop.permute.xlu1 %1003  ;;  %v6784_v35 = vsel %vm710_vm1, %v1455_v11, %v1456_v37 }
 0x17d   : > { %10576 = vst [vmem:[#allocation130_spill] sm:$0xff] %v6765_v12  ;;  %v6772_v39 = vpop.permute.xlu0 %1001  ;;  %v6847_v12 = vld [vmem:[%s5650_s10 + $0x198] sm:$0xff]  }
 0x17e   : > { %10577 = vst [vmem:[#allocation131_spill] sm:$0xff] %v6772_v39  ;;  %1487 = vrot.lane.b32.xlu1 %v6759_v53, %s5546_s7 }
 0x17f   : > { %1485 = vrot.lane.b32.xlu0 %v6768_v58, %s5546_s7 }
 0x180   : > { %v6781_v23 = vpop.permute.xlu1 %1007 }
 0x181   : > { %10578 = vst [vmem:[#allocation132_spill] sm:$0xff] %v6781_v23  ;;  %v6786_v47 = vpop.permute.xlu0 %1005 }
 0x182   : > { %10579 = vst [vmem:[#allocation133_spill] sm:$0xff] %v6786_v47  ;;  %1491 = vrot.lane.b32.xlu1 %v6777_v63, %s5546_s7 }
 0x183   : > { %1489 = vrot.lane.b32.xlu0 %v6784_v35, %s5546_s7  ;;  %s5549_s7 = smov 56  }
 0x184   : > { %v6792_v39 = vpop.permute.xlu1 %1011 }
 0x185   : > { %v6794_v61 = vpop.permute.xlu0 %1009 }
 0x186   : > { %1500 = vrot.lane.b32.xlu1 %v6354_v41, %s5547_s8 }
 0x187   : > { %1498 = vrot.lane.b32.xlu0 %v6333_v57, %s5547_s8 }
 0x188   : > { %v6800_v11 = vpop.permute.xlu1 %1015 }
 0x189   : > { %10580 = vst [vmem:[#allocation134_spill] sm:$0xff] %v6800_v11  ;;  %v6802_v37 = vpop.permute.xlu0 %1013 }
 0x18a   : > { %10581 = vst [vmem:[#allocation135_spill] sm:$0xff] %v6802_v37  ;;  %1504 = vrot.lane.b32.xlu1 %v6368_v55, %s5547_s8 }
 0x18b   : > { %1502 = vrot.lane.b32.xlu0 %v6347_v62, %s5547_s8 }
 0x18c   : > { %v6808_v54 = vpop.permute.xlu1 %1019 }
 0x18d   : > { %10582 = vst [vmem:[#allocation136_spill] sm:$0xff] %v6808_v54  ;;  %v6810_v23 = vpop.permute.xlu0 %1017 }
 0x18e   : > { %10583 = vst [vmem:[#allocation137_spill] sm:$0xff] %v6810_v23  ;;  %1508 = vrot.lane.b32.xlu1 %v6382_v24, %s5547_s8 }
 0x18f   : > { %1506 = vrot.lane.b32.xlu0 %v6361_v59, %s5547_s8 }
 0x190   : > { %v6816_v57 = vpop.permute.xlu1 %1023 }
 0x191   : > { %10584 = vst [vmem:[#allocation138_spill] sm:$0xff] %v6816_v57  ;;  %v6818_v47 = vpop.permute.xlu0 %1021 }
 0x192   : > { %10585 = vst [vmem:[#allocation139_spill] sm:$0xff] %v6818_v47  ;;  %1512 = vrot.lane.b32.xlu1 %v6396_v16, %s5547_s8 }
 0x193   : > { %1510 = vrot.lane.b32.xlu0 %v6375_v14, %s5547_s8 }
 0x194   : > { %v6824_v54 = vpop.permute.xlu1 %1027 }
 0x195   : > { %v6826_v23 = vpop.permute.xlu0 %1025 }
 0x196   : > { %10586 = vst [vmem:[#allocation140_spill] sm:$0xff] %v6826_v23  ;;  %1516 = vrot.lane.b32.xlu1 %v6414_v40, %s5547_s8  ;;  %v1536_v23 = vshll.u32 %v6847_v12, 16 }
 0x197   : > { %1514 = vrot.lane.b32.xlu0 %v6389_v5, %s5547_s8 }
 0x198   : > { %v6832_v37 = vpop.permute.xlu1 %1111 }
 0x199   : > { %10587 = vst [vmem:[#allocation141_spill] sm:$0xff] %v6832_v37  ;;  %v6834_v57 = vpop.permute.xlu0 %1109 }
 0x19a   : > { %10588 = vst [vmem:[#allocation142_spill] sm:$0xff] %v6834_v57  ;;  %1520 = vrot.lane.b32.xlu1 %v6438_v38, %s5547_s8 }
 0x19b   : > { %1518 = vrot.lane.b32.xlu0 %v6403_v3, %s5547_s8 }
 0x19c   : > { %v6840_v47 = vpop.permute.xlu1 %1115 }
 0x19d   : > { %10589 = vst [vmem:[#allocation143_spill] sm:$0xff] %v6840_v47  ;;  %v6842_v11 = vpop.permute.xlu0 %1113 }
 0x19e   : > { %10590 = vst [vmem:[#allocation144_spill] sm:$0xff] %v6842_v11  ;;  %1524 = vrot.lane.b32.xlu1 %v6464_v29, %s5547_s8 }
 0x19f   : > { %1522 = vrot.lane.b32.xlu0 %v6425_v22, %s5547_s8 }
 0x1a0   : > { %v6851_v37 = vpop.permute.xlu1 %1119 }
 0x1a1   : > { %10591 = vst [vmem:[#allocation145_spill] sm:$0xff] %v6851_v37  ;;  %v6853_v57 = vpop.permute.xlu0 %1117 }
 0x1a2   : > { %10592 = vst [vmem:[#allocation146_spill] sm:$0xff] %v6853_v57  ;;  %1528 = vrot.lane.b32.xlu1 %v6847_v12, %s5547_s8 }
 0x1a3   : > { %1526 = vrot.lane.b32.xlu0 %v6451_v49, %s5547_s8  ;;  %s5550_s8 = smov 60  }
 0x1a4   : > { %v6859_v47 = vpop.permute.xlu1 %1123 }
 0x1a5   : > { %v6861_v11 = vpop.permute.xlu0 %1121 }
 0x1a6   : > { %1547 = vrot.lane.b32.xlu1 %v6514_v13, %s5548_s9 }
 0x1a7   : > { %1545 = vrot.lane.b32.xlu0 %v6482_v43, %s5548_s9 }
 0x1a8   : > { %v6867_v37 = vpop.permute.xlu1 %1127 }
 0x1a9   : > { %10593 = vst [vmem:[#allocation147_spill] sm:$0xff] %v6867_v37  ;;  %v6869_v57 = vpop.permute.xlu0 %1125 }
 0x1aa   : > { %10594 = vst [vmem:[#allocation148_spill] sm:$0xff] %v6869_v57  ;;  %1551 = vrot.lane.b32.xlu1 %v6539_v56, %s5548_s9  ;;  %v6890_v57 = vld [vmem:[%s5650_s10 + $0x1a0] ss:$0 sps:$4 sm:$0x11]  }
 0x1ab   : > { %1549 = vrot.lane.b32.xlu0 %v6502_v33, %s5548_s9 }
 0x1ac   : > { %v6875_v2 = vpop.permute.xlu1 %1131 }
 0x1ad   : > { %10595 = vst [vmem:[#allocation149_spill] sm:$0xff] %v6875_v2  ;;  %v6877_v25 = vpop.permute.xlu0 %1129 }
 0x1ae   : > { %10596 = vst [vmem:[#allocation150_spill] sm:$0xff] %v6877_v25  ;;  %1555 = vrot.lane.b32.xlu1 %v6568_v28, %s5548_s9  ;;  %v1541_v28 = vshll.u32 %v6890_v57, 16 }
 0x1af   : > { %1553 = vrot.lane.b32.xlu0 %v6526_v1, %s5548_s9 }
 0x1b0   : > { %v6883_v43 = vpop.permute.xlu1 %1135 }
 0x1b1   : > { %10597 = vst [vmem:[#allocation151_spill] sm:$0xff] %v6883_v43  ;;  %v6885_v37 = vpop.permute.xlu0 %1133  ;;  %v1534_v43 = vshrl.u32 %v6847_v12, 16 }
 0x1b2   : > { %10598 = vst [vmem:[#allocation152_spill] sm:$0xff] %v6885_v37  ;;  %1559 = vrot.lane.b32.xlu1 %v6592_v20, %s5548_s9  ;;  %v1538_v37 = vrot.slane %v1536_v23, 1 }
 0x1b3   : > { %1557 = vrot.lane.b32.xlu0 %v6557_v31, %s5548_s9 }
 0x1b4   : > { %v6895_v2 = vpop.permute.xlu1 %1139  ;;  %v1539_v31 = vor.u32 %v1538_v37, %v1534_v43 }
 0x1b5   : > { %v6897_v25 = vpop.permute.xlu0 %1137 }
 0x1b6   : > { %10599 = vst [vmem:[#allocation153_spill] sm:$0xff] %v6897_v25  ;;  %1563 = vrot.lane.b32.xlu1 %v6613_v51, %s5548_s9  ;;  %v1543_v25 = vrot.slane %v1541_v28, 1 }
 0x1b7   : > { %1561 = vrot.lane.b32.xlu0 %v6579_v60, %s5548_s9 }
 0x1b8   : > { %v6905_v20 = vpop.permute.xlu1 %1383  ;;  %v6920_v60 = vsel %vm485_vm0, %v1539_v31, %v1543_v25 }
 0x1b9   : > { %10600 = vst [vmem:[#allocation154_spill] sm:$0xff] %v6905_v20  ;;  %v6907_v1 = vpop.permute.xlu0 %1381 }
 0x1ba   : > { %10601 = vst [vmem:[#allocation155_spill] sm:$0xff] %v6907_v1  ;;  %1567 = vrot.lane.b32.xlu1 %v6629_v17, %s5548_s9 }
 0x1bb   : > { %1565 = vrot.lane.b32.xlu0 %v6604_v32, %s5548_s9 }
 0x1bc   : > { %v6913_v51 = vpop.permute.xlu1 %1387 }
 0x1bd   : > { %10602 = vst [vmem:[#allocation156_spill] sm:$0xff] %v6913_v51  ;;  %v6915_v23 = vpop.permute.xlu0 %1385 }
 0x1be   : > { %10603 = vst [vmem:[#allocation157_spill] sm:$0xff] %v6915_v23  ;;  %1571 = vrot.lane.b32.xlu1 %v6645_v48, %s5548_s9 }
 0x1bf   : > { %1569 = vrot.lane.b32.xlu0 %v6622_v50, %s5548_s9 }
 0x1c0   : > { %v6924_v20 = vpop.permute.xlu1 %1391 }
 0x1c1   : > { %10604 = vst [vmem:[#allocation158_spill] sm:$0xff] %v6924_v20  ;;  %v6926_v37 = vpop.permute.xlu0 %1389 }
 0x1c2   : > { %10605 = vst [vmem:[#allocation159_spill] sm:$0xff] %v6926_v37  ;;  %1575 = vrot.lane.b32.xlu1 %v6920_v60, %s5548_s9 }
 0x1c3   : > { %1573 = vrot.lane.b32.xlu0 %v6636_v0, %s5548_s9 }
 0x1c4   : > { %v6932_v28 = vpop.permute.xlu1 %1395 }
 0x1c5   : > { %v6934_v43 = vpop.permute.xlu0 %1393 }
 0x1c6   : > { %1582 = vrot.lane.b32.xlu1 %v6678_v46, %s5549_s7 }
 0x1c7   : > { %1580 = vrot.lane.b32.xlu0 %v6654_v15, %s5549_s7 }
 0x1c8   : > { %v6940_v31 = vpop.permute.xlu1 %1399 }
 0x1c9   : > { %10606 = vst [vmem:[#allocation160_spill] sm:$0xff] %v6940_v31  ;;  %v6942_v25 = vpop.permute.xlu0 %1397  ;;  %v7686_v31 = vld [vmem:[%s5650_s10 + $0x1dc] ss:$0 sps:$4 sm:$0x11]  }
 0x1ca   : > { %10607 = vst [vmem:[#allocation161_spill] sm:$0xff] %v6942_v25  ;;  %1586 = vrot.lane.b32.xlu1 %v6696_v27, %s5549_s7  ;;  %10749 = vst [vmem:[#allocation218_spill] sm:$0xff] %v7686_v31 }
 0x1cb   : > { %1584 = vrot.lane.b32.xlu0 %v6670_v9, %s5549_s7 }
 0x1cc   : > { %v6948_v20 = vpop.permute.xlu1 %1403 }
 0x1cd   : > { %10608 = vst [vmem:[#allocation162_spill] sm:$0xff] %v6948_v20  ;;  %v6950_v37 = vpop.permute.xlu0 %1401 }
 0x1ce   : > { %10609 = vst [vmem:[#allocation163_spill] sm:$0xff] %v6950_v37  ;;  %1590 = vrot.lane.b32.xlu1 %v6714_v52, %s5549_s7 }
 0x1cf   : > { %1588 = vrot.lane.b32.xlu0 %v6687_v4, %s5549_s7 }
 0x1d0   : > { %v6956_v15 = vpop.permute.xlu1 %1407 }
 0x1d1   : > { %10610 = vst [vmem:[#allocation164_spill] sm:$0xff] %v6956_v15  ;;  %v6958_v46 = vpop.permute.xlu0 %1405 }
 0x1d2   : > { %10611 = vst [vmem:[#allocation165_spill] sm:$0xff] %v6958_v46  ;;  %1594 = vrot.lane.b32.xlu1 %v6732_v6, %s5549_s7  ;;  %v1577_v6 = vrot.slane %v6847_v12, 1 }
 0x1d3   : > { %1592 = vrot.lane.b32.xlu0 %v6705_v18, %s5549_s7  ;;  %v1578_v18 = vrot.slane %v6890_v57, 1 }
 0x1d4   : > { %v6964_v9 = vpop.permute.xlu1 %1411 }
 0x1d5   : > { %v6966_v27 = vpop.permute.xlu0 %1409 }
 0x1d6   : > { %1598 = vrot.lane.b32.xlu1 %v6750_v44, %s5549_s7 }
 0x1d7   : > { %1596 = vrot.lane.b32.xlu0 %v6723_v7, %s5549_s7  ;;  %v1579_v7 = vsel %vm710_vm1, %v1577_v6, %v1578_v18  ;;  %vm10445_vm1 = vcmask 490496  }
 0x1d8   : > { %v6972_v4 = vpop.permute.xlu1 %1463 }
 0x1d9   : > { %10612 = vst [vmem:[#allocation166_spill] sm:$0xff] %v6972_v4  ;;  %v6974_v52 = vpop.permute.xlu0 %1461 }
 0x1da   : > { %10613 = vst [vmem:[#allocation167_spill] sm:$0xff] %v6974_v52  ;;  %1602 = vrot.lane.b32.xlu1 %v6768_v58, %s5549_s7 }
 0x1db   : > { %1600 = vrot.lane.b32.xlu0 %v6741_v34, %s5549_s7 }
 0x1dc   : > { %v6982_v15 = vpop.permute.xlu1 %1467 }
 0x1dd   : > { %10614 = vst [vmem:[#allocation168_spill] sm:$0xff] %v6982_v15  ;;  %v6984_v44 = vpop.permute.xlu0 %1465 }
 0x1de   : > { %10615 = vst [vmem:[#allocation169_spill] sm:$0xff] %v6984_v44  ;;  %1606 = vrot.lane.b32.xlu1 %v6784_v35, %s5549_s7 }
 0x1df   : > { %1604 = vrot.lane.b32.xlu0 %v6759_v53, %s5549_s7 }
 0x1e0   : > { %v6991_v58 = vpop.permute.xlu1 %1471 }
 0x1e1   : > { %10616 = vst [vmem:[#allocation170_spill] sm:$0xff] %v6991_v58  ;;  %v6993_v46 = vpop.permute.xlu0 %1469  ;;  %v10628_v58 = vld [vmem:[#allocation42_spill] sm:$0xff] }
 0x1e2   : > { %10617 = vst [vmem:[#allocation171_spill] sm:$0xff] %v6993_v46  ;;  %1610 = vrot.lane.b32.xlu1 %v1579_v7, %s5549_s7 }
 0x1e3   : > { %1608 = vrot.lane.b32.xlu0 %v6777_v63, %s5549_s7  ;;  %s4961_s7 = sshll.u32 %s5518_s15, 5 }
 0x1e4   : > { %v6998_v34 = vpop.permute.xlu1 %1475 }
 0x1e5   : > { %v7000_v15 = vpop.permute.xlu0 %1473 }
 0x1e6   : > { %1619 = vrot.lane.b32.xlu1 %v6347_v62, %s5550_s8 }
 0x1e7   : > { %1617 = vrot.lane.b32.xlu0 %v6354_v41, %s5550_s8 }
 0x1e8   : > { %v7006_v53 = vpop.permute.xlu1 %1479 }
 0x1e9   : > { %10618 = vst [vmem:[#allocation172_spill] sm:$0xff] %v7006_v53  ;;  %v7008_v35 = vpop.permute.xlu0 %1477  ;;  %v7675_v53 = vld [vmem:[%s5650_s10 + $0x1d0] ss:$0 sps:$4 sm:$0x11]  }
 0x1ea   : > { %10619 = vst [vmem:[#allocation173_spill] sm:$0xff] %v7008_v35  ;;  %1623 = vrot.lane.b32.xlu1 %v6361_v59, %s5550_s8 }
 0x1eb   : > { %1621 = vrot.lane.b32.xlu0 %v6368_v55, %s5550_s8 }
 0x1ec   : > { %v7014_v63 = vpop.permute.xlu1 %1483 }
 0x1ed   : > { %10620 = vst [vmem:[#allocation174_spill] sm:$0xff] %v7014_v63  ;;  %v7016_v6 = vpop.permute.xlu0 %1481 }
 0x1ee   : > { %10621 = vst [vmem:[#allocation175_spill] sm:$0xff] %v7016_v6  ;;  %1627 = vrot.lane.b32.xlu1 %v6375_v14, %s5550_s8 }
 0x1ef   : > { %1625 = vrot.lane.b32.xlu0 %v6382_v24, %s5550_s8  ;;  %v5382_v24 = vld [vmem:[%s5650_s10 + $0x54] sm:$0xff]  }
 0x1f0   : > { %v7022_v62 = vpop.permute.xlu1 %1487 }
 0x1f1   : > { %10622 = vst [vmem:[#allocation176_spill] sm:$0xff] %v7022_v62  ;;  %v7024_v41 = vpop.permute.xlu0 %1485 }
 0x1f2   : > { %10623 = vst [vmem:[#allocation177_spill] sm:$0xff] %v7024_v41  ;;  %1631 = vrot.lane.b32.xlu1 %v6389_v5, %s5550_s8  ;;  %v1665_v5 = vsel %vm1649_vm2, %v5382_v24, %v6063_v21  ;;  %v10630_v24 = vld [vmem:[#allocation27_spill] sm:$0xff]  ;;  %v10631_v41 = vld [vmem:[#allocation58_spill] sm:$0xff] }
 0x1f3   : > { %1629 = vrot.lane.b32.xlu0 %v6396_v16, %s5550_s8  ;;  %v10626_v16 = vld [vmem:[#allocation26_spill] sm:$0xff] }
 0x1f4   : > { %v7030_v59 = vpop.permute.xlu1 %1491  ;;  %v1698_v7 = vsel %vm1682_vm3, %v1665_v5, %v10626_v16  ;;  %v10632_v16 = vld [vmem:[#allocation43_spill] sm:$0xff] }
 0x1f5   : > { %v7032_v55 = vpop.permute.xlu0 %1489  ;;  %v1731_v46 = vsel %vm1715_vm4, %v1698_v7, %v10628_v58  ;;  %v10635_v7 = vld [vmem:[#allocation59_spill] sm:$0xff] }
 0x1f6   : > { %1635 = vrot.lane.b32.xlu1 %v6403_v3, %s5550_s8  ;;  %v5383_v3 = vld [vmem:[%s5650_s10 + $0x48] sm:$0xff]   ;;  %v1764_v5 = vsel %vm1748_vm5, %v1731_v46, %v10631_v41  ;;  %v10637_v41 = vld [vmem:[#allocation75_spill] sm:$0xff] }
 0x1f7   : > { %1633 = vrot.lane.b32.xlu0 %v6414_v40, %s5550_s8  ;;  %v10627_v40 = vld [vmem:[#allocation11_spill] sm:$0xff] }
 0x1f8   : > { %v7038_v14 = vpop.permute.xlu1 %1500  ;;  %v1663_v62 = vsel %vm1649_vm2, %v5383_v3, %v10627_v40  ;;  %v10633_v3 = vld [vmem:[#allocation74_spill] sm:$0xff] }
 0x1f9   : > { %10624 = vst [vmem:[#allocation178_spill] sm:$0xff] %v7038_v14  ;;  %v7043_v18 = vpop.permute.xlu0 %1498  ;;  %v1797_v40 = vsel %vm1781_vm6, %v1764_v5, %v10633_v3 }
 0x1fa   : > { %10625 = vst [vmem:[#allocation179_spill] sm:$0xff] %v7043_v18  ;;  %1639 = vrot.lane.b32.xlu1 %v6425_v22, %s5550_s8  ;;  %v1696_v22 = vsel %vm1682_vm3, %v1663_v62, %v10630_v24  ;;  %v10636_v24 = vld [vmem:[#allocation91_spill] sm:$0xff] }
 0x1fb   : > { %1637 = vrot.lane.b32.xlu0 %v6438_v38, %s5550_s8  ;;  %v1729_v51 = vsel %vm1715_vm4, %v1696_v22, %v10632_v16  ;;  %v7071_v38 = vld [vmem:[%s5650_s10 + $0x1a4] sm:$0xff]   ;;  %v1830_v46 = vsel %vm1814_vm7, %v1797_v40, %v10636_v24 }
 0x1fc   : > { %v7056_v21 = vpop.permute.xlu1 %1504  ;;  %v1762_v62 = vsel %vm1748_vm5, %v1729_v51, %v10635_v7  ;;  %v1863_v5 = vsel %vm10447_vm8, %v1830_v46, %v6660_v36  ;;  %v10639_v16 = vld [vmem:[#allocation93_spill] sm:$0xff] }
 0x1fd   : > { %10629 = vst [vmem:[#allocation26_spill] sm:$0xff] %v7056_v21  ;;  %v7066_v58 = vpop.permute.xlu0 %1502  ;;  %v1795_v22 = vsel %vm1781_vm6, %v1762_v62, %v10637_v41  ;;  %v1896_v51 = vsel %vm10446_vm9, %v1863_v5, %v6792_v39  ;;  %v10642_v41 = vld [vmem:[#allocation18_spill] sm:$0xff] }
 0x1fe   : > { %10634 = vst [vmem:[#allocation11_spill] sm:$0xff] %v7066_v58  ;;  %1643 = vrot.lane.b32.xlu1 %v6451_v49, %s5550_s8  ;;  %v1828_v3 = vsel %vm1814_vm7, %v1795_v22, %v10639_v16  ;;  %v1929_v7 = vsel %vm1913_vm10, %v1896_v51, %v6859_v47  ;;  %v10644_v16 = vld [vmem:[#allocation34_spill] sm:$0xff]  ;;  %v10645_v51 = vld [vmem:[#allocation19_spill] sm:$0xff] }
 0x1ff   : > { %1641 = vrot.lane.b32.xlu0 %v6464_v29, %s5550_s8  ;;  %v1861_v40 = vsel %vm10447_vm8, %v1828_v3, %v6665_v42  ;;  %v2147_v29 = vshrl.u32 %v6443_v26, 16  ;;  %v1962_v39 = vsel %vm1946_vm11, %v1929_v7, %v6932_v28  ;;  %v5385_v3 = vld [vmem:[%s5650_s10 + $0xa8] sm:$0xff]  }
 0x200   : > { %v7083_v49 = vpop.permute.xlu1 %1508  ;;  %v1894_v62 = vsel %vm10446_vm9, %v1861_v40, %v6794_v61  ;;  %v1995_v47 = vsel %vm1979_vm12, %v1962_v39, %v6998_v34  ;;  %v1679_v40 = vsel %vm1649_vm2, %v5385_v3, %v10645_v51 }
 0x201   : > { %10638 = vst [vmem:[#allocation42_spill] sm:$0xff] %v7083_v49  ;;  %v7093_v36 = vpop.permute.xlu0 %1506  ;;  %v1927_v42 = vsel %vm1913_vm10, %v1894_v62, %v6861_v11  ;;  %v2149_v11 = vshrl.u32 %v6430_v19, 16  ;;  %v10648_v62 = vld [vmem:[#allocation35_spill] sm:$0xff] }
 0x202   : > { %10640 = vst [vmem:[#allocation27_spill] sm:$0xff] %v7093_v36  ;;  %1647 = vrot.lane.b32.xlu1 %v7071_v38, %s5550_s8  ;;  %v1960_v26 = vsel %vm1946_vm11, %v1927_v42, %v6934_v43  ;;  %v5384_v43 = vld [vmem:[%s5650_s10 + $0xb4] sm:$0xff]   ;;  %v1712_v39 = vsel %vm1682_vm3, %v1679_v40, %v10648_v62  ;;  %v10649_v42 = vld [vmem:[#allocation66_spill] sm:$0xff] }
 0x203   : > { %1645 = vrot.lane.b32.xlu0 %v6847_v12, %s5550_s8  ;;  %v1993_v28 = vsel %vm1979_vm12, %v1960_v26, %v7000_v15  ;;  %v1681_v22 = vsel %vm1649_vm2, %v5384_v43, %v10642_v41  ;;  %v2151_v15 = vshrl.u32 %v6467_v30, 16  ;;  %v10651_v26 = vld [vmem:[#allocation82_spill] sm:$0xff]  ;;  %v10654_v41 = vld [vmem:[#allocation111_spill] sm:$0xff] }
 0x204   : > { %v1513_v24 = vpop.permute.xlu1 %1512  ;;  %v1714_v19 = vsel %vm1682_vm3, %v1681_v22, %v10644_v16  ;;  %v10655_v16 = vld [vmem:[#allocation83_spill] sm:$0xff] }
 0x205   : > { %v7111_v61 = vsel %vm2012_vm13, %v1995_v47, %v1513_v24  ;;  %v1511_v46 = vpop.permute.xlu0 %1510  ;;  %v10650_v47 = vld [vmem:[#allocation51_spill] sm:$0xff] }
 0x206   : > { %2193 = vrot.lane.b32.xlu1 %v2147_v29, %s5536_s11  ;;  %v7118_v34 = vsel %vm2012_vm13, %v1993_v28, %v1511_v46  ;;  %v1745_v24 = vsel %vm1715_vm4, %v1712_v39, %v10650_v47  ;;  %v10660_v39 = vld [vmem:[#allocation140_spill] sm:$0xff]  ;;  %v10661_v47 = vld [vmem:[#allocation153_spill] sm:$0xff] }
 0x207   : > { %2191 = vrot.lane.b32.xlu0 %v6514_v13, %s5536_s11  ;;  %v10646_v13 = vld [vmem:[#allocation50_spill] sm:$0xff] }
 0x208   : > { %v7122_v12 = vpop.permute.xlu1 %1516  ;;  %v1747_v7 = vsel %vm1715_vm4, %v1714_v19, %v10646_v13 }
 0x209   : > { %10641 = vst [vmem:[#allocation58_spill] sm:$0xff] %v7122_v12  ;;  %v7127_v5 = vpop.permute.xlu0 %1514  ;;  %v1780_v30 = vsel %vm1748_vm5, %v1747_v7, %v10649_v42 }
 0x20a   : > { %10643 = vst [vmem:[#allocation43_spill] sm:$0xff] %v7127_v5  ;;  %2197 = vrot.lane.b32.xlu1 %v2149_v11, %s5536_s11  ;;  %v1813_v28 = vsel %vm1781_vm6, %v1780_v30, %v10651_v26  ;;  %v10653_v11 = vld [vmem:[#allocation67_spill] sm:$0xff] }
 0x20b   : > { %2195 = vrot.lane.b32.xlu0 %v6502_v33, %s5536_s11  ;;  %v2153_v33 = vshrl.u32 %v6454_v45, 16  ;;  %v1778_v43 = vsel %vm1748_vm5, %v1745_v24, %v10653_v11  ;;  %v1846_v22 = vsel %vm1814_vm7, %v1813_v28, %v10654_v41 }
 0x20c   : > { %v7140_v29 = vpop.permute.xlu1 %1520  ;;  %v1811_v19 = vsel %vm1781_vm6, %v1778_v43, %v10655_v16  ;;  %v1879_v3 = vsel %vm10447_vm8, %v1846_v22, %v6729_v8  ;;  %v10659_v8 = vld [vmem:[#allocation92_spill] sm:$0xff] }
 0x20d   : > { %10647 = vst [vmem:[#allocation74_spill] sm:$0xff] %v7140_v29  ;;  %v7150_v46 = vpop.permute.xlu0 %1518  ;;  %v1912_v40 = vsel %vm10446_vm9, %v1879_v3, %v6824_v54  ;;  %v7456_v29 = vld [vmem:[%s5650_s10 + $0x21c] sm:$0xff]  }
 0x20e   : > { %10652 = vst [vmem:[#allocation59_spill] sm:$0xff] %v7150_v46  ;;  %2201 = vrot.lane.b32.xlu1 %v2151_v15, %s5536_s11  ;;  %v10657_v15 = vld [vmem:[#allocation114_spill] sm:$0xff]  ;;  %v1945_v7 = vsel %vm1913_vm10, %v1912_v40, %v6895_v2  ;;  %v10369_v63 = vshrl.u32 %v7456_v29, 16 }
 0x20f   : > { %2199 = vrot.lane.b32.xlu0 %v6539_v56, %s5536_s11  ;;  %v1844_v45 = vsel %vm1814_vm7, %v1811_v19, %v10657_v15  ;;  %v2155_v56 = vshrl.u32 %v10659_v8, 16  ;;  %v1978_v30 = vsel %vm1946_vm11, %v1945_v7, %v6964_v9  ;;  %v10662_v2 = vld [vmem:[#allocation98_spill] sm:$0xff] }
 0x210   : > { %v7164_v51 = vpop.permute.xlu1 %1524  ;;  %v1877_v13 = vsel %vm10447_vm8, %v1844_v45, %v6736_v10  ;;  %v2011_v10 = vsel %vm1979_vm12, %v1978_v30, %v7030_v59  ;;  %v10663_v9 = vld [vmem:[#allocation90_spill] sm:$0xff] }
 0x211   : > { %10656 = vst [vmem:[#allocation91_spill] sm:$0xff] %v7164_v51  ;;  %v7174_v62 = vpop.permute.xlu0 %1522  ;;  %v1910_v42 = vsel %vm10446_vm9, %v1877_v13, %v10660_v39  ;;  %v2157_v43 = vshrl.u32 %v10663_v9, 16  ;;  %v10664_v59 = vld [vmem:[#allocation106_spill] sm:$0xff]  ;;  %v10672_v13 = vld [vmem:[#allocation112_spill] sm:$0xff] }
 0x212   : > { %10658 = vst [vmem:[#allocation75_spill] sm:$0xff] %v7174_v62  ;;  %2205 = vrot.lane.b32.xlu1 %v2153_v33, %s5536_s11  ;;  %v1943_v54 = vsel %vm1913_vm10, %v1910_v42, %v10661_v47  ;;  %v10671_v45 = vld [vmem:[#allocation94_spill] sm:$0xff]  ;;  %v10676_v42 = vld [vmem:[#allocation109_spill] sm:$0xff] }
 0x213   : > { %2203 = vrot.lane.b32.xlu0 %v10662_v2, %s5536_s11  ;;  %v1976_v26 = vsel %vm1946_vm11, %v1943_v54, %v6966_v27  ;;  %v10667_v27 = vld [vmem:[#allocation96_spill] sm:$0xff]  ;;  %v2161_v40 = vshrl.u32 %v10671_v45, 16  ;;  %v10687_v45 = vld [vmem:[#allocation113_spill] sm:$0xff] }
 0x214   : > { %v1529_v24 = vpop.permute.xlu1 %1528  ;;  %v2009_v33 = vsel %vm1979_vm12, %v1976_v26, %v7032_v55  ;;  %v2159_v19 = vshrl.u32 %v10667_v27, 16  ;;  %v10668_v55 = vld [vmem:[#allocation104_spill] sm:$0xff] }
 0x215   : > { %v2044_v28 = vsel %vm2012_vm13, %v2011_v10, %v1529_v24  ;;  %v1527_v11 = vpop.permute.xlu0 %1526  ;;  %v10677_v10 = vld [vmem:[#allocation99_spill] sm:$0xff]  ;;  %v10678_v26 = vld [vmem:[#allocation116_spill] sm:$0xff] }
 0x216   : > { %2209 = vrot.lane.b32.xlu1 %v2155_v56, %s5536_s11  ;;  %v2042_v41 = vsel %vm2012_vm13, %v2009_v33, %v1527_v11  ;;  %v10675_v56 = vld [vmem:[#allocation101_spill] sm:$0xff]  ;;  %v2165_v2 = vshrl.u32 %v10677_v10, 16  ;;  %v7273_v10 = vld [vmem:[%s5650_s10 + $0x1b0] sm:$0xff]  }
 0x217   : > { %2207 = vrot.lane.b32.xlu0 %v10664_v59, %s5536_s11  ;;  %v2163_v39 = vshrl.u32 %v10675_v56, 16  ;;  %v5338_v56 = vld [vmem:[%s5650_s10 + $0x1ac] ss:$0 sps:$4 sm:$0x11]  }
 0x218   : > { %v7198_v22 = vpop.permute.xlu1 %1547 }
 0x219   : > { %10665 = vst [vmem:[#allocation93_spill] sm:$0xff] %v7198_v22  ;;  %v7200_v16 = vpop.permute.xlu0 %1545 }
 0x21a   : > { %10666 = vst [vmem:[#allocation18_spill] sm:$0xff] %v7200_v16  ;;  %2213 = vrot.lane.b32.xlu1 %v2157_v43, %s5536_s11 }
 0x21b   : > { %2211 = vrot.lane.b32.xlu0 %v10668_v55, %s5536_s11 }
 0x21c   : > { %v7206_v3 = vpop.permute.xlu1 %1551 }
 0x21d   : > { %10669 = vst [vmem:[#allocation34_spill] sm:$0xff] %v7206_v3  ;;  %v7208_v15 = vpop.permute.xlu0 %1549 }
 0x21e   : > { %10670 = vst [vmem:[#allocation19_spill] sm:$0xff] %v7208_v15  ;;  %2217 = vrot.lane.b32.xlu1 %v2159_v19, %s5536_s11 }
 0x21f   : > { %2215 = vrot.lane.b32.xlu0 %v10672_v13, %s5536_s11 }
 0x220   : > { %v7214_v7 = vpop.permute.xlu1 %1555 }
 0x221   : > { %10673 = vst [vmem:[#allocation50_spill] sm:$0xff] %v7214_v7  ;;  %v7216_v8 = vpop.permute.xlu0 %1553 }
 0x222   : > { %10674 = vst [vmem:[#allocation35_spill] sm:$0xff] %v7216_v8  ;;  %2221 = vrot.lane.b32.xlu1 %v2161_v40, %s5536_s11 }
 0x223   : > { %2219 = vrot.lane.b32.xlu0 %v10676_v42, %s5536_s11  ;;  %v10688_v42 = vld [vmem:[#allocation110_spill] sm:$0xff] }
 0x224   : > { %v1560_v30 = vpop.permute.xlu1 %1559 }
 0x225   : > { %v7224_v47 = vsel %vm2045_vm14, %v7111_v61, %v1560_v30  ;;  %v1558_v54 = vpop.permute.xlu0 %1557  ;;  %v10681_v61 = vld [vmem:[#allocation107_spill] sm:$0xff]  ;;  %v2173_v30 = vshrl.u32 %v10688_v42, 16 }
 0x226   : > { %2225 = vrot.lane.b32.xlu1 %v2163_v39, %s5536_s11  ;;  %v7230_v24 = vsel %vm2045_vm14, %v7118_v34, %v1558_v54  ;;  %v2167_v9 = vshrl.u32 %v10681_v61, 16  ;;  %v10684_v34 = vld [vmem:[#allocation103_spill] sm:$0xff]  ;;  %v2180_v39 = vshll.u32 %v7071_v38, 16 }
 0x227   : > { %2223 = vrot.lane.b32.xlu0 %v10678_v26, %s5536_s11  ;;  %v2169_v27 = vshrl.u32 %v10684_v34, 16  ;;  %v2185_v26 = vshll.u32 %v5338_v56, 16  ;;  %v7286_v34 = vld [vmem:[%s5650_s10 + $0x1bc] sm:$0xff]  }
 0x228   : > { %v7234_v33 = vpop.permute.xlu1 %1563  ;;  %10692 = vst [vmem:[#allocation153_spill] sm:$0xff] %v7286_v34 }
 0x229   : > { %10679 = vst [vmem:[#allocation66_spill] sm:$0xff] %v7234_v33  ;;  %v7236_v11 = vpop.permute.xlu0 %1561 }
 0x22a   : > { %10680 = vst [vmem:[#allocation51_spill] sm:$0xff] %v7236_v11  ;;  %2229 = vrot.lane.b32.xlu1 %v2165_v2, %s5536_s11  ;;  %v2182_v2 = vrot.slane %v2180_v39, 1  ;;  %v10352_v39 = vshrl.u32 %v7286_v34, 16  ;;  %v7653_v11 = vld [vmem:[%s5650_s10 + $0x1b8] ss:$0 sps:$4 sm:$0x11]  }
 0x22b   : > { %2227 = vrot.lane.b32.xlu0 %v6604_v32, %s5536_s11  ;;  %v2171_v32 = vshrl.u32 %v10687_v45, 16 }
 0x22c   : > { %v7242_v43 = vpop.permute.xlu1 %1567 }
 0x22d   : > { %10682 = vst [vmem:[#allocation82_spill] sm:$0xff] %v7242_v43  ;;  %v7244_v59 = vpop.permute.xlu0 %1565 }
 0x22e   : > { %10683 = vst [vmem:[#allocation67_spill] sm:$0xff] %v7244_v59  ;;  %2233 = vrot.lane.b32.xlu1 %v2167_v9, %s5536_s11  ;;  %v2175_v9 = vshrl.u32 %v6890_v57, 16 }
 0x22f   : > { %2231 = vrot.lane.b32.xlu0 %v6629_v17, %s5536_s11 }
 0x230   : > { %v7250_v19 = vpop.permute.xlu1 %1571 }
 0x231   : > { %10685 = vst [vmem:[#allocation111_spill] sm:$0xff] %v7250_v19  ;;  %v7252_v55 = vpop.permute.xlu0 %1569  ;;  %v7364_v19 = vld [vmem:[%s5650_s10 + $0x1ec] sm:$0xff]  }
 0x232   : > { %10686 = vst [vmem:[#allocation83_spill] sm:$0xff] %v7252_v55  ;;  %2237 = vrot.lane.b32.xlu1 %v2169_v27, %s5536_s11  ;;  %v10362_v49 = vshrl.u32 %v7364_v19, 16  ;;  %v10363_v36 = vshll.u32 %v7364_v19, 16  ;;  %v7406_v55 = vld [vmem:[%s5650_s10 + $0x204] sm:$0xff]  }
 0x233   : > { %2235 = vrot.lane.b32.xlu0 %v6622_v50, %s5536_s11  ;;  %v10366_v43 = vshll.u32 %v7406_v55, 16 }
 0x234   : > { %v1576_v40 = vpop.permute.xlu1 %1575 }
 0x235   : > { %v7259_v13 = vsel %vm2045_vm14, %v2044_v28, %v1576_v40  ;;  %v1574_v17 = vpop.permute.xlu0 %1573  ;;  %v2178_v28 = vshrl.u32 %v7071_v38, 16  ;;  %v2187_v38 = vrot.slane %v2185_v26, 1  ;;  %v10356_v40 = vshll.u32 %v7273_v10, 16 }
 0x236   : > { %2241 = vrot.lane.b32.xlu1 %v2171_v32, %s5536_s11  ;;  %v7266_v54 = vsel %vm2045_vm14, %v2042_v41, %v1574_v17  ;;  %v2189_v32 = vshrl.u32 %v5338_v56, 16  ;;  %v7300_v17 = vld [vmem:[%s5650_s10 + $0x1c8] sm:$0xff]  }
 0x237   : > { %2239 = vrot.lane.b32.xlu0 %v6645_v48, %s5536_s11  ;;  %v10354_v48 = vshrl.u32 %v7273_v10, 16  ;;  %v2183_v27 = vor.u32 %v2182_v2, %v2178_v28  ;;  %v7311_v28 = vrot.slane %v10352_v39, 7  ;;  %v10355_v2 = vshll.u32 %v7286_v34, 16 }
 0x238   : > { %v7270_v50 = vpop.permute.xlu1 %1582  ;;  %v10353_v26 = vshrl.u32 %v7300_v17, 16 }
 0x239   : > { %10689 = vst [vmem:[#allocation114_spill] sm:$0xff] %v7270_v50  ;;  %v7276_v61 = vpop.permute.xlu0 %1580  ;;  %v2188_v42 = vsel %vm485_vm0, %v2183_v27, %v2187_v38  ;;  %v7333_v39 = vor.u32 %v10355_v2, %v7311_v28 }
 0x23a   : > { %10690 = vst [vmem:[#allocation92_spill] sm:$0xff] %v7276_v61  ;;  %2245 = vrot.lane.b32.xlu1 %v2173_v30, %s5536_s11 }
 0x23b   : > { %2243 = vrot.lane.b32.xlu0 %v6636_v0, %s5536_s11  ;;  %v2338_v0 = vrot.slane %v10354_v48, 7 }
 0x23c   : > { %v7282_v41 = vpop.permute.xlu1 %1586 }
 0x23d   : > { %10691 = vst [vmem:[#allocation140_spill] sm:$0xff] %v7282_v41  ;;  %v7288_v45 = vpop.permute.xlu0 %1584  ;;  %v2341_v56 = vor.u32 %v10356_v40, %v2338_v0 }
 0x23e   : > { %10693 = vst [vmem:[#allocation98_spill] sm:$0xff] %v7288_v45  ;;  %2249 = vrot.lane.b32.xlu1 %v2175_v9, %s5536_s11  ;;  %v7316_v9 = vld [vmem:[%s5650_s10 + $0x1d4] sm:$0xff]  }
 0x23f   : > { %2247 = vrot.lane.b32.xlu0 %v6920_v60, %s5536_s11  ;;  %10696 = vst [vmem:[#allocation96_spill] sm:$0xff] %v7316_v9  ;;  %v10359_v2 = vshll.u32 %v7316_v9, 16 }
 0x240   : > { %v7293_v57 = vpop.permute.xlu1 %1590 }
 0x241   : > { %10694 = vst [vmem:[#allocation90_spill] sm:$0xff] %v7293_v57  ;;  %v7303_v30 = vpop.permute.xlu0 %1588 }
 0x242   : > { %10695 = vst [vmem:[#allocation106_spill] sm:$0xff] %v7303_v30  ;;  %2253 = vrot.lane.b32.xlu1 %v2189_v32, %s5536_s11  ;;  %v7386_v30 = vld [vmem:[%s5650_s10 + $0x1f8] sm:$0xff]  }
 0x243   : > { %2251 = vrot.lane.b32.xlu0 %v2188_v42, %s5536_s11  ;;  %v10364_v3 = vshll.u32 %v7386_v30, 16 }
 0x244   : > { %v1595_v60 = vpop.permute.xlu1 %1594 }
 0x245   : > { %v7320_v27 = vsel %vm2078_vm15, %v7224_v47, %v1595_v60  ;;  %v1593_v38 = vpop.permute.xlu0 %1592  ;;  %v7337_v47 = vrot.slane %v10353_v26, 7  ;;  %v10358_v60 = vshrl.u32 %v7316_v9, 16 }
 0x246   : > { %2449 = vrot.lane.b32.xlu1 %v2338_v0, %s5537_s20  ;;  %v7325_v32 = vsel %vm2078_vm15, %v7230_v24, %v1593_v38  ;;  %v10357_v0 = vshll.u32 %v7300_v17, 16  ;;  %v7342_v24 = vld [vmem:[%s5650_s10 + $0x1e0] sm:$0xff]  }
 0x247   : > { %2447 = vrot.lane.b32.xlu0 %v2341_v56, %s5537_s20  ;;  %v7359_v48 = vrot.slane %v10358_v60, 7  ;;  %v10360_v40 = vshrl.u32 %v7342_v24, 16  ;;  %v10361_v7 = vshll.u32 %v7342_v24, 16 }
 0x248   : > { %v7328_v42 = vpop.permute.xlu1 %1598  ;;  %v7355_v26 = vor.u32 %v10357_v0, %v7337_v47 }
 0x249   : > { %10697 = vst [vmem:[#allocation104_spill] sm:$0xff] %v7328_v42  ;;  %v7344_v38 = vpop.permute.xlu0 %1596  ;;  %v7377_v60 = vor.u32 %v10359_v2, %v7359_v48  ;;  %v7381_v57 = vrot.slane %v10360_v40, 7  ;;  %v7570_v42 = vld [vmem:[%s5650_s10 + $0x258] sm:$0xff]  }
 0x24a   : > { %10698 = vst [vmem:[#allocation94_spill] sm:$0xff] %v7344_v38  ;;  %2453 = vrot.lane.b32.xlu1 %v7311_v28, %s5537_s20 }
 0x24b   : > { %2451 = vrot.lane.b32.xlu0 %v7333_v39, %s5537_s20  ;;  %v7397_v40 = vor.u32 %v10361_v7, %v7381_v57 }
 0x24c   : > { %v7350_v56 = vpop.permute.xlu1 %1602 }
 0x24d   : > { %10699 = vst [vmem:[#allocation112_spill] sm:$0xff] %v7350_v56  ;;  %v7366_v51 = vpop.permute.xlu0 %1600 }
 0x24e   : > { %10700 = vst [vmem:[#allocation101_spill] sm:$0xff] %v7366_v51  ;;  %2457 = vrot.lane.b32.xlu1 %v7337_v47, %s5537_s20  ;;  %v7478_v51 = vld [vmem:[%s5650_s10 + $0x228] sm:$0xff]  }
 0x24f   : > { %2455 = vrot.lane.b32.xlu0 %v7355_v26, %s5537_s20 }
 0x250   : > { %v7372_v0 = vpop.permute.xlu1 %1606 }
 0x251   : > { %10701 = vst [vmem:[#allocation109_spill] sm:$0xff] %v7372_v0  ;;  %v7388_v8 = vpop.permute.xlu0 %1604  ;;  %v7401_v0 = vrot.slane %v10362_v49, 7 }
 0x252   : > { %10702 = vst [vmem:[#allocation99_spill] sm:$0xff] %v7388_v8  ;;  %2461 = vrot.lane.b32.xlu1 %v7359_v48, %s5537_s20 }
 0x253   : > { %2459 = vrot.lane.b32.xlu0 %v7377_v60, %s5537_s20  ;;  %v7425_v8 = vor.u32 %v10363_v36, %v7401_v0 }
 0x254   : > { %v1611_v2 = vpop.permute.xlu1 %1610 }
 0x255   : > { %v7410_v62 = vsel %vm2078_vm15, %v7259_v13, %v1611_v2  ;;  %v1609_v41 = vpop.permute.xlu0 %1608  ;;  %v10704_v13 = vshrl.u32 %v7386_v30, 16 }
 0x256   : > { %2465 = vrot.lane.b32.xlu1 %v7381_v57, %s5537_s20  ;;  %v7416_v7 = vsel %vm2078_vm15, %v7266_v54, %v1609_v41  ;;  %v10365_v54 = vshrl.u32 %v7406_v55, 16  ;;  %v7434_v41 = vld [vmem:[%s5650_s10 + $0x210] sm:$0xff]  }
 0x257   : > { %2463 = vrot.lane.b32.xlu0 %v7397_v40, %s5537_s20  ;;  %v7429_v2 = vrot.slane %v10704_v13, 7  ;;  %v10367_v45 = vshrl.u32 %v7434_v41, 16 }
 0x258   : > { %v7420_v49 = vpop.permute.xlu1 %1619  ;;  %v7451_v21 = vrot.slane %v10365_v54, 7 }
 0x259   : > { %10703 = vst [vmem:[#allocation116_spill] sm:$0xff] %v7420_v49  ;;  %v7436_v56 = vpop.permute.xlu0 %1617  ;;  %v7447_v13 = vor.u32 %v10364_v3, %v7429_v2  ;;  %v7498_v49 = vld [vmem:[%s5650_s10 + $0x234] sm:$0xff]  }
 0x25a   : > { %10705 = vst [vmem:[#allocation107_spill] sm:$0xff] %v7436_v56  ;;  %2469 = vrot.lane.b32.xlu1 %v7401_v0, %s5537_s20  ;;  %v7469_v54 = vor.u32 %v10366_v43, %v7451_v21  ;;  %v10373_v46 = vshll.u32 %v7498_v49, 16  ;;  %v7590_v56 = vld [vmem:[%s5650_s10 + $0x264] sm:$0xff]  }
 0x25b   : > { %2467 = vrot.lane.b32.xlu0 %v7425_v8, %s5537_s20  ;;  %v10380_v4 = vshll.u32 %v7590_v56, 16 }
 0x25c   : > { %v7442_v36 = vpop.permute.xlu1 %1623 }
 0x25d   : > { %10706 = vst [vmem:[#allocation103_spill] sm:$0xff] %v7442_v36  ;;  %v7458_v15 = vpop.permute.xlu0 %1621  ;;  %v7473_v36 = vrot.slane %v10367_v45, 7 }
 0x25e   : > { %10707 = vst [vmem:[#allocation113_spill] sm:$0xff] %v7458_v15  ;;  %2473 = vrot.lane.b32.xlu1 %v7429_v2, %s5537_s20  ;;  %v10368_v15 = vshll.u32 %v7434_v41, 16 }
 0x25f   : > { %2471 = vrot.lane.b32.xlu0 %v7447_v13, %s5537_s20  ;;  %10709 = vst [vmem:[#allocation180_spill] sm:$0xff] %v7473_v36 }
 0x260   : > { %v7464_v3 = vpop.permute.xlu1 %1627  ;;  %v7489_v45 = vor.u32 %v10368_v15, %v7473_v36 }
 0x261   : > { %10708 = vst [vmem:[#allocation110_spill] sm:$0xff] %v7464_v3  ;;  %v7480_v58 = vpop.permute.xlu0 %1625  ;;  %v7493_v3 = vrot.slane %v10369_v63, 7 }
 0x262   : > { %10710 = vst [vmem:[#allocation181_spill] sm:$0xff] %v7480_v58  ;;  %2477 = vrot.lane.b32.xlu1 %v7451_v21, %s5537_s20  ;;  %v10370_v58 = vshll.u32 %v7456_v29, 16 }
 0x263   : > { %2475 = vrot.lane.b32.xlu0 %v7469_v54, %s5537_s20  ;;  %10711 = vst [vmem:[#allocation182_spill] sm:$0xff] %v7493_v3 }
 0x264   : > { %v1632_v43 = vpop.permute.xlu1 %1631  ;;  %v7517_v20 = vor.u32 %v10370_v58, %v7493_v3 }
 0x265   : > { %v7502_v59 = vsel %vm10445_vm1, %v7320_v27, %v1632_v43  ;;  %v1630_v44 = vpop.permute.xlu0 %1629  ;;  %v10716_v43 = vshrl.u32 %v7478_v51, 16 }
 0x266   : > { %10712 = vst [vmem:[#allocation183_spill] sm:$0xff] %v7502_v59  ;;  %2481 = vrot.lane.b32.xlu1 %v7473_v36, %s5537_s20  ;;  %v7508_v15 = vsel %vm10445_vm1, %v7325_v32, %v1630_v44  ;;  %10715 = vst [vmem:[#allocation186_spill] sm:$0xff] %v7517_v20  ;;  %v10371_v59 = vshll.u32 %v7478_v51, 16  ;;  %v10372_v44 = vshrl.u32 %v7498_v49, 16  ;;  %v7526_v32 = vld [vmem:[%s5650_s10 + $0x240] sm:$0xff]  }
 0x267   : > { %10713 = vst [vmem:[#allocation184_spill] sm:$0xff] %v7508_v15  ;;  %2479 = vrot.lane.b32.xlu0 %v7489_v45, %s5537_s20  ;;  %v7521_v27 = vrot.slane %v10716_v43, 7  ;;  %v10374_v23 = vshrl.u32 %v7526_v32, 16 }
 0x268   : > { %v7512_v63 = vpop.permute.xlu1 %1635  ;;  %v7543_v50 = vrot.slane %v10372_v44, 7 }
 0x269   : > { %10714 = vst [vmem:[#allocation185_spill] sm:$0xff] %v7512_v63  ;;  %v7528_v15 = vpop.permute.xlu0 %1633  ;;  %v7539_v43 = vor.u32 %v10371_v59, %v7521_v27  ;;  %v7548_v63 = vld [vmem:[%s5650_s10 + $0x24c] sm:$0xff]  }
 0x26a   : > { %10717 = vst [vmem:[#allocation187_spill] sm:$0xff] %v7528_v15  ;;  %2485 = vrot.lane.b32.xlu1 %v7493_v3, %s5537_s20  ;;  %10720 = vst [vmem:[#allocation190_spill] sm:$0xff] %v7543_v50  ;;  %v7561_v44 = vor.u32 %v10373_v46, %v7543_v50  ;;  %v10376_v6 = vshrl.u32 %v7548_v63, 16  ;;  %v10377_v37 = vshll.u32 %v7548_v63, 16 }
 0x26b   : > { %2483 = vrot.lane.b32.xlu0 %v7517_v20, %s5537_s20  ;;  %10719 = vst [vmem:[#allocation189_spill] sm:$0xff] %v7539_v43  ;;  %10721 = vst [vmem:[#allocation191_spill] sm:$0xff] %v7548_v63 }
 0x26c   : > { %v7534_v58 = vpop.permute.xlu1 %1639  ;;  %10724 = vst [vmem:[#allocation194_spill] sm:$0xff] %v7561_v44 }
 0x26d   : > { %10718 = vst [vmem:[#allocation188_spill] sm:$0xff] %v7534_v58  ;;  %v7550_v22 = vpop.permute.xlu0 %1637  ;;  %v7565_v58 = vrot.slane %v10374_v23, 7 }
 0x26e   : > { %10722 = vst [vmem:[#allocation192_spill] sm:$0xff] %v7550_v22  ;;  %2489 = vrot.lane.b32.xlu1 %v7521_v27, %s5537_s20  ;;  %v10375_v22 = vshll.u32 %v7526_v32, 16 }
 0x26f   : > { %2487 = vrot.lane.b32.xlu0 %v7539_v43, %s5537_s20  ;;  %10725 = vst [vmem:[#allocation195_spill] sm:$0xff] %v7565_v58 }
 0x270   : > { %v7556_v59 = vpop.permute.xlu1 %1643  ;;  %v7581_v23 = vor.u32 %v10375_v22, %v7565_v58 }
 0x271   : > { %10723 = vst [vmem:[#allocation193_spill] sm:$0xff] %v7556_v59  ;;  %v7572_v14 = vpop.permute.xlu0 %1641  ;;  %v7585_v59 = vrot.slane %v10376_v6, 7 }
 0x272   : > { %10726 = vst [vmem:[#allocation196_spill] sm:$0xff] %v7572_v14  ;;  %2493 = vrot.lane.b32.xlu1 %v7543_v50, %s5537_s20  ;;  %10727 = vst [vmem:[#allocation197_spill] sm:$0xff] %v7581_v23 }
 0x273   : > { %2491 = vrot.lane.b32.xlu0 %v7561_v44, %s5537_s20  ;;  %10728 = vst [vmem:[#allocation198_spill] sm:$0xff] %v7585_v59  ;;  %v7609_v14 = vor.u32 %v10377_v37, %v7585_v59  ;;  %v2630_v44 = vshrl.u32 %v7653_v11, 16 }
 0x274   : > { %v1648_v46 = vpop.permute.xlu1 %1647 }
 0x275   : > { %v7594_v61 = vsel %vm10445_vm1, %v7410_v62, %v1648_v46  ;;  %v1646_v33 = vpop.permute.xlu0 %1645  ;;  %10732 = vst [vmem:[#allocation202_spill] sm:$0xff] %v7609_v14  ;;  %v10733_v46 = vshrl.u32 %v7570_v42, 16 }
 0x276   : > { %10729 = vst [vmem:[#allocation199_spill] sm:$0xff] %v7594_v61  ;;  %2497 = vrot.lane.b32.xlu1 %v7565_v58, %s5537_s20  ;;  %v7600_v22 = vsel %vm10445_vm1, %v7416_v7, %v1646_v33  ;;  %v10378_v61 = vshll.u32 %v7570_v42, 16  ;;  %v10379_v7 = vshrl.u32 %v7590_v56, 16  ;;  %vm4223_vm1 = vcmask 1045504  }
 0x277   : > { %10730 = vst [vmem:[#allocation200_spill] sm:$0xff] %v7600_v22  ;;  %2495 = vrot.lane.b32.xlu0 %v7581_v23, %s5537_s20  ;;  %v7613_v62 = vrot.slane %v10733_v46, 7 }
 0x278   : > { %v7604_v6 = vpop.permute.xlu1 %2193  ;;  %v7632_v37 = vrot.slane %v10379_v7, 7 }
 0x279   : > { %10731 = vst [vmem:[#allocation201_spill] sm:$0xff] %v7604_v6  ;;  %10734 = vst [vmem:[#allocation203_spill] sm:$0xff] %v7613_v62  ;;  %v7617_v33 = vpop.permute.xlu0 %2191  ;;  %v7628_v46 = vor.u32 %v10378_v61, %v7613_v62  ;;  %v7796_v6 = vld [vmem:[%s5650_s10 + $0x254] ss:$0 sps:$4 sm:$0x11]  }
 0x27a   : > { %10735 = vst [vmem:[#allocation204_spill] sm:$0xff] %v7617_v33  ;;  %2501 = vrot.lane.b32.xlu1 %v7585_v59, %s5537_s20  ;;  %10738 = vst [vmem:[#allocation207_spill] sm:$0xff] %v7632_v37  ;;  %v7646_v61 = vor.u32 %v10380_v4, %v7632_v37  ;;  %v7664_v4 = vld [vmem:[%s5650_s10 + $0x1c4] ss:$0 sps:$4 sm:$0x11]  }
 0x27b   : > { %2499 = vrot.lane.b32.xlu0 %v7609_v14, %s5537_s20  ;;  %10737 = vst [vmem:[#allocation206_spill] sm:$0xff] %v7628_v46  ;;  %v7785_v33 = vld [vmem:[%s5650_s10 + $0x248] ss:$0 sps:$4 sm:$0x11]   ;;  %10774 = vst [vmem:[#allocation243_spill] sm:$0xff] %v7796_v6  ;;  %v10781_v14 = vshll.u32 %v7286_v34, 16 }
 0x27c   : > { %v7623_v22 = vpop.permute.xlu1 %2197  ;;  %10741 = vst [vmem:[#allocation210_spill] sm:$0xff] %v7646_v61  ;;  %v2635_v59 = vshll.u32 %v7664_v4, 16 }
 0x27d   : > { %10736 = vst [vmem:[#allocation205_spill] sm:$0xff] %v7623_v22  ;;  %v7635_v15 = vpop.permute.xlu0 %2195 }
 0x27e   : > { %10739 = vst [vmem:[#allocation208_spill] sm:$0xff] %v7635_v15  ;;  %2505 = vrot.lane.b32.xlu1 %v7613_v62, %s5537_s20  ;;  %v2637_v43 = vrot.slane %v2635_v59, 1 }
 0x27f   : > { %2503 = vrot.lane.b32.xlu0 %v7628_v46, %s5537_s20  ;;  %v2626_v46 = vshll.u32 %v7653_v11, 16 }
 0x280   : > { %v7641_v38 = vpop.permute.xlu1 %2201 }
 0x281   : > { %10740 = vst [vmem:[#allocation209_spill] sm:$0xff] %v7641_v38  ;;  %v7648_v7 = vpop.permute.xlu0 %2199  ;;  %v2628_v58 = vrot.slane %v2626_v46, 1 }
 0x282   : > { %10742 = vst [vmem:[#allocation211_spill] sm:$0xff] %v7648_v7  ;;  %2509 = vrot.lane.b32.xlu1 %v7632_v37, %s5537_s20  ;;  %v7807_v37 = vld [vmem:[%s5650_s10 + $0x260] ss:$0 sps:$4 sm:$0x11]  }
 0x283   : > { %2507 = vrot.lane.b32.xlu0 %v7646_v61, %s5537_s20 }
 0x284   : > { %v7657_v16 = vpop.permute.xlu1 %2205 }
 0x285   : > { %10743 = vst [vmem:[#allocation212_spill] sm:$0xff] %v7657_v16  ;;  %v7659_v12 = vpop.permute.xlu0 %2203 }
 0x286   : > { %10744 = vst [vmem:[#allocation213_spill] sm:$0xff] %v7659_v12  ;;  %2561 = vrot.lane.b32.xlu1 %v7653_v11, %s5538_s21  ;;  %v10404_v11 = vshrl.u32 %v7664_v4, 16 }
 0x287   : > { %2559 = vrot.lane.b32.xlu0 %v7273_v10, %s5538_s21 }
 0x288   : > { %v7668_v5 = vpop.permute.xlu1 %2209 }
 0x289   : > { %10745 = vst [vmem:[#allocation214_spill] sm:$0xff] %v7668_v5  ;;  %v7670_v18 = vpop.permute.xlu0 %2207 }
 0x28a   : > { %10746 = vst [vmem:[#allocation215_spill] sm:$0xff] %v7670_v18  ;;  %2565 = vrot.lane.b32.xlu1 %v7664_v4, %s5538_s21 }
 0x28b   : > { %2563 = vrot.lane.b32.xlu0 %v7286_v34, %s5538_s21 }
 0x28c   : > { %v7679_v35 = vpop.permute.xlu1 %2213 }
 0x28d   : > { %10747 = vst [vmem:[#allocation216_spill] sm:$0xff] %v7679_v35  ;;  %v7681_v52 = vpop.permute.xlu0 %2211  ;;  %v7697_v35 = vld [vmem:[%s5650_s10 + $0x1e8] ss:$0 sps:$4 sm:$0x11]  }
 0x28e   : > { %10748 = vst [vmem:[#allocation217_spill] sm:$0xff] %v7681_v52  ;;  %2569 = vrot.lane.b32.xlu1 %v7675_v53, %s5538_s21  ;;  %10752 = vst [vmem:[#allocation221_spill] sm:$0xff] %v7697_v35 }
 0x28f   : > { %2567 = vrot.lane.b32.xlu0 %v7300_v17, %s5538_s21 }
 0x290   : > { %v7690_v25 = vpop.permute.xlu1 %2217 }
 0x291   : > { %10750 = vst [vmem:[#allocation219_spill] sm:$0xff] %v7690_v25  ;;  %v7692_v1 = vpop.permute.xlu0 %2215  ;;  %v7708_v25 = vld [vmem:[%s5650_s10 + $0x1f4] ss:$0 sps:$4 sm:$0x11]  }
 0x292   : > { %10751 = vst [vmem:[#allocation220_spill] sm:$0xff] %v7692_v1  ;;  %2573 = vrot.lane.b32.xlu1 %v7686_v31, %s5538_s21  ;;  %10755 = vst [vmem:[#allocation224_spill] sm:$0xff] %v7708_v25 }
 0x293   : > { %2571 = vrot.lane.b32.xlu0 %v7316_v9, %s5538_s21 }
 0x294   : > { %v7701_v52 = vpop.permute.xlu1 %2221 }
 0x295   : > { %10753 = vst [vmem:[#allocation222_spill] sm:$0xff] %v7701_v52  ;;  %v7703_v18 = vpop.permute.xlu0 %2219  ;;  %v7719_v52 = vld [vmem:[%s5650_s10 + $0x200] ss:$0 sps:$4 sm:$0x11]  }
 0x296   : > { %10754 = vst [vmem:[#allocation223_spill] sm:$0xff] %v7703_v18  ;;  %2577 = vrot.lane.b32.xlu1 %v7697_v35, %s5538_s21  ;;  %10758 = vst [vmem:[#allocation227_spill] sm:$0xff] %v7719_v52 }
 0x297   : > { %2575 = vrot.lane.b32.xlu0 %v7342_v24, %s5538_s21 }
 0x298   : > { %v7712_v1 = vpop.permute.xlu1 %2225 }
 0x299   : > { %10756 = vst [vmem:[#allocation225_spill] sm:$0xff] %v7712_v1  ;;  %v7714_v5 = vpop.permute.xlu0 %2223  ;;  %v7730_v1 = vld [vmem:[%s5650_s10 + $0x20c] ss:$0 sps:$4 sm:$0x11]  }
 0x29a   : > { %10757 = vst [vmem:[#allocation226_spill] sm:$0xff] %v7714_v5  ;;  %2581 = vrot.lane.b32.xlu1 %v7708_v25, %s5538_s21  ;;  %10761 = vst [vmem:[#allocation230_spill] sm:$0xff] %v7730_v1 }
 0x29b   : > { %2579 = vrot.lane.b32.xlu0 %v7364_v19, %s5538_s21 }
 0x29c   : > { %v7723_v18 = vpop.permute.xlu1 %2229 }
 0x29d   : > { %10759 = vst [vmem:[#allocation228_spill] sm:$0xff] %v7723_v18  ;;  %v7725_v12 = vpop.permute.xlu0 %2227  ;;  %v7741_v18 = vld [vmem:[%s5650_s10 + $0x218] ss:$0 sps:$4 sm:$0x11]  }
 0x29e   : > { %10760 = vst [vmem:[#allocation229_spill] sm:$0xff] %v7725_v12  ;;  %2585 = vrot.lane.b32.xlu1 %v7719_v52, %s5538_s21 }
 0x29f   : > { %2583 = vrot.lane.b32.xlu0 %v7386_v30, %s5538_s21 }
 0x2a0   : > { %v7734_v5 = vpop.permute.xlu1 %2233 }
 0x2a1   : > { %10762 = vst [vmem:[#allocation231_spill] sm:$0xff] %v7734_v5  ;;  %v7736_v16 = vpop.permute.xlu0 %2231  ;;  %v7752_v5 = vld [vmem:[%s5650_s10 + $0x224] ss:$0 sps:$4 sm:$0x11]  }
 0x2a2   : > { %10763 = vst [vmem:[#allocation232_spill] sm:$0xff] %v7736_v16  ;;  %2589 = vrot.lane.b32.xlu1 %v7730_v1, %s5538_s21 }
 0x2a3   : > { %2587 = vrot.lane.b32.xlu0 %v7406_v55, %s5538_s21 }
 0x2a4   : > { %v7745_v12 = vpop.permute.xlu1 %2237 }
 0x2a5   : > { %10764 = vst [vmem:[#allocation233_spill] sm:$0xff] %v7745_v12  ;;  %v7747_v7 = vpop.permute.xlu0 %2235  ;;  %v7763_v12 = vld [vmem:[%s5650_s10 + $0x230] ss:$0 sps:$4 sm:$0x11]  }
 0x2a6   : > { %10765 = vst [vmem:[#allocation234_spill] sm:$0xff] %v7747_v7  ;;  %2593 = vrot.lane.b32.xlu1 %v7741_v18, %s5538_s21 }
 0x2a7   : > { %2591 = vrot.lane.b32.xlu0 %v7434_v41, %s5538_s21 }
 0x2a8   : > { %v7756_v16 = vpop.permute.xlu1 %2241 }
 0x2a9   : > { %10766 = vst [vmem:[#allocation235_spill] sm:$0xff] %v7756_v16  ;;  %v7758_v38 = vpop.permute.xlu0 %2239  ;;  %v7774_v16 = vld [vmem:[%s5650_s10 + $0x23c] ss:$0 sps:$4 sm:$0x11]  }
 0x2aa   : > { %10767 = vst [vmem:[#allocation236_spill] sm:$0xff] %v7758_v38  ;;  %2597 = vrot.lane.b32.xlu1 %v7752_v5, %s5538_s21 }
 0x2ab   : > { %2595 = vrot.lane.b32.xlu0 %v7456_v29, %s5538_s21 }
 0x2ac   : > { %v7767_v7 = vpop.permute.xlu1 %2245 }
 0x2ad   : > { %10768 = vst [vmem:[#allocation237_spill] sm:$0xff] %v7767_v7  ;;  %v7769_v15 = vpop.permute.xlu0 %2243 }
 0x2ae   : > { %10769 = vst [vmem:[#allocation238_spill] sm:$0xff] %v7769_v15  ;;  %2601 = vrot.lane.b32.xlu1 %v7763_v12, %s5538_s21 }
 0x2af   : > { %2599 = vrot.lane.b32.xlu0 %v7478_v51, %s5538_s21 }
 0x2b0   : > { %v7778_v38 = vpop.permute.xlu1 %2249 }
 0x2b1   : > { %10770 = vst [vmem:[#allocation239_spill] sm:$0xff] %v7778_v38  ;;  %v7780_v22 = vpop.permute.xlu0 %2247 }
 0x2b2   : > { %10771 = vst [vmem:[#allocation240_spill] sm:$0xff] %v7780_v22  ;;  %2605 = vrot.lane.b32.xlu1 %v7774_v16, %s5538_s21 }
 0x2b3   : > { %2603 = vrot.lane.b32.xlu0 %v7498_v49, %s5538_s21 }
 0x2b4   : > { %v7789_v15 = vpop.permute.xlu1 %2253 }
 0x2b5   : > { %10772 = vst [vmem:[#allocation241_spill] sm:$0xff] %v7789_v15  ;;  %v7791_v7 = vpop.permute.xlu0 %2251 }
 0x2b6   : > { %10773 = vst [vmem:[#allocation242_spill] sm:$0xff] %v7791_v7  ;;  %2609 = vrot.lane.b32.xlu1 %v7785_v33, %s5538_s21  ;;  %v10778_v7 = vshll.u32 %v7273_v10, 16 }
 0x2b7   : > { %2607 = vrot.lane.b32.xlu0 %v7526_v32, %s5538_s21 }
 0x2b8   : > { %v7800_v38 = vpop.permute.xlu1 %2449  ;;  %v2623_v61 = vrot.slane %v10778_v7, 1  ;;  %v10782_v7 = vshrl.u32 %v7273_v10, 16 }
 0x2b9   : > { %10775 = vst [vmem:[#allocation244_spill] sm:$0xff] %v7800_v38  ;;  %v7802_v22 = vpop.permute.xlu0 %2447 }
 0x2ba   : > { %10776 = vst [vmem:[#allocation245_spill] sm:$0xff] %v7802_v22  ;;  %2613 = vrot.lane.b32.xlu1 %v7796_v6, %s5538_s21  ;;  %v7821_v22 = vld [vmem:[%s5650_s10 + $0x26c] ss:$0 sps:$4 sm:$0x11]   ;;  %v2624_v23 = vor.u32 %v2623_v61, %v10782_v7  ;;  %v10786_v61 = vshll.u32 %v7300_v17, 16  ;;  %v2644_v7 = vshll.u32 %v7675_v53, 16 }
 0x2bb   : > { %2611 = vrot.lane.b32.xlu0 %v7548_v63, %s5538_s21 }
 0x2bc   : > { %v7811_v15 = vpop.permute.xlu1 %2453  ;;  %v2629_v10 = vsel %vm485_vm0, %v2624_v23, %v2628_v58  ;;  %v2641_v46 = vrot.slane %v10786_v61, 1  ;;  %v10789_v23 = vshrl.u32 %v7300_v17, 16  ;;  %v2646_v59 = vrot.slane %v2644_v7, 1 }
 0x2bd   : > { %10777 = vst [vmem:[#allocation246_spill] sm:$0xff] %v7811_v15  ;;  %v7816_v62 = vpop.permute.xlu0 %2451  ;;  %v2632_v15 = vrot.slane %v10781_v14, 1  ;;  %v10785_v14 = vshrl.u32 %v7286_v34, 16 }
 0x2be   : > { %10779 = vst [vmem:[#allocation247_spill] sm:$0xff] %v7816_v62  ;;  %2617 = vrot.lane.b32.xlu1 %v7807_v37, %s5538_s21  ;;  %v2642_v58 = vor.u32 %v2641_v46, %v10789_v23  ;;  %v2662_v46 = vshll.u32 %v7697_v35, 16  ;;  %v10794_v23 = vshrl.u32 %v7316_v9, 16 }
 0x2bf   : > { %2615 = vrot.lane.b32.xlu0 %v7570_v42, %s5538_s21  ;;  %v2633_v50 = vor.u32 %v2632_v15, %v10785_v14  ;;  %v10790_v14 = vshll.u32 %v7316_v9, 16 }
 0x2c0   : > { %v7825_v38 = vpop.permute.xlu1 %2457  ;;  %v7878_v7 = vsel %vm485_vm0, %v2642_v58, %v2646_v59  ;;  %v10797_v58 = vshrl.u32 %v7342_v24, 16 }
 0x2c1   : > { %10780 = vst [vmem:[#allocation248_spill] sm:$0xff] %v7825_v38  ;;  %v7832_v62 = vpop.permute.xlu0 %2455  ;;  %v7855_v15 = vsel %vm485_vm0, %v2633_v50, %v2637_v43  ;;  %v2650_v61 = vrot.slane %v10790_v14, 1  ;;  %v10793_v43 = vshll.u32 %v7342_v24, 16 }
 0x2c2   : > { %10783 = vst [vmem:[#allocation249_spill] sm:$0xff] %v7832_v62  ;;  %2621 = vrot.lane.b32.xlu1 %v7821_v22, %s5538_s21 }
 0x2c3   : > { %2619 = vrot.lane.b32.xlu0 %v7590_v56, %s5538_s21  ;;  %v2651_v14 = vor.u32 %v2650_v61, %v10794_v23 }
 0x2c4   : > { %v7839_v38 = vpop.permute.xlu1 %2461 }
 0x2c5   : > { %10784 = vst [vmem:[#allocation250_spill] sm:$0xff] %v7839_v38  ;;  %v7847_v62 = vpop.permute.xlu0 %2459 }
 0x2c6   : > { %10787 = vst [vmem:[#allocation251_spill] sm:$0xff] %v7847_v62  ;;  %2769 = vrot.lane.b32.xlu1 %v2630_v44, %s5539_s24  ;;  %v2653_v62 = vshll.u32 %v7686_v31, 16  ;;  %v7868_v44 = vshrl.u32 %v7675_v53, 16 }
 0x2c7   : > { %2767 = vrot.lane.b32.xlu0 %v2629_v10, %s5539_s24  ;;  %v2659_v10 = vrot.slane %v10793_v43, 1 }
 0x2c8   : > { %v7852_v38 = vpop.permute.xlu1 %2465 }
 0x2c9   : > { %10788 = vst [vmem:[#allocation252_spill] sm:$0xff] %v7852_v38  ;;  %v7862_v34 = vpop.permute.xlu0 %2463  ;;  %v7887_v38 = vshrl.u32 %v7686_v31, 16  ;;  %v2660_v59 = vor.u32 %v2659_v10, %v10797_v58  ;;  %v7906_v31 = vshrl.u32 %v7697_v35, 16  ;;  %v10801_v10 = vshrl.u32 %v7364_v19, 16 }
 0x2ca   : > { %10791 = vst [vmem:[#allocation253_spill] sm:$0xff] %v7862_v34  ;;  %2773 = vrot.lane.b32.xlu1 %v10404_v11, %s5539_s24  ;;  %v2655_v11 = vrot.slane %v2653_v62, 1  ;;  %v10798_v62 = vshll.u32 %v7364_v19, 16  ;;  %v10802_v58 = vshll.u32 %v7386_v30, 16  ;;  %v7925_v35 = vshrl.u32 %v7708_v25, 16 }
 0x2cb   : > { %2771 = vrot.lane.b32.xlu0 %v7855_v15, %s5539_s24  ;;  %v10806_v19 = vshll.u32 %v7406_v55, 16 }
 0x2cc   : > { %v7872_v50 = vpop.permute.xlu1 %2469  ;;  %v7896_v61 = vsel %vm485_vm0, %v2651_v14, %v2655_v11  ;;  %v2668_v23 = vrot.slane %v10798_v62, 1  ;;  %v2677_v62 = vrot.slane %v10802_v58, 1  ;;  %10804 = vst [vmem:[#allocation260_spill] sm:$0xff] %v7925_v35 }
 0x2cd   : > { %10792 = vst [vmem:[#allocation254_spill] sm:$0xff] %v7872_v50  ;;  %v7882_v34 = vpop.permute.xlu0 %2467  ;;  %v2664_v50 = vrot.slane %v2662_v46, 1 }
 0x2ce   : > { %10795 = vst [vmem:[#allocation255_spill] sm:$0xff] %v7882_v34  ;;  %2777 = vrot.lane.b32.xlu1 %v7868_v44, %s5539_s24  ;;  %v2671_v34 = vshll.u32 %v7708_v25, 16  ;;  %v2669_v46 = vor.u32 %v2668_v23, %v10801_v10  ;;  %v10808_v10 = vshrl.u32 %v7386_v30, 16  ;;  %v7944_v25 = vshrl.u32 %v7719_v52, 16 }
 0x2cf   : > { %2775 = vrot.lane.b32.xlu0 %v7878_v7, %s5539_s24  ;;  %v7913_v11 = vsel %vm485_vm0, %v2660_v59, %v2664_v50  ;;  %v2689_v59 = vshll.u32 %v7730_v1, 16 }
 0x2d0   : > { %v7891_v43 = vpop.permute.xlu1 %2473  ;;  %v2673_v14 = vrot.slane %v2671_v34, 1  ;;  %v2686_v34 = vrot.slane %v10806_v19, 1  ;;  %v2678_v58 = vor.u32 %v2677_v62, %v10808_v10  ;;  %10810 = vst [vmem:[#allocation264_spill] sm:$0xff] %v7944_v25  ;;  %v2698_v10 = vshll.u32 %v7741_v18, 16 }
 0x2d1   : > { %10796 = vst [vmem:[#allocation256_spill] sm:$0xff] %v7891_v43  ;;  %v7901_v9 = vpop.permute.xlu0 %2471  ;;  %v2680_v43 = vshll.u32 %v7719_v52, 16  ;;  %v7963_v52 = vshrl.u32 %v7730_v1, 16  ;;  %v7982_v1 = vshrl.u32 %v7741_v18, 16  ;;  %v8001_v18 = vshrl.u32 %v7752_v5, 16 }
 0x2d2   : > { %10799 = vst [vmem:[#allocation257_spill] sm:$0xff] %v7901_v9  ;;  %2781 = vrot.lane.b32.xlu1 %v7887_v38, %s5539_s24  ;;  %v7935_v23 = vsel %vm485_vm0, %v2669_v46, %v2673_v14  ;;  %v10812_v46 = vshrl.u32 %v7406_v55, 16 }
 0x2d3   : > { %2779 = vrot.lane.b32.xlu0 %v7896_v61, %s5539_s24  ;;  %10807 = vst [vmem:[#allocation262_spill] sm:$0xff] %v7935_v23  ;;  %10816 = vst [vmem:[#allocation268_spill] sm:$0xff] %v7963_v52 }
 0x2d4   : > { %v7910_v24 = vpop.permute.xlu1 %2477  ;;  %v2687_v14 = vor.u32 %v2686_v34, %v10812_v46  ;;  %v10819_v34 = vshrl.u32 %v7434_v41, 16  ;;  %v10820_v46 = vshll.u32 %v7456_v29, 16  ;;  %10822 = vst [vmem:[#allocation272_spill] sm:$0xff] %v7982_v1  ;;  %10828 = vst [vmem:[#allocation276_spill] sm:$0xff] %v8001_v18 }
 0x2d5   : > { %10800 = vst [vmem:[#allocation258_spill] sm:$0xff] %v7910_v24  ;;  %v7920_v9 = vpop.permute.xlu0 %2475 }
 0x2d6   : > { %10803 = vst [vmem:[#allocation259_spill] sm:$0xff] %v7920_v9  ;;  %2785 = vrot.lane.b32.xlu1 %v7906_v31, %s5539_s24  ;;  %v2682_v9 = vrot.slane %v2680_v43, 1  ;;  %v10814_v43 = vshll.u32 %v7434_v41, 16  ;;  %v10824_v41 = vshll.u32 %v7478_v51, 16 }
 0x2d7   : > { %2783 = vrot.lane.b32.xlu0 %v7913_v11, %s5539_s24 }
 0x2d8   : > { %v7929_v50 = vpop.permute.xlu1 %2481  ;;  %v7953_v30 = vsel %vm485_vm0, %v2678_v58, %v2682_v9  ;;  %v2695_v62 = vrot.slane %v10814_v43, 1  ;;  %v2700_v58 = vrot.slane %v2698_v10, 1  ;;  %v2704_v43 = vrot.slane %v10820_v46, 1 }
 0x2d9   : > { %10805 = vst [vmem:[#allocation261_spill] sm:$0xff] %v7929_v50  ;;  %v7939_v24 = vpop.permute.xlu0 %2479  ;;  %v2691_v50 = vrot.slane %v2689_v59, 1  ;;  %10813 = vst [vmem:[#allocation266_spill] sm:$0xff] %v7953_v30 }
 0x2da   : > { %10809 = vst [vmem:[#allocation263_spill] sm:$0xff] %v7939_v24  ;;  %2789 = vrot.lane.b32.xlu1 %v7925_v35, %s5539_s24  ;;  %v2696_v59 = vor.u32 %v2695_v62, %v10819_v34  ;;  %v2716_v62 = vshll.u32 %v7763_v12, 16  ;;  %v10826_v34 = vshrl.u32 %v7456_v29, 16 }
 0x2db   : > { %2787 = vrot.lane.b32.xlu0 %v7935_v23, %s5539_s24  ;;  %v7970_v9 = vsel %vm485_vm0, %v2687_v14, %v2691_v50  ;;  %v2713_v14 = vrot.slane %v10824_v41, 1  ;;  %v8077_v23 = vshrl.u32 %v7796_v6, 16 }
 0x2dc   : > { %v7948_v19 = vpop.permute.xlu1 %2485  ;;  %10818 = vst [vmem:[#allocation270_spill] sm:$0xff] %v7970_v9  ;;  %v7992_v10 = vsel %vm485_vm0, %v2696_v59, %v2700_v58  ;;  %v2705_v46 = vor.u32 %v2704_v43, %v10826_v34  ;;  %v10830_v59 = vshrl.u32 %v7478_v51, 16 }
 0x2dd   : > { %10811 = vst [vmem:[#allocation265_spill] sm:$0xff] %v7948_v19  ;;  %v7958_v24 = vpop.permute.xlu0 %2483  ;;  %10825 = vst [vmem:[#allocation274_spill] sm:$0xff] %v7992_v10 }
 0x2de   : > { %10815 = vst [vmem:[#allocation267_spill] sm:$0xff] %v7958_v24  ;;  %2793 = vrot.lane.b32.xlu1 %v7944_v25, %s5539_s24  ;;  %v2707_v24 = vshll.u32 %v7752_v5, 16  ;;  %v2714_v58 = vor.u32 %v2713_v14, %v10830_v59 }
 0x2df   : > { %2791 = vrot.lane.b32.xlu0 %v7953_v30, %s5539_s24  ;;  %v8058_v30 = vshrl.u32 %v7785_v33, 16 }
 0x2e0   : > { %v7967_v55 = vpop.permute.xlu1 %2489 }
 0x2e1   : > { %10817 = vst [vmem:[#allocation269_spill] sm:$0xff] %v7967_v55  ;;  %v7977_v19 = vpop.permute.xlu0 %2487 }
 0x2e2   : > { %10821 = vst [vmem:[#allocation271_spill] sm:$0xff] %v7977_v19  ;;  %2797 = vrot.lane.b32.xlu1 %v7963_v52, %s5539_s24  ;;  %v2709_v19 = vrot.slane %v2707_v24, 1  ;;  %v10832_v24 = vshll.u32 %v7498_v49, 16 }
 0x2e3   : > { %2795 = vrot.lane.b32.xlu0 %v7970_v9, %s5539_s24  ;;  %v8039_v9 = vshrl.u32 %v7774_v16, 16 }
 0x2e4   : > { %v7986_v50 = vpop.permute.xlu1 %2493  ;;  %v8010_v43 = vsel %vm485_vm0, %v2705_v46, %v2709_v19  ;;  %v2722_v34 = vrot.slane %v10832_v24, 1  ;;  %v10836_v24 = vshll.u32 %v7526_v32, 16 }
 0x2e5   : > { %10823 = vst [vmem:[#allocation273_spill] sm:$0xff] %v7986_v50  ;;  %v7996_v55 = vpop.permute.xlu0 %2491  ;;  %v2718_v50 = vrot.slane %v2716_v62, 1  ;;  %10831 = vst [vmem:[#allocation278_spill] sm:$0xff] %v8010_v43  ;;  %v10835_v62 = vshrl.u32 %v7498_v49, 16 }
 0x2e6   : > { %10827 = vst [vmem:[#allocation275_spill] sm:$0xff] %v7996_v55  ;;  %2801 = vrot.lane.b32.xlu1 %v7982_v1, %s5539_s24  ;;  %v2725_v1 = vshll.u32 %v7774_v16, 16 }
 0x2e7   : > { %2799 = vrot.lane.b32.xlu0 %v7992_v10, %s5539_s24  ;;  %v8020_v10 = vshrl.u32 %v7763_v12, 16  ;;  %v8027_v19 = vsel %vm485_vm0, %v2714_v58, %v2718_v50  ;;  %v2723_v46 = vor.u32 %v2722_v34, %v10835_v62  ;;  %v2743_v34 = vshll.u32 %v7796_v6, 16 }
 0x2e8   : > { %v8005_v41 = vpop.permute.xlu1 %2497  ;;  %v2727_v59 = vrot.slane %v2725_v1, 1  ;;  %v10839_v1 = vshll.u32 %v7548_v63, 16  ;;  %v8096_v6 = vshrl.u32 %v7807_v37, 16 }
 0x2e9   : > { %10829 = vst [vmem:[#allocation277_spill] sm:$0xff] %v8005_v41  ;;  %v8015_v55 = vpop.permute.xlu0 %2495  ;;  %v2734_v41 = vshll.u32 %v7785_v33, 16 }
 0x2ea   : > { %10833 = vst [vmem:[#allocation279_spill] sm:$0xff] %v8015_v55  ;;  %2805 = vrot.lane.b32.xlu1 %v8001_v18, %s5539_s24  ;;  %v2731_v55 = vrot.slane %v10836_v24, 1  ;;  %v2740_v58 = vrot.slane %v10839_v1, 1  ;;  %v8049_v62 = vsel %vm485_vm0, %v2723_v46, %v2727_v59  ;;  %v10840_v24 = vshrl.u32 %v7526_v32, 16 }
 0x2eb   : > { %2803 = vrot.lane.b32.xlu0 %v8010_v43, %s5539_s24  ;;  %v10843_v46 = vshrl.u32 %v7548_v63, 16 }
 0x2ec   : > { %v8024_v14 = vpop.permute.xlu1 %2501 }
 0x2ed   : > { %10834 = vst [vmem:[#allocation280_spill] sm:$0xff] %v8024_v14  ;;  %v8034_v52 = vpop.permute.xlu0 %2499  ;;  %v2736_v14 = vrot.slane %v2734_v41, 1  ;;  %v2741_v59 = vor.u32 %v2740_v58, %v10843_v46  ;;  %v10844_v41 = vshll.u32 %v7570_v42, 16 }
 0x2ee   : > { %10837 = vst [vmem:[#allocation281_spill] sm:$0xff] %v8034_v52  ;;  %2809 = vrot.lane.b32.xlu1 %v8020_v10, %s5539_s24  ;;  %v2732_v52 = vor.u32 %v2731_v55, %v10840_v24 }
 0x2ef   : > { %2807 = vrot.lane.b32.xlu0 %v8027_v19, %s5539_s24  ;;  %v2749_v24 = vrot.slane %v10844_v41, 1  ;;  %v10848_v41 = vshll.u32 %v7590_v56, 16 }
 0x2f0   : > { %v8043_v50 = vpop.permute.xlu1 %2505  ;;  %v8067_v55 = vsel %vm485_vm0, %v2732_v52, %v2736_v14  ;;  %v10847_v14 = vshrl.u32 %v7570_v42, 16 }
 0x2f1   : > { %10838 = vst [vmem:[#allocation282_spill] sm:$0xff] %v8043_v50  ;;  %v8053_v25 = vpop.permute.xlu0 %2503  ;;  %v2745_v50 = vrot.slane %v2743_v34, 1 }
 0x2f2   : > { %10841 = vst [vmem:[#allocation283_spill] sm:$0xff] %v8053_v25  ;;  %2813 = vrot.lane.b32.xlu1 %v8039_v9, %s5539_s24  ;;  %v2752_v25 = vshll.u32 %v7807_v37, 16  ;;  %v2750_v34 = vor.u32 %v2749_v24, %v10847_v14 }
 0x2f3   : > { %2811 = vrot.lane.b32.xlu0 %v8049_v62, %s5539_s24  ;;  %v8084_v52 = vsel %vm485_vm0, %v2741_v59, %v2745_v50  ;;  %v10851_v59 = vshrl.u32 %v7590_v56, 16 }
 0x2f4   : > { %v8062_v1 = vpop.permute.xlu1 %2509  ;;  %v2754_v46 = vrot.slane %v2752_v25, 1 }
 0x2f5   : > { %10842 = vst [vmem:[#allocation284_spill] sm:$0xff] %v8062_v1  ;;  %v8072_v35 = vpop.permute.xlu0 %2507  ;;  %v2758_v1 = vrot.slane %v10848_v41, 1 }
 0x2f6   : > { %10845 = vst [vmem:[#allocation285_spill] sm:$0xff] %v8072_v35  ;;  %2817 = vrot.lane.b32.xlu1 %v8058_v30, %s5539_s24  ;;  %v2761_v35 = vshll.u32 %v7821_v22, 16  ;;  %v8103_v25 = vsel %vm485_vm0, %v2750_v34, %v2754_v46 }
 0x2f7   : > { %2815 = vrot.lane.b32.xlu0 %v8067_v55, %s5539_s24  ;;  %v2759_v24 = vor.u32 %v2758_v1, %v10851_v59 }
 0x2f8   : > { %v8081_v58 = vpop.permute.xlu1 %2561  ;;  %v2763_v14 = vrot.slane %v2761_v35, 1 }
 0x2f9   : > { %10846 = vst [vmem:[#allocation286_spill] sm:$0xff] %v8081_v58  ;;  %v8091_v63 = vpop.permute.xlu0 %2559 }
 0x2fa   : > { %10849 = vst [vmem:[#allocation287_spill] sm:$0xff] %v8091_v63  ;;  %2821 = vrot.lane.b32.xlu1 %v8077_v23, %s5539_s24  ;;  %v8112_v63 = vshrl.u32 %v7821_v22, 16  ;;  %v8119_v34 = vsel %vm485_vm0, %v2759_v24, %v2763_v14 }
 0x2fb   : > { %2819 = vrot.lane.b32.xlu0 %v8084_v52, %s5539_s24 }
 0x2fc   : > { %v8100_v50 = vpop.permute.xlu1 %2565 }
 0x2fd   : > { %10850 = vst [vmem:[#allocation288_spill] sm:$0xff] %v8100_v50  ;;  %v8107_v41 = vpop.permute.xlu0 %2563 }
 0x2fe   : > { %10852 = vst [vmem:[#allocation289_spill] sm:$0xff] %v8107_v41  ;;  %2825 = vrot.lane.b32.xlu1 %v8096_v6, %s5539_s24  ;;  %v10891_v41 = vld [vmem:[#allocation206_spill] sm:$0xff] }
 0x2ff   : > { %2823 = vrot.lane.b32.xlu0 %v8103_v25, %s5539_s24 }
 0x300   : > { %v8116_v58 = vpop.permute.xlu1 %2569 }
 0x301   : > { %10853 = vst [vmem:[#allocation290_spill] sm:$0xff] %v8116_v58  ;;  %v8121_v46 = vpop.permute.xlu0 %2567 }
 0x302   : > { %10854 = vst [vmem:[#allocation291_spill] sm:$0xff] %v8121_v46  ;;  %2829 = vrot.lane.b32.xlu1 %v8112_v63, %s5539_s24  ;;  %v10887_v46 = vld [vmem:[#allocation202_spill] sm:$0xff] }
 0x303   : > { %2827 = vrot.lane.b32.xlu0 %v8119_v34, %s5539_s24 }
 0x304   : > { %v8127_v35 = vpop.permute.xlu1 %2573 }
 0x305   : > { %10855 = vst [vmem:[#allocation292_spill] sm:$0xff] %v8127_v35  ;;  %v8129_v56 = vpop.permute.xlu0 %2571 }
 0x306   : > { %10856 = vst [vmem:[#allocation293_spill] sm:$0xff] %v8129_v56  ;;  %2845 = vrot.lane.b32.xlu1 %v7311_v28, %s5540_s27  ;;  %v10883_v56 = vld [vmem:[#allocation197_spill] sm:$0xff] }
 0x307   : > { %2843 = vrot.lane.b32.xlu0 %v7333_v39, %s5540_s27 }
 0x308   : > { %v8135_v1 = vpop.permute.xlu1 %2577 }
 0x309   : > { %10857 = vst [vmem:[#allocation294_spill] sm:$0xff] %v8135_v1  ;;  %v8137_v59 = vpop.permute.xlu0 %2575 }
 0x30a   : > { %10858 = vst [vmem:[#allocation295_spill] sm:$0xff] %v8137_v59  ;;  %2849 = vrot.lane.b32.xlu1 %v7337_v47, %s5540_s27 }
 0x30b   : > { %2847 = vrot.lane.b32.xlu0 %v7355_v26, %s5540_s27 }
 0x30c   : > { %v8143_v24 = vpop.permute.xlu1 %2581 }
 0x30d   : > { %10859 = vst [vmem:[#allocation296_spill] sm:$0xff] %v8143_v24  ;;  %v8145_v14 = vpop.permute.xlu0 %2579 }
 0x30e   : > { %10860 = vst [vmem:[#allocation297_spill] sm:$0xff] %v8145_v14  ;;  %2853 = vrot.lane.b32.xlu1 %v7359_v48, %s5540_s27 }
 0x30f   : > { %2851 = vrot.lane.b32.xlu0 %v7377_v60, %s5540_s27 }
 0x310   : > { %v8151_v39 = vpop.permute.xlu1 %2585 }
 0x311   : > { %10861 = vst [vmem:[#allocation298_spill] sm:$0xff] %v8151_v39  ;;  %v8153_v28 = vpop.permute.xlu0 %2583 }
 0x312   : > { %10862 = vst [vmem:[#allocation299_spill] sm:$0xff] %v8153_v28  ;;  %2857 = vrot.lane.b32.xlu1 %v7381_v57, %s5540_s27 }
 0x313   : > { %2855 = vrot.lane.b32.xlu0 %v7397_v40, %s5540_s27 }
 0x314   : > { %v8159_v59 = vpop.permute.xlu1 %2589 }
 0x315   : > { %10863 = vst [vmem:[#allocation300_spill] sm:$0xff] %v8159_v59  ;;  %v8161_v24 = vpop.permute.xlu0 %2587 }
 0x316   : > { %10864 = vst [vmem:[#allocation301_spill] sm:$0xff] %v8161_v24  ;;  %2861 = vrot.lane.b32.xlu1 %v7401_v0, %s5540_s27 }
 0x317   : > { %2859 = vrot.lane.b32.xlu0 %v7425_v8, %s5540_s27 }
 0x318   : > { %v8167_v14 = vpop.permute.xlu1 %2593 }
 0x319   : > { %10865 = vst [vmem:[#allocation302_spill] sm:$0xff] %v8167_v14  ;;  %v8169_v39 = vpop.permute.xlu0 %2591 }
 0x31a   : > { %10866 = vst [vmem:[#allocation303_spill] sm:$0xff] %v8169_v39  ;;  %2865 = vrot.lane.b32.xlu1 %v7429_v2, %s5540_s27 }
 0x31b   : > { %2863 = vrot.lane.b32.xlu0 %v7447_v13, %s5540_s27 }
 0x31c   : > { %v8175_v28 = vpop.permute.xlu1 %2597 }
 0x31d   : > { %10867 = vst [vmem:[#allocation304_spill] sm:$0xff] %v8175_v28  ;;  %v8177_v59 = vpop.permute.xlu0 %2595 }
 0x31e   : > { %10868 = vst [vmem:[#allocation305_spill] sm:$0xff] %v8177_v59  ;;  %2869 = vrot.lane.b32.xlu1 %v7451_v21, %s5540_s27 }
 0x31f   : > { %2867 = vrot.lane.b32.xlu0 %v7469_v54, %s5540_s27 }
 0x320   : > { %v8183_v24 = vpop.permute.xlu1 %2601 }
 0x321   : > { %10869 = vst [vmem:[#allocation306_spill] sm:$0xff] %v8183_v24  ;;  %v8185_v14 = vpop.permute.xlu0 %2599 }
 0x322   : > { %10870 = vst [vmem:[#allocation307_spill] sm:$0xff] %v8185_v14  ;;  %2873 = vrot.lane.b32.xlu1 %v7473_v36, %s5540_s27  ;;  %v10875_v36 = vld [vmem:[#allocation189_spill] sm:$0xff] }
 0x323   : > { %2871 = vrot.lane.b32.xlu0 %v7489_v45, %s5540_s27 }
 0x324   : > { %v8191_v39 = vpop.permute.xlu1 %2605 }
 0x325   : > { %10871 = vst [vmem:[#allocation308_spill] sm:$0xff] %v8191_v39  ;;  %v8193_v28 = vpop.permute.xlu0 %2603 }
 0x326   : > { %10872 = vst [vmem:[#allocation309_spill] sm:$0xff] %v8193_v28  ;;  %2877 = vrot.lane.b32.xlu1 %v7493_v3, %s5540_s27  ;;  %v10878_v28 = vld [vmem:[#allocation190_spill] sm:$0xff] }
 0x327   : > { %2875 = vrot.lane.b32.xlu0 %v7517_v20, %s5540_s27  ;;  %v10879_v3 = vld [vmem:[#allocation194_spill] sm:$0xff] }
 0x328   : > { %v8199_v59 = vpop.permute.xlu1 %2609 }
 0x329   : > { %10873 = vst [vmem:[#allocation310_spill] sm:$0xff] %v8199_v59  ;;  %v8201_v24 = vpop.permute.xlu0 %2607 }
 0x32a   : > { %10874 = vst [vmem:[#allocation311_spill] sm:$0xff] %v8201_v24  ;;  %2881 = vrot.lane.b32.xlu1 %v7521_v27, %s5540_s27  ;;  %v10882_v24 = vld [vmem:[#allocation195_spill] sm:$0xff] }
 0x32b   : > { %2879 = vrot.lane.b32.xlu0 %v10875_v36, %s5540_s27 }
 0x32c   : > { %v8207_v14 = vpop.permute.xlu1 %2613 }
 0x32d   : > { %10876 = vst [vmem:[#allocation189_spill] sm:$0xff] %v8207_v14  ;;  %v8209_v39 = vpop.permute.xlu0 %2611 }
 0x32e   : > { %10877 = vst [vmem:[#allocation312_spill] sm:$0xff] %v8209_v39  ;;  %2885 = vrot.lane.b32.xlu1 %v10878_v28, %s5540_s27  ;;  %v10886_v39 = vld [vmem:[#allocation198_spill] sm:$0xff] }
 0x32f   : > { %2883 = vrot.lane.b32.xlu0 %v10879_v3, %s5540_s27 }
 0x330   : > { %v8215_v1 = vpop.permute.xlu1 %2617 }
 0x331   : > { %10880 = vst [vmem:[#allocation190_spill] sm:$0xff] %v8215_v1  ;;  %v8217_v59 = vpop.permute.xlu0 %2615 }
 0x332   : > { %10881 = vst [vmem:[#allocation194_spill] sm:$0xff] %v8217_v59  ;;  %2889 = vrot.lane.b32.xlu1 %v10882_v24, %s5540_s27  ;;  %v10890_v59 = vld [vmem:[#allocation203_spill] sm:$0xff] }
 0x333   : > { %2887 = vrot.lane.b32.xlu0 %v10883_v56, %s5540_s27 }
 0x334   : > { %v8223_v35 = vpop.permute.xlu1 %2621 }
 0x335   : > { %10884 = vst [vmem:[#allocation195_spill] sm:$0xff] %v8223_v35  ;;  %v8225_v14 = vpop.permute.xlu0 %2619 }
 0x336   : > { %10885 = vst [vmem:[#allocation197_spill] sm:$0xff] %v8225_v14  ;;  %2893 = vrot.lane.b32.xlu1 %v10886_v39, %s5540_s27  ;;  %v10893_v14 = vld [vmem:[#allocation153_spill] sm:$0xff] }
 0x337   : > { %2891 = vrot.lane.b32.xlu0 %v10887_v46, %s5540_s27 }
 0x338   : > { %v8231_v58 = vpop.permute.xlu1 %2769 }
 0x339   : > { %10888 = vst [vmem:[#allocation198_spill] sm:$0xff] %v8231_v58  ;;  %v8233_v1 = vpop.permute.xlu0 %2767 }
 0x33a   : > { %10889 = vst [vmem:[#allocation202_spill] sm:$0xff] %v8233_v1  ;;  %2897 = vrot.lane.b32.xlu1 %v10890_v59, %s5540_s27 }
 0x33b   : > { %2895 = vrot.lane.b32.xlu0 %v10891_v41, %s5540_s27 }
 0x33c   : > { %v8239_v50 = vpop.permute.xlu1 %2773 }
 0x33d   : > { %10892 = vst [vmem:[#allocation203_spill] sm:$0xff] %v8239_v50  ;;  %v8241_v35 = vpop.permute.xlu0 %2771 }
 0x33e   : > { %2942 = vrot.lane.b32.xlu1 %v7456_v29, %s5541_s28 }
 0x33f   : > { %2910 = vrot.lane.b32.xlu0 %v10893_v14, %s5541_s28 }
 0x340   : > { %v8247_v20 = vpop.permute.xlu1 %2777 }
 0x341   : > { %v8249_v58 = vpop.permute.xlu0 %2775 }
 0x342   : > { %10894 = vst [vmem:[#allocation206_spill] sm:$0xff] %v8249_v58  ;;  %2946 = vrot.lane.b32.xlu1 %v7478_v51, %s5541_s28 }
 0x343   : > { %2914 = vrot.lane.b32.xlu0 %v7300_v17, %s5541_s28 }
 0x344   : > { %v8255_v1 = vpop.permute.xlu1 %2781 }
 0x345   : > { %10895 = vst [vmem:[#allocation153_spill] sm:$0xff] %v8255_v1  ;;  %v8257_v50 = vpop.permute.xlu0 %2779 }
 0x346   : > { %3015 = vrot.lane.b32.xlu1 %v8010_v43, %s5542_s29 }
 0x347   : > { %2983 = vrot.lane.b32.xlu0 %v7855_v15, %s5542_s29 }
 0x348   : > { %v8263_v29 = vpop.permute.xlu1 %2785 }
 0x349   : > { %v8265_v14 = vpop.permute.xlu0 %2783 }
 0x34a   : > { %2944 = vrot.lane.b32.xlu1 %v7752_v5, %s5541_s28 }
 0x34b   : > { %2912 = vrot.lane.b32.xlu0 %v7664_v4, %s5541_s28 }
 0x34c   : > { %v8271_v58 = vpop.permute.xlu1 %2789 }
 0x34d   : > { %10896 = vst [vmem:[#allocation313_spill] sm:$0xff] %v8271_v58  ;;  %v8273_v1 = vpop.permute.xlu0 %2787 }
 0x34e   : > { %10897 = vst [vmem:[#allocation314_spill] sm:$0xff] %v8273_v1  ;;  %3019 = vrot.lane.b32.xlu1 %v8027_v19, %s5542_s29 }
 0x34f   : > { %2987 = vrot.lane.b32.xlu0 %v7878_v7, %s5542_s29 }
 0x350   : > { %v8279_v15 = vpop.permute.xlu1 %2793 }
 0x351   : > { %10898 = vst [vmem:[#allocation315_spill] sm:$0xff] %v8279_v15  ;;  %v8281_v43 = vpop.permute.xlu0 %2791 }
 0x352   : > { %10899 = vst [vmem:[#allocation316_spill] sm:$0xff] %v8281_v43  ;;  %3091 = vrot.lane.b32.xlu1 %v10875_v36, %s5543_s4  ;;  %v10902_v36 = vshrl.u32 %v7664_v4, 16 }
 0x353   : > { %3059 = vrot.lane.b32.xlu0 %v7355_v26, %s5543_s4 }
 0x354   : > { %v8287_v5 = vpop.permute.xlu1 %2797 }
 0x355   : > { %10900 = vst [vmem:[#allocation317_spill] sm:$0xff] %v8287_v5  ;;  %v8289_v58 = vpop.permute.xlu0 %2795 }
 0x356   : > { %10901 = vst [vmem:[#allocation318_spill] sm:$0xff] %v8289_v58  ;;  %2948 = vrot.lane.b32.xlu1 %v7763_v12, %s5541_s28 }
 0x357   : > { %2916 = vrot.lane.b32.xlu0 %v7675_v53, %s5541_s28 }
 0x358   : > { %v8295_v1 = vpop.permute.xlu1 %2801 }
 0x359   : > { %v8297_v15 = vpop.permute.xlu0 %2799 }
 0x35a   : > { %3017 = vrot.lane.b32.xlu1 %v8001_v18, %s5542_s29  ;;  %v10907_v18 = vld [vmem:[#allocation96_spill] sm:$0xff] }
 0x35b   : > { %2985 = vrot.lane.b32.xlu0 %v10902_v36, %s5542_s29 }
 0x35c   : > { %v8304_v26 = vpop.permute.xlu1 %2805 }
 0x35d   : > { %v8306_v58 = vpop.permute.xlu0 %2803 }
 0x35e   : > { %3095 = vrot.lane.b32.xlu1 %v10879_v3, %s5543_s4 }
 0x35f   : > { %3063 = vrot.lane.b32.xlu0 %v7377_v60, %s5543_s4 }
 0x360   : > { %v8312_v5 = vpop.permute.xlu1 %2809 }
 0x361   : > { %v8314_v43 = vpop.permute.xlu0 %2807 }
 0x362   : > { %3158 = vrot.lane.b32.xlu1 %v7478_v51, %s5544_s5 }
 0x363   : > { %3126 = vrot.lane.b32.xlu0 %v7300_v17, %s5544_s5 }
 0x364   : > { %v8320_v4 = vpop.permute.xlu1 %2813 }
 0x365   : > { %v8322_v36 = vpop.permute.xlu0 %2811 }
 0x366   : > { %10903 = vst [vmem:[#allocation319_spill] sm:$0xff] %v8322_v36  ;;  %3021 = vrot.lane.b32.xlu1 %v8020_v10, %s5542_s29 }
 0x367   : > { %2989 = vrot.lane.b32.xlu0 %v7868_v44, %s5542_s29 }
 0x368   : > { %v8328_v3 = vpop.permute.xlu1 %2817 }
 0x369   : > { %10904 = vst [vmem:[#allocation320_spill] sm:$0xff] %v8328_v3  ;;  %v8330_v60 = vpop.permute.xlu0 %2815 }
 0x36a   : > { %3093 = vrot.lane.b32.xlu1 %v7521_v27, %s5543_s4 }
 0x36b   : > { %3061 = vrot.lane.b32.xlu0 %v7337_v47, %s5543_s4 }
 0x36c   : > { %v8336_v51 = vpop.permute.xlu1 %2821 }
 0x36d   : > { %10905 = vst [vmem:[#allocation321_spill] sm:$0xff] %v8336_v51  ;;  %v8338_v17 = vpop.permute.xlu0 %2819 }
 0x36e   : > { %10906 = vst [vmem:[#allocation322_spill] sm:$0xff] %v8338_v17  ;;  %3162 = vrot.lane.b32.xlu1 %v7498_v49, %s5544_s5 }
 0x36f   : > { %3130 = vrot.lane.b32.xlu0 %v10907_v18, %s5544_s5 }
 0x370   : > { %v8344_v36 = vpop.permute.xlu1 %2825 }
 0x371   : > { %10908 = vst [vmem:[#allocation96_spill] sm:$0xff] %v8344_v36  ;;  %v8346_v3 = vpop.permute.xlu0 %2823 }
 0x372   : > { %10909 = vst [vmem:[#allocation323_spill] sm:$0xff] %v8346_v3  ;;  %3231 = vrot.lane.b32.xlu1 %v8027_v19, %s5545_s6 }
 0x373   : > { %3199 = vrot.lane.b32.xlu0 %v7878_v7, %s5545_s6 }
 0x374   : > { %v8352_v47 = vpop.permute.xlu1 %2829 }
 0x375   : > { %10910 = vst [vmem:[#allocation324_spill] sm:$0xff] %v8352_v47  ;;  %v8354_v27 = vpop.permute.xlu0 %2827 }
 0x376   : > { %10911 = vst [vmem:[#allocation325_spill] sm:$0xff] %v8354_v27  ;;  %3097 = vrot.lane.b32.xlu1 %v10878_v28, %s5543_s4 }
 0x377   : > { %3065 = vrot.lane.b32.xlu0 %v7359_v48, %s5543_s4 }
 0x378   : > { %v8360_v18 = vpop.permute.xlu1 %2845 }
 0x379   : > { %v8362_v36 = vpop.permute.xlu0 %2843 }
 0x37a   : > { %3160 = vrot.lane.b32.xlu1 %v7763_v12, %s5544_s5 }
 0x37b   : > { %3128 = vrot.lane.b32.xlu0 %v7675_v53, %s5544_s5  ;;  %v10912_v53 = vld [vmem:[#allocation218_spill] sm:$0xff] }
 0x37c   : > { %v8368_v7 = vpop.permute.xlu1 %2849 }
 0x37d   : > { %v8370_v19 = vpop.permute.xlu0 %2847 }
 0x37e   : > { %3235 = vrot.lane.b32.xlu1 %v8049_v62, %s5545_s6 }
 0x37f   : > { %3203 = vrot.lane.b32.xlu0 %v7896_v61, %s5545_s6 }
 0x380   : > { %v8376_v48 = vpop.permute.xlu1 %2853 }
 0x381   : > { %v8378_v28 = vpop.permute.xlu0 %2851 }
 0x382   : > { %3164 = vrot.lane.b32.xlu1 %v7774_v16, %s5544_s5 }
 0x383   : > { %3132 = vrot.lane.b32.xlu0 %v10912_v53, %s5544_s5 }
 0x384   : > { %v8384_v12 = vpop.permute.xlu1 %2857 }
 0x385   : > { %10913 = vst [vmem:[#allocation218_spill] sm:$0xff] %v8384_v12  ;;  %v8386_v47 = vpop.permute.xlu0 %2855 }
 0x386   : > { %10914 = vst [vmem:[#allocation326_spill] sm:$0xff] %v8386_v47  ;;  %3233 = vrot.lane.b32.xlu1 %v8020_v10, %s5545_s6  ;;  %v5386_v10 = vld [vmem:[%s5650_s10 + $0x1d4] sm:$0xff]  }
 0x387   : > { %3201 = vrot.lane.b32.xlu0 %v7868_v44, %s5545_s6 }
 0x388   : > { %v8392_v27 = vpop.permute.xlu1 %2861 }
 0x389   : > { %10915 = vst [vmem:[#allocation327_spill] sm:$0xff] %v8392_v27  ;;  %v8394_v3 = vpop.permute.xlu0 %2859 }
 0x38a   : > { %10916 = vst [vmem:[#allocation328_spill] sm:$0xff] %v8394_v3  ;;  %3237 = vrot.lane.b32.xlu1 %v8039_v9, %s5545_s6  ;;  %v5387_v3 = vld [vmem:[%s5650_s10 + $0x1e0] sm:$0xff]  }
 0x38b   : > { %3205 = vrot.lane.b32.xlu0 %v7887_v38, %s5545_s6 }
 0x38c   : > { %v8400_v17 = vpop.permute.xlu1 %2865 }
 0x38d   : > { %10917 = vst [vmem:[#allocation329_spill] sm:$0xff] %v8400_v17  ;;  %v8402_v51 = vpop.permute.xlu0 %2863 }
 0x38e   : > { %10918 = vst [vmem:[#allocation330_spill] sm:$0xff] %v8402_v51  ;;  %2950 = vrot.lane.b32.xlu1 %v7498_v49, %s5541_s28 }
 0x38f   : > { %2918 = vrot.lane.b32.xlu0 %v5386_v10, %s5541_s28 }
 0x390   : > { %v8408_v44 = vpop.permute.xlu1 %2869 }
 0x391   : > { %10919 = vst [vmem:[#allocation331_spill] sm:$0xff] %v8408_v44  ;;  %v8410_v27 = vpop.permute.xlu0 %2867 }
 0x392   : > { %10920 = vst [vmem:[#allocation332_spill] sm:$0xff] %v8410_v27  ;;  %2954 = vrot.lane.b32.xlu1 %v7526_v32, %s5541_s28 }
 0x393   : > { %2922 = vrot.lane.b32.xlu0 %v5387_v3, %s5541_s28 }
 0x394   : > { %v8416_v47 = vpop.permute.xlu1 %2873 }
 0x395   : > { %10921 = vst [vmem:[#allocation333_spill] sm:$0xff] %v8416_v47  ;;  %v8418_v17 = vpop.permute.xlu0 %2871 }
 0x396   : > { %10922 = vst [vmem:[#allocation334_spill] sm:$0xff] %v8418_v17  ;;  %3023 = vrot.lane.b32.xlu1 %v8049_v62, %s5542_s29  ;;  %v10931_v17 = vld [vmem:[#allocation221_spill] sm:$0xff] }
 0x397   : > { %2991 = vrot.lane.b32.xlu0 %v7896_v61, %s5542_s29 }
 0x398   : > { %v8424_v49 = vpop.permute.xlu1 %2877 }
 0x399   : > { %10923 = vst [vmem:[#allocation335_spill] sm:$0xff] %v8424_v49  ;;  %v8426_v10 = vpop.permute.xlu0 %2875 }
 0x39a   : > { %10924 = vst [vmem:[#allocation336_spill] sm:$0xff] %v8426_v10  ;;  %2952 = vrot.lane.b32.xlu1 %v7774_v16, %s5541_s28  ;;  %v11059_v10 = vld [vmem:[#allocation238_spill] sm:$0xff] }
 0x39b   : > { %2920 = vrot.lane.b32.xlu0 %v10912_v53, %s5541_s28 }
 0x39c   : > { %v8432_v44 = vpop.permute.xlu1 %2881 }
 0x39d   : > { %10925 = vst [vmem:[#allocation337_spill] sm:$0xff] %v8432_v44  ;;  %v8434_v47 = vpop.permute.xlu0 %2879  ;;  %v5419_v44 = vld [vmem:[%s5650_s10 + $0x18c] sm:$0xff]  }
 0x39e   : > { %10926 = vst [vmem:[#allocation338_spill] sm:$0xff] %v8434_v47  ;;  %3027 = vrot.lane.b32.xlu1 %v8067_v55, %s5542_s29  ;;  %v5418_v47 = vld [vmem:[%s5650_s10 + $0x194] ss:$0 sps:$4 sm:$0x11]  }
 0x39f   : > { %2995 = vrot.lane.b32.xlu0 %v7913_v11, %s5542_s29 }
 0x3a0   : > { %v8440_v61 = vpop.permute.xlu1 %2885 }
 0x3a1   : > { %10927 = vst [vmem:[#allocation339_spill] sm:$0xff] %v8440_v61  ;;  %v8442_v62 = vpop.permute.xlu0 %2883 }
 0x3a2   : > { %10928 = vst [vmem:[#allocation340_spill] sm:$0xff] %v8442_v62  ;;  %3099 = vrot.lane.b32.xlu1 %v10883_v56, %s5543_s4 }
 0x3a3   : > { %3067 = vrot.lane.b32.xlu0 %v7397_v40, %s5543_s4 }
 0x3a4   : > { %v8448_v16 = vpop.permute.xlu1 %2889 }
 0x3a5   : > { %10929 = vst [vmem:[#allocation341_spill] sm:$0xff] %v8448_v16  ;;  %v8450_v53 = vpop.permute.xlu0 %2887 }
 0x3a6   : > { %10930 = vst [vmem:[#allocation342_spill] sm:$0xff] %v8450_v53  ;;  %2956 = vrot.lane.b32.xlu1 %v7785_v33, %s5541_s28 }
 0x3a7   : > { %2924 = vrot.lane.b32.xlu0 %v10931_v17, %s5541_s28 }
 0x3a8   : > { %v8456_v27 = vpop.permute.xlu1 %2893 }
 0x3a9   : > { %10932 = vst [vmem:[#allocation221_spill] sm:$0xff] %v8456_v27  ;;  %v8458_v51 = vpop.permute.xlu0 %2891 }
 0x3aa   : > { %10933 = vst [vmem:[#allocation343_spill] sm:$0xff] %v8458_v51  ;;  %3025 = vrot.lane.b32.xlu1 %v8039_v9, %s5542_s29 }
 0x3ab   : > { %2993 = vrot.lane.b32.xlu0 %v7887_v38, %s5542_s29 }
 0x3ac   : > { %v8464_v40 = vpop.permute.xlu1 %2897 }
 0x3ad   : > { %10934 = vst [vmem:[#allocation344_spill] sm:$0xff] %v8464_v40  ;;  %v8466_v56 = vpop.permute.xlu0 %2895  ;;  %v10944_v40 = vld [vmem:[#allocation191_spill] sm:$0xff] }
 0x3ae   : > { %10935 = vst [vmem:[#allocation345_spill] sm:$0xff] %v8466_v56  ;;  %3103 = vrot.lane.b32.xlu1 %v10887_v46, %s5543_s4  ;;  %v5388_v56 = vld [vmem:[%s5650_s10 + $0x1ec] sm:$0xff]  }
 0x3af   : > { %3071 = vrot.lane.b32.xlu0 %v7425_v8, %s5543_s4 }
 0x3b0   : > { %v8472_v27 = vpop.permute.xlu1 %2942 }
 0x3b1   : > { %10936 = vst [vmem:[#allocation346_spill] sm:$0xff] %v8472_v27  ;;  %v8474_v51 = vpop.permute.xlu0 %2910 }
 0x3b2   : > { %10937 = vst [vmem:[#allocation347_spill] sm:$0xff] %v8474_v51  ;;  %3166 = vrot.lane.b32.xlu1 %v7526_v32, %s5544_s5 }
 0x3b3   : > { %3134 = vrot.lane.b32.xlu0 %v5387_v3, %s5544_s5 }
 0x3b4   : > { %v8479_v38 = vpop.permute.xlu1 %2946 }
 0x3b5   : > { %10938 = vst [vmem:[#allocation348_spill] sm:$0xff] %v8479_v38  ;;  %v8481_v9 = vpop.permute.xlu0 %2914  ;;  %v11056_v38 = vld [vmem:[#allocation235_spill] sm:$0xff] }
 0x3b6   : > { %10939 = vst [vmem:[#allocation349_spill] sm:$0xff] %v8481_v9  ;;  %3029 = vrot.lane.b32.xlu1 %v8058_v30, %s5542_s29  ;;  %v11055_v9 = vld [vmem:[#allocation234_spill] sm:$0xff] }
 0x3b7   : > { %2997 = vrot.lane.b32.xlu0 %v7906_v31, %s5542_s29 }
 0x3b8   : > { %v8487_v8 = vpop.permute.xlu1 %3015 }
 0x3b9   : > { %10940 = vst [vmem:[#allocation350_spill] sm:$0xff] %v8487_v8  ;;  %v8489_v46 = vpop.permute.xlu0 %2983  ;;  %v11054_v8 = vld [vmem:[#allocation233_spill] sm:$0xff] }
 0x3ba   : > { %10941 = vst [vmem:[#allocation351_spill] sm:$0xff] %v8489_v46  ;;  %3101 = vrot.lane.b32.xlu1 %v10882_v24, %s5543_s4  ;;  %v11051_v46 = vld [vmem:[#allocation232_spill] sm:$0xff] }
 0x3bb   : > { %3069 = vrot.lane.b32.xlu0 %v7381_v57, %s5543_s4 }
 0x3bc   : > { %v8495_v32 = vpop.permute.xlu1 %2944 }
 0x3bd   : > { %10942 = vst [vmem:[#allocation352_spill] sm:$0xff] %v8495_v32  ;;  %v8497_v3 = vpop.permute.xlu0 %2912  ;;  %v11050_v32 = vld [vmem:[#allocation231_spill] sm:$0xff] }
 0x3be   : > { %10943 = vst [vmem:[#allocation353_spill] sm:$0xff] %v8497_v3  ;;  %3170 = vrot.lane.b32.xlu1 %v10944_v40, %s5544_s5 }
 0x3bf   : > { %3138 = vrot.lane.b32.xlu0 %v5388_v56, %s5544_s5 }
 0x3c0   : > { %v8503_v53 = vpop.permute.xlu1 %3019 }
 0x3c1   : > { %10945 = vst [vmem:[#allocation191_spill] sm:$0xff] %v8503_v53  ;;  %v8505_v16 = vpop.permute.xlu0 %2987  ;;  %v11048_v53 = vld [vmem:[#allocation228_spill] sm:$0xff] }
 0x3c2   : > { %10946 = vst [vmem:[#allocation354_spill] sm:$0xff] %v8505_v16  ;;  %3239 = vrot.lane.b32.xlu1 %v8067_v55, %s5545_s6 }
 0x3c3   : > { %3207 = vrot.lane.b32.xlu0 %v7913_v11, %s5545_s6 }
 0x3c4   : > { %v8511_v57 = vpop.permute.xlu1 %3091 }
 0x3c5   : > { %10947 = vst [vmem:[#allocation355_spill] sm:$0xff] %v8511_v57  ;;  %v8513_v24 = vpop.permute.xlu0 %3059 }
 0x3c6   : > { %10948 = vst [vmem:[#allocation356_spill] sm:$0xff] %v8513_v24  ;;  %3105 = vrot.lane.b32.xlu1 %v10886_v39, %s5543_s4  ;;  %v10953_v39 = vld [vmem:[#allocation262_spill] sm:$0xff] }
 0x3c7   : > { %3073 = vrot.lane.b32.xlu0 %v7401_v0, %s5543_s4  ;;  %v11047_v24 = vld [vmem:[#allocation226_spill] sm:$0xff] }
 0x3c8   : > { %v8519_v62 = vpop.permute.xlu1 %2948 }
 0x3c9   : > { %10949 = vst [vmem:[#allocation357_spill] sm:$0xff] %v8519_v62  ;;  %v8521_v61 = vpop.permute.xlu0 %2916 }
 0x3ca   : > { %10950 = vst [vmem:[#allocation358_spill] sm:$0xff] %v8521_v61  ;;  %3168 = vrot.lane.b32.xlu1 %v7785_v33, %s5544_s5  ;;  %v10956_v61 = vld [vmem:[#allocation243_spill] sm:$0xff]  ;;  %v10957_v33 = vld [vmem:[#allocation224_spill] sm:$0xff] }
 0x3cb   : > { %3136 = vrot.lane.b32.xlu0 %v10931_v17, %s5544_s5 }
 0x3cc   : > { %v8527_v11 = vpop.permute.xlu1 %3017 }
 0x3cd   : > { %10951 = vst [vmem:[#allocation359_spill] sm:$0xff] %v8527_v11  ;;  %v8529_v55 = vpop.permute.xlu0 %2985 }
 0x3ce   : > { %10952 = vst [vmem:[#allocation360_spill] sm:$0xff] %v8529_v55  ;;  %3243 = vrot.lane.b32.xlu1 %v8084_v52, %s5545_s6  ;;  %v10962_v55 = vld [vmem:[#allocation260_spill] sm:$0xff] }
 0x3cf   : > { %3211 = vrot.lane.b32.xlu0 %v10953_v39, %s5545_s6 }
 0x3d0   : > { %v8535_v0 = vpop.permute.xlu1 %3095 }
 0x3d1   : > { %10954 = vst [vmem:[#allocation262_spill] sm:$0xff] %v8535_v0  ;;  %v8537_v62 = vpop.permute.xlu0 %3063 }
 0x3d2   : > { %10955 = vst [vmem:[#allocation361_spill] sm:$0xff] %v8537_v62  ;;  %3172 = vrot.lane.b32.xlu1 %v10956_v61, %s5544_s5 }
 0x3d3   : > { %3140 = vrot.lane.b32.xlu0 %v10957_v33, %s5544_s5 }
 0x3d4   : > { %v8543_v17 = vpop.permute.xlu1 %3158 }
 0x3d5   : > { %10958 = vst [vmem:[#allocation243_spill] sm:$0xff] %v8543_v17  ;;  %v8545_v16 = vpop.permute.xlu0 %3126 }
 0x3d6   : > { %10959 = vst [vmem:[#allocation224_spill] sm:$0xff] %v8545_v16  ;;  %3241 = vrot.lane.b32.xlu1 %v8058_v30, %s5545_s6  ;;  %v11046_v16 = vld [vmem:[#allocation225_spill] sm:$0xff] }
 0x3d7   : > { %3209 = vrot.lane.b32.xlu0 %v7906_v31, %s5545_s6 }
 0x3d8   : > { %v8551_v0 = vpop.permute.xlu1 %3021 }
 0x3d9   : > { %10960 = vst [vmem:[#allocation362_spill] sm:$0xff] %v8551_v0  ;;  %v8553_v62 = vpop.permute.xlu0 %2989 }
 0x3da   : > { %10961 = vst [vmem:[#allocation363_spill] sm:$0xff] %v8553_v62  ;;  %3245 = vrot.lane.b32.xlu1 %v8077_v23, %s5545_s6  ;;  %v5389_v62 = vld [vmem:[%s5650_s10 + $0x1f8] sm:$0xff]  }
 0x3db   : > { %3213 = vrot.lane.b32.xlu0 %v10962_v55, %s5545_s6 }
 0x3dc   : > { %v8559_v11 = vpop.permute.xlu1 %3093 }
 0x3dd   : > { %10963 = vst [vmem:[#allocation260_spill] sm:$0xff] %v8559_v11  ;;  %v8561_v17 = vpop.permute.xlu0 %3061 }
 0x3de   : > { %10964 = vst [vmem:[#allocation364_spill] sm:$0xff] %v8561_v17  ;;  %2958 = vrot.lane.b32.xlu1 %v10944_v40, %s5541_s28  ;;  %v11040_v17 = vld [vmem:[#allocation215_spill] sm:$0xff] }
 0x3df   : > { %2926 = vrot.lane.b32.xlu0 %v5388_v56, %s5541_s28 }
 0x3e0   : > { %v8566_v31 = vpop.permute.xlu1 %3162 }
 0x3e1   : > { %10965 = vst [vmem:[#allocation365_spill] sm:$0xff] %v8566_v31  ;;  %v8568_v30 = vpop.permute.xlu0 %3130  ;;  %v11039_v31 = vld [vmem:[#allocation214_spill] sm:$0xff] }
 0x3e2   : > { %10966 = vst [vmem:[#allocation366_spill] sm:$0xff] %v8568_v30  ;;  %2962 = vrot.lane.b32.xlu1 %v7570_v42, %s5541_s28 }
 0x3e3   : > { %2930 = vrot.lane.b32.xlu0 %v5389_v62, %s5541_s28 }
 0x3e4   : > { %v8574_v0 = vpop.permute.xlu1 %3231 }
 0x3e5   : > { %10967 = vst [vmem:[#allocation367_spill] sm:$0xff] %v8574_v0  ;;  %v8576_v11 = vpop.permute.xlu0 %3199  ;;  %v11038_v0 = vld [vmem:[#allocation213_spill] sm:$0xff] }
 0x3e6   : > { %10968 = vst [vmem:[#allocation368_spill] sm:$0xff] %v8576_v11  ;;  %3031 = vrot.lane.b32.xlu1 %v8084_v52, %s5542_s29  ;;  %v10973_v52 = vld [vmem:[#allocation266_spill] sm:$0xff] }
 0x3e7   : > { %2999 = vrot.lane.b32.xlu0 %v10953_v39, %s5542_s29 }
 0x3e8   : > { %v8582_v40 = vpop.permute.xlu1 %3097 }
 0x3e9   : > { %10969 = vst [vmem:[#allocation369_spill] sm:$0xff] %v8582_v40  ;;  %v8584_v56 = vpop.permute.xlu0 %3065 }
 0x3ea   : > { %10970 = vst [vmem:[#allocation370_spill] sm:$0xff] %v8584_v56  ;;  %2960 = vrot.lane.b32.xlu1 %v10956_v61, %s5541_s28  ;;  %v10978_v56 = vld [vmem:[#allocation227_spill] sm:$0xff] }
 0x3eb   : > { %2928 = vrot.lane.b32.xlu0 %v10957_v33, %s5541_s28 }
 0x3ec   : > { %v8590_v42 = vpop.permute.xlu1 %3160 }
 0x3ed   : > { %10971 = vst [vmem:[#allocation371_spill] sm:$0xff] %v8590_v42  ;;  %v8592_v30 = vpop.permute.xlu0 %3128 }
 0x3ee   : > { %10972 = vst [vmem:[#allocation372_spill] sm:$0xff] %v8592_v30  ;;  %3035 = vrot.lane.b32.xlu1 %v8103_v25, %s5542_s29 }
 0x3ef   : > { %3003 = vrot.lane.b32.xlu0 %v10973_v52, %s5542_s29 }
 0x3f0   : > { %v8598_v39 = vpop.permute.xlu1 %3235 }
 0x3f1   : > { %10974 = vst [vmem:[#allocation266_spill] sm:$0xff] %v8598_v39  ;;  %v8600_v40 = vpop.permute.xlu0 %3203 }
 0x3f2   : > { %10975 = vst [vmem:[#allocation373_spill] sm:$0xff] %v8600_v40  ;;  %3107 = vrot.lane.b32.xlu1 %v10891_v41, %s5543_s4 }
 0x3f3   : > { %3075 = vrot.lane.b32.xlu0 %v7447_v13, %s5543_s4 }
 0x3f4   : > { %v8606_v61 = vpop.permute.xlu1 %3164 }
 0x3f5   : > { %10976 = vst [vmem:[#allocation374_spill] sm:$0xff] %v8606_v61  ;;  %v8608_v33 = vpop.permute.xlu0 %3132 }
 0x3f6   : > { %10977 = vst [vmem:[#allocation375_spill] sm:$0xff] %v8608_v33  ;;  %2964 = vrot.lane.b32.xlu1 %v7807_v37, %s5541_s28  ;;  %v10983_v33 = vld [vmem:[#allocation210_spill] sm:$0xff] }
 0x3f7   : > { %2932 = vrot.lane.b32.xlu0 %v10978_v56, %s5541_s28 }
 0x3f8   : > { %v8614_v39 = vpop.permute.xlu1 %3233 }
 0x3f9   : > { %10979 = vst [vmem:[#allocation227_spill] sm:$0xff] %v8614_v39  ;;  %v8616_v40 = vpop.permute.xlu0 %3201  ;;  %v5398_v39 = vld [vmem:[%s5650_s10 + $0xfc] sm:$0xff]  }
 0x3fa   : > { %10980 = vst [vmem:[#allocation376_spill] sm:$0xff] %v8616_v40  ;;  %3033 = vrot.lane.b32.xlu1 %v8077_v23, %s5542_s29  ;;  %v5390_v23 = vld [vmem:[%s5650_s10 + $0x258] sm:$0xff]  }
 0x3fb   : > { %3001 = vrot.lane.b32.xlu0 %v10962_v55, %s5542_s29 }
 0x3fc   : > { %v8622_v13 = vpop.permute.xlu1 %3237 }
 0x3fd   : > { %10981 = vst [vmem:[#allocation377_spill] sm:$0xff] %v8622_v13  ;;  %v8624_v41 = vpop.permute.xlu0 %3205 }
 0x3fe   : > { %10982 = vst [vmem:[#allocation378_spill] sm:$0xff] %v8624_v41  ;;  %3111 = vrot.lane.b32.xlu1 %v10983_v33, %s5543_s4 }
 0x3ff   : > { %3079 = vrot.lane.b32.xlu0 %v7469_v54, %s5543_s4  ;;  %v10988_v54 = vld [vmem:[#allocation264_spill] sm:$0xff] }
 0x400   : > { %v8630_v61 = vpop.permute.xlu1 %2950 }
 0x401   : > { %10984 = vst [vmem:[#allocation210_spill] sm:$0xff] %v8630_v61  ;;  %v8632_v40 = vpop.permute.xlu0 %2918 }
 0x402   : > { %10985 = vst [vmem:[#allocation379_spill] sm:$0xff] %v8632_v40  ;;  %3174 = vrot.lane.b32.xlu1 %v5390_v23, %s5544_s5  ;;  %v5397_v40 = vld [vmem:[%s5650_s10 + $0x104] ss:$0 sps:$4 sm:$0x11]  }
 0x403   : > { %3142 = vrot.lane.b32.xlu0 %v5389_v62, %s5544_s5 }
 0x404   : > { %v8637_v55 = vpop.permute.xlu1 %2954 }
 0x405   : > { %10986 = vst [vmem:[#allocation380_spill] sm:$0xff] %v8637_v55  ;;  %v8639_v41 = vpop.permute.xlu0 %2922  ;;  %v5392_v55 = vld [vmem:[%s5650_s10 + $0x204] sm:$0xff]  }
 0x406   : > { %10987 = vst [vmem:[#allocation381_spill] sm:$0xff] %v8639_v41  ;;  %3037 = vrot.lane.b32.xlu1 %v8096_v6, %s5542_s29  ;;  %v5391_v41 = vld [vmem:[%s5650_s10 + $0x264] sm:$0xff]  }
 0x407   : > { %3005 = vrot.lane.b32.xlu0 %v10988_v54, %s5542_s29 }
 0x408   : > { %v8645_v13 = vpop.permute.xlu1 %3023 }
 0x409   : > { %10989 = vst [vmem:[#allocation264_spill] sm:$0xff] %v8645_v13  ;;  %v8647_v61 = vpop.permute.xlu0 %2991 }
 0x40a   : > { %10990 = vst [vmem:[#allocation382_spill] sm:$0xff] %v8647_v61  ;;  %3109 = vrot.lane.b32.xlu1 %v10890_v59, %s5543_s4 }
 0x40b   : > { %3077 = vrot.lane.b32.xlu0 %v7429_v2, %s5543_s4 }
 0x40c   : > { %v8653_v62 = vpop.permute.xlu1 %2952 }
 0x40d   : > { %10991 = vst [vmem:[#allocation383_spill] sm:$0xff] %v8653_v62  ;;  %v8655_v23 = vpop.permute.xlu0 %2920 }
 0x40e   : > { %10992 = vst [vmem:[#allocation384_spill] sm:$0xff] %v8655_v23  ;;  %3178 = vrot.lane.b32.xlu1 %v5391_v41, %s5544_s5  ;;  %v10997_v23 = vld [vmem:[#allocation207_spill] sm:$0xff] }
 0x40f   : > { %3146 = vrot.lane.b32.xlu0 %v5392_v55, %s5544_s5 }
 0x410   : > { %v8661_v13 = vpop.permute.xlu1 %3027 }
 0x411   : > { %10993 = vst [vmem:[#allocation385_spill] sm:$0xff] %v8661_v13  ;;  %v8663_v61 = vpop.permute.xlu0 %2995 }
 0x412   : > { %10994 = vst [vmem:[#allocation386_spill] sm:$0xff] %v8663_v61  ;;  %3247 = vrot.lane.b32.xlu1 %v8103_v25, %s5545_s6 }
 0x413   : > { %3215 = vrot.lane.b32.xlu0 %v10973_v52, %s5545_s6 }
 0x414   : > { %v8669_v2 = vpop.permute.xlu1 %3099 }
 0x415   : > { %10995 = vst [vmem:[#allocation387_spill] sm:$0xff] %v8669_v2  ;;  %v8671_v59 = vpop.permute.xlu0 %3067 }
 0x416   : > { %10996 = vst [vmem:[#allocation388_spill] sm:$0xff] %v8671_v59  ;;  %3113 = vrot.lane.b32.xlu1 %v10997_v23, %s5543_s4  ;;  %v8692_v59 = vld [vmem:[%s5650_s10 + $0x270] sm:$0xff]  }
 0x417   : > { %3081 = vrot.lane.b32.xlu0 %v7451_v21, %s5543_s4  ;;  %v11002_v21 = vld [vmem:[#allocation270_spill] sm:$0xff] }
 0x418   : > { %v8677_v62 = vpop.permute.xlu1 %2956 }
 0x419   : > { %10998 = vst [vmem:[#allocation207_spill] sm:$0xff] %v8677_v62  ;;  %v8679_v13 = vpop.permute.xlu0 %2924 }
 0x41a   : > { %10999 = vst [vmem:[#allocation389_spill] sm:$0xff] %v8679_v13  ;;  %3176 = vrot.lane.b32.xlu1 %v7807_v37, %s5544_s5  ;;  %v2837_v37 = vshrl.u32 %v8692_v59, 16 }
 0x41b   : > { %3144 = vrot.lane.b32.xlu0 %v10978_v56, %s5544_s5  ;;  %v11005_v56 = vld [vmem:[#allocation230_spill] sm:$0xff] }
 0x41c   : > { %v8685_v25 = vpop.permute.xlu1 %3025  ;;  %v8711_v61 = vrot.slane %v2837_v37, 7 }
 0x41d   : > { %11000 = vst [vmem:[#allocation390_spill] sm:$0xff] %v8685_v25  ;;  %v8687_v52 = vpop.permute.xlu0 %2993 }
 0x41e   : > { %11001 = vst [vmem:[#allocation391_spill] sm:$0xff] %v8687_v52  ;;  %3251 = vrot.lane.b32.xlu1 %v8119_v34, %s5545_s6 }
 0x41f   : > { %3219 = vrot.lane.b32.xlu0 %v11002_v21, %s5545_s6 }
 0x420   : > { %v8696_v62 = vpop.permute.xlu1 %3103 }
 0x421   : > { %11003 = vst [vmem:[#allocation270_spill] sm:$0xff] %v8696_v62  ;;  %v8698_v13 = vpop.permute.xlu0 %3071  ;;  %v2840_v62 = vshll.u32 %v8692_v59, 16 }
 0x422   : > { %11004 = vst [vmem:[#allocation392_spill] sm:$0xff] %v8698_v13  ;;  %3180 = vrot.lane.b32.xlu1 %v7821_v22, %s5544_s5 }
 0x423   : > { %3148 = vrot.lane.b32.xlu0 %v11005_v56, %s5544_s5  ;;  %v11010_v56 = vld [vmem:[#allocation268_spill] sm:$0xff] }
 0x424   : > { %v8705_v52 = vpop.permute.xlu1 %3166 }
 0x425   : > { %11006 = vst [vmem:[#allocation230_spill] sm:$0xff] %v8705_v52  ;;  %v8707_v25 = vpop.permute.xlu0 %3134 }
 0x426   : > { %11007 = vst [vmem:[#allocation393_spill] sm:$0xff] %v8707_v25  ;;  %3249 = vrot.lane.b32.xlu1 %v8096_v6, %s5545_s6  ;;  %v2842_v25 = vor.u32 %v2840_v62, %v8711_v61 }
 0x427   : > { %3217 = vrot.lane.b32.xlu0 %v10988_v54, %s5545_s6 }
 0x428   : > { %v8716_v13 = vpop.permute.xlu1 %3029 }
 0x429   : > { %11008 = vst [vmem:[#allocation394_spill] sm:$0xff] %v8716_v13  ;;  %v8718_v2 = vpop.permute.xlu0 %2997 }
 0x42a   : > { %11009 = vst [vmem:[#allocation395_spill] sm:$0xff] %v8718_v2  ;;  %3221 = vrot.lane.b32.xlu1 %v11010_v56, %s5545_s6 }
 0x42b   : > { %2899 = vrot.lane.b32.xlu0 %v10983_v33, %s5540_s27 }
 0x42c   : > { %v8725_v6 = vpop.permute.xlu1 %3101 }
 0x42d   : > { %11011 = vst [vmem:[#allocation268_spill] sm:$0xff] %v8725_v6  ;;  %v8727_v52 = vpop.permute.xlu0 %3069  ;;  %v8743_v6 = vld [vmem:[%s5650_s10 + $0x210] sm:$0xff]  }
 0x42e   : > { %11012 = vst [vmem:[#allocation396_spill] sm:$0xff] %v8727_v52  ;;  %2903 = vrot.lane.b32.xlu1 %v2842_v25, %s5540_s27  ;;  %v8748_v52 = vld [vmem:[%s5650_s10 + $0x278] ss:$0 sps:$4 sm:$0x11]  }
 0x42f   : > { %3253 = vrot.lane.b32.xlu0 %v8112_v63, %s5545_s6 }
 0x430   : > { %v8732_v54 = vpop.permute.xlu1 %3170 }
 0x431   : > { %11013 = vst [vmem:[#allocation397_spill] sm:$0xff] %v8732_v54  ;;  %v8734_v2 = vpop.permute.xlu0 %3138 }
 0x432   : > { %11014 = vst [vmem:[#allocation398_spill] sm:$0xff] %v8734_v2  ;;  %2966 = vrot.lane.b32.xlu1 %v5391_v41, %s5541_s28  ;;  %v2977_v2 = vshll.u32 %v8748_v52, 16 }
 0x433   : > { %2934 = vrot.lane.b32.xlu0 %v5392_v55, %s5541_s28  ;;  %v2974_v55 = vrot.slane %v2840_v62, 1 }
 0x434   : > { %v8738_v13 = vpop.permute.xlu1 %3239 }
 0x435   : > { %11015 = vst [vmem:[#allocation399_spill] sm:$0xff] %v8738_v13  ;;  %v8740_v33 = vpop.permute.xlu0 %3207 }
 0x436   : > { %11016 = vst [vmem:[#allocation400_spill] sm:$0xff] %v8740_v33  ;;  %2938 = vrot.lane.b32.xlu1 %v8743_v6, %s5541_s28 }
 0x437   : > { %2901 = vrot.lane.b32.xlu0 %v10997_v23, %s5540_s27  ;;  %v2975_v23 = vor.u32 %v2974_v55, %v2837_v37  ;;  %v8787_v37 = vld [vmem:[%s5650_s10 + $0x27c] sm:$0xff]   ;;  %v11027_v55 = vld [vmem:[#allocation274_spill] sm:$0xff] }
 0x438   : > { %v8752_v54 = vpop.permute.xlu1 %3105  ;;  %11026 = vst [vmem:[#allocation410_spill] sm:$0xff] %v8787_v37 }
 0x439   : > { %11017 = vst [vmem:[#allocation401_spill] sm:$0xff] %v8752_v54  ;;  %v8754_v41 = vpop.permute.xlu0 %3073  ;;  %v2979_v54 = vrot.slane %v2977_v2, 1 }
 0x43a   : > { %11018 = vst [vmem:[#allocation402_spill] sm:$0xff] %v8754_v41  ;;  %3007 = vrot.lane.b32.xlu1 %v11002_v21, %s5542_s29 }
 0x43b   : > { %2970 = vrot.lane.b32.xlu0 %v8692_v59, %s5541_s28  ;;  %v8776_v41 = vsel %vm485_vm0, %v2975_v23, %v2979_v54  ;;  %v5395_v23 = vld [vmem:[%s5650_s10 + $0xf8] ss:$0 sps:$4 sm:$0x11]  }
 0x43c   : > { %v8761_v33 = vpop.permute.xlu1 %3168  ;;  %11023 = vst [vmem:[#allocation407_spill] sm:$0xff] %v8776_v41 }
 0x43d   : > { %11019 = vst [vmem:[#allocation403_spill] sm:$0xff] %v8761_v33  ;;  %v8763_v13 = vpop.permute.xlu0 %3136 }
 0x43e   : > { %11020 = vst [vmem:[#allocation404_spill] sm:$0xff] %v8763_v13  ;;  %2905 = vrot.lane.b32.xlu1 %v8711_v61, %s5540_s27  ;;  %v5394_v13 = vld [vmem:[%s5650_s10 + $0x20c] ss:$0 sps:$4 sm:$0x11]  }
 0x43f   : > { %3039 = vrot.lane.b32.xlu0 %v8119_v34, %s5542_s29 }
 0x440   : > { %v8769_v62 = vpop.permute.xlu1 %3243 }
 0x441   : > { %11021 = vst [vmem:[#allocation405_spill] sm:$0xff] %v8769_v62  ;;  %v8771_v21 = vpop.permute.xlu0 %3211  ;;  %v11031_v62 = vld [vmem:[#allocation204_spill] sm:$0xff] }
 0x442   : > { %11022 = vst [vmem:[#allocation406_spill] sm:$0xff] %v8771_v21  ;;  %2968 = vrot.lane.b32.xlu1 %v7821_v22, %s5541_s28 }
 0x443   : > { %2936 = vrot.lane.b32.xlu0 %v5394_v13, %s5541_s28 }
 0x444   : > { %v8780_v2 = vpop.permute.xlu1 %3172 }
 0x445   : > { %11024 = vst [vmem:[#allocation408_spill] sm:$0xff] %v8780_v2  ;;  %v8782_v34 = vpop.permute.xlu0 %3140  ;;  %v5396_v2 = vld [vmem:[%s5650_s10 + $0xf0] sm:$0xff]  }
 0x446   : > { %11025 = vst [vmem:[#allocation409_spill] sm:$0xff] %v8782_v34  ;;  %3043 = vrot.lane.b32.xlu1 %v8776_v41, %s5542_s29  ;;  %v11030_v34 = vld [vmem:[#allocation201_spill] sm:$0xff]  ;;  %v3264_v33 = vsel %vm1649_vm2, %v5396_v2, %v11031_v62  ;;  %v5400_v62 = vld [vmem:[%s5650_s10 + $0x108] sm:$0xff]   ;;  %v11036_v2 = vld [vmem:[#allocation211_spill] sm:$0xff] }
 0x447   : > { %3011 = vrot.lane.b32.xlu0 %v11027_v55, %s5542_s29  ;;  %v3266_v21 = vsel %vm1649_vm2, %v5395_v23, %v11030_v34  ;;  %v5399_v34 = vld [vmem:[%s5650_s10 + $0x110] ss:$0 sps:$4 sm:$0x11]   ;;  %v11035_v23 = vld [vmem:[#allocation209_spill] sm:$0xff]  ;;  %v3272_v11 = vsel %vm1649_vm2, %v5400_v62, %v11036_v2 }
 0x448   : > { %v8791_v22 = vpop.permute.xlu1 %3241  ;;  %v3274_v42 = vsel %vm1649_vm2, %v5399_v34, %v11035_v23  ;;  %v5404_v23 = vld [vmem:[%s5650_s10 + $0x120] sm:$0xff]   ;;  %v5406_v55 = vld [vmem:[%s5650_s10 + $0x12c] sm:$0xff]  }
 0x449   : > { %11028 = vst [vmem:[#allocation411_spill] sm:$0xff] %v8791_v22  ;;  %v8793_v54 = vpop.permute.xlu0 %3209  ;;  %v11032_v22 = vld [vmem:[#allocation205_spill] sm:$0xff]  ;;  %v3280_v62 = vsel %vm1649_vm2, %v5404_v23, %v11040_v17 }
 0x44a   : > { %11029 = vst [vmem:[#allocation412_spill] sm:$0xff] %v8793_v54  ;;  %3115 = vrot.lane.b32.xlu1 %v2842_v25, %s5543_s4  ;;  %v3270_v54 = vsel %vm1649_vm2, %v5397_v40, %v11032_v22  ;;  %v11033_v25 = vld [vmem:[#allocation208_spill] sm:$0xff]  ;;  %v11045_v17 = vld [vmem:[#allocation217_spill] sm:$0xff] }
 0x44b   : > { %v3268_v30 = vsel %vm1649_vm2, %v5398_v39, %v11033_v25  ;;  %3083 = vrot.lane.b32.xlu0 %v7489_v45, %s5543_s4  ;;  %v5401_v40 = vld [vmem:[%s5650_s10 + $0x11c] ss:$0 sps:$4 sm:$0x11]   ;;  %v5402_v25 = vld [vmem:[%s5650_s10 + $0x114] sm:$0xff]   ;;  %v3284_v23 = vsel %vm1649_vm2, %v5406_v55, %v11045_v17 }
 0x44c   : > { %v8811_v13 = vpop.permute.xlu1 %3245  ;;  %v11037_v22 = vld [vmem:[#allocation212_spill] sm:$0xff]  ;;  %v3276_v45 = vsel %vm1649_vm2, %v5402_v25, %v11038_v0  ;;  %v5405_v25 = vld [vmem:[%s5650_s10 + $0x134] ss:$0 sps:$4 sm:$0x11]  }
 0x44d   : > { %11034 = vst [vmem:[#allocation201_spill] sm:$0xff] %v8811_v13  ;;  %v3278_v39 = vsel %vm1649_vm2, %v5401_v40, %v11037_v22  ;;  %v5403_v13 = vld [vmem:[%s5650_s10 + $0x128] ss:$0 sps:$4 sm:$0x11]   ;;  %v8831_v2 = vpop.permute.xlu0 %3213  ;;  %v11042_v40 = vshrl.u32 %v8787_v37, 16 }
 0x44e   : > { %v3282_v34 = vsel %vm1649_vm2, %v5403_v13, %v11039_v31  ;;  %11041 = vst [vmem:[#allocation204_spill] sm:$0xff] %v8831_v2  ;;  %2972 = vrot.lane.b32.xlu1 %v8748_v52, %s5541_s28  ;;  %v11044_v31 = vld [vmem:[#allocation216_spill] sm:$0xff]  ;;  %v5409_v0 = vld [vmem:[%s5650_s10 + $0x164] ss:$0 sps:$4 sm:$0x11]  }
 0x44f   : > { %v8837_v22 = vrot.slane %v11042_v40, 7  ;;  %v3286_v13 = vsel %vm1649_vm2, %v5405_v25, %v11044_v31  ;;  %v5407_v2 = vld [vmem:[%s5650_s10 + $0x158] ss:$0 sps:$4 sm:$0x11]   ;;  %v5408_v40 = vld [vmem:[%s5650_s10 + $0x150] sm:$0xff]   ;;  %v3302_v3 = vsel %vm1649_vm2, %v5409_v0, %v11048_v53  ;;  %v5410_v25 = vld [vmem:[%s5650_s10 + $0x15c] sm:$0xff]  }
 0x450   : > { %v3298_v41 = vsel %vm1649_vm2, %v5407_v2, %v11046_v16  ;;  %v3296_v57 = vsel %vm1649_vm2, %v5408_v40, %v11047_v24  ;;  %v11049_v31 = vld [vmem:[#allocation229_spill] sm:$0xff]  ;;  %v5411_v17 = vld [vmem:[%s5650_s10 + $0x170] ss:$0 sps:$4 sm:$0x11]   ;;  %v5412_v2 = vld [vmem:[%s5650_s10 + $0x168] sm:$0xff]   ;;  %v8869_v53 = vpop.permute.xlu1 %2958 }
 0x451   : > { %11043 = vst [vmem:[#allocation205_spill] sm:$0xff] %v8837_v22  ;;  %v3300_v55 = vsel %vm1649_vm2, %v5410_v25, %v11049_v31  ;;  %v3306_v16 = vsel %vm1649_vm2, %v5411_v17, %v11050_v32  ;;  %v3304_v24 = vsel %vm1649_vm2, %v5412_v2, %v11051_v46  ;;  %v8865_v40 = vld [vmem:[%s5650_s10 + $0x218] ss:$0 sps:$4 sm:$0x11]   ;;  %11053 = vst [vmem:[#allocation209_spill] sm:$0xff] %v8869_v53  ;;  %v5417_v46 = vld [vmem:[%s5650_s10 + $0x180] sm:$0xff]  }
 0x452   : > { %11052 = vst [vmem:[#allocation208_spill] sm:$0xff] %v8865_v40  ;;  %2940 = vrot.lane.b32.xlu0 %v8865_v40, %s5541_s28  ;;  %v5414_v0 = vld [vmem:[%s5650_s10 + $0x17c] ss:$0 sps:$4 sm:$0x11]   ;;  %v5415_v31 = vld [vmem:[%s5650_s10 + $0x174] sm:$0xff]   ;;  %v11058_v40 = vld [vmem:[#allocation237_spill] sm:$0xff]  ;;  %3041 = vrot.lane.b32.xlu1 %v8112_v63, %s5542_s29 }
 0x453   : > { %v3310_v25 = vsel %vm1649_vm2, %v5414_v0, %v11054_v8  ;;  %v3308_v32 = vsel %vm1649_vm2, %v5415_v31, %v11055_v9  ;;  %v5416_v17 = vld [vmem:[%s5650_s10 + $0x188] ss:$0 sps:$4 sm:$0x11]   ;;  %v11057_v2 = vld [vmem:[#allocation236_spill] sm:$0xff]  ;;  %v3318_v53 = vsel %vm1649_vm2, %v5418_v47, %v11058_v40  ;;  %v3316_v8 = vsel %vm1649_vm2, %v5419_v44, %v11059_v10  ;;  %v8891_v9 = vpop.permute.xlu0 %2926  ;;  %s175_s28 = sand.u32 1, %s5510_s13  }
 0x454   : > { %v3314_v51 = vsel %vm1649_vm2, %v5416_v17, %v11056_v38  ;;  %v3312_v27 = vsel %vm1649_vm2, %v5417_v46, %v11057_v2  ;;  %v11060_v0 = vld [vmem:[#allocation244_spill] sm:$0xff]  ;;  %11061 = vst [vmem:[#allocation211_spill] sm:$0xff] %v8891_v9  ;;  %v11062_v38 = vshll.u32 %v8787_v37, 16  ;;  %v11063_v17 = vld [vmem:[#allocation245_spill] sm:$0xff]  ;;  %v11064_v47 = vld [vmem:[#allocation246_spill] sm:$0xff]  ;;  %s4581_s27 = scalar_lea.sflag [#allocation3], %s175_s28 }
 0x455   : > { %v3330_v49 = vsel %vm1682_vm3, %v3266_v21, %v11060_v0  ;;  %v3328_v46 = vsel %vm1682_vm3, %v3264_v33, %v11063_v17  ;;  %v3334_v40 = vsel %vm1682_vm3, %v3270_v54, %v11064_v47  ;;  %v11065_v2 = vld [vmem:[#allocation247_spill] sm:$0xff]  ;;  %v11066_v10 = vld [vmem:[#allocation248_spill] sm:$0xff]  ;;  %v11067_v0 = vld [vmem:[#allocation249_spill] sm:$0xff]  ;;  %v8916_v54 = vpop.permute.xlu1 %2962 }
 0x456   : > { %v3058_v31 = vor.u32 %v11062_v38, %v8837_v22  ;;  %v3332_v44 = vsel %vm1682_vm3, %v3268_v30, %v11065_v2  ;;  %v3338_v21 = vsel %vm1682_vm3, %v3274_v42, %v11066_v10  ;;  %v3336_v9 = vsel %vm1682_vm3, %v3272_v11, %v11067_v0  ;;  %v11068_v63 = vld [vmem:[#allocation250_spill] sm:$0xff]  ;;  %v11069_v37 = vld [vmem:[#allocation251_spill] sm:$0xff]  ;;  %v11070_v22 = vld [vmem:[#allocation252_spill] sm:$0xff]  ;;  %3009 = vrot.lane.b32.xlu0 %v11010_v56, %s5542_s29 }
 0x457   : > { %v3342_v12 = vsel %vm1682_vm3, %v3278_v39, %v11068_v63  ;;  %v3340_v38 = vsel %vm1682_vm3, %v3276_v45, %v11069_v37  ;;  %v3346_v33 = vsel %vm1682_vm3, %v3282_v34, %v11070_v22  ;;  %11071 = vst [vmem:[#allocation212_spill] sm:$0xff] %v8916_v54  ;;  %v11072_v30 = vld [vmem:[#allocation253_spill] sm:$0xff]  ;;  %v11073_v17 = vld [vmem:[#allocation254_spill] sm:$0xff]  ;;  %v11074_v47 = vld [vmem:[#allocation255_spill] sm:$0xff] }
 0x458   : > { %v3344_v42 = vsel %vm1682_vm3, %v3280_v62, %v11072_v30  ;;  %v3350_v11 = vsel %vm1682_vm3, %v3286_v13, %v11073_v17  ;;  %v3348_v39 = vsel %vm1682_vm3, %v3284_v23, %v11074_v47  ;;  %v11075_v2 = vld [vmem:[#allocation261_spill] sm:$0xff]  ;;  %v11076_v45 = vld [vmem:[#allocation263_spill] sm:$0xff]  ;;  %v8934_v30 = vpop.permute.xlu0 %2930  ;;  %3119 = vrot.lane.b32.xlu1 %v3058_v31, %s5543_s4 }
 0x459   : > { %v3362_v37 = vsel %vm1682_vm3, %v3298_v41, %v11075_v2  ;;  %v3360_v34 = vsel %vm1682_vm3, %v3296_v57, %v11076_v45  ;;  %v11077_v22 = vld [vmem:[#allocation265_spill] sm:$0xff]  ;;  %v11078_v10 = vld [vmem:[#allocation267_spill] sm:$0xff] }
 0x45a   : > { %v3366_v56 = vsel %vm1682_vm3, %v3302_v3, %v11077_v22  ;;  %v3364_v0 = vsel %vm1682_vm3, %v3300_v55, %v11078_v10  ;;  %v11079_v63 = vld [vmem:[#allocation269_spill] sm:$0xff]  ;;  %v11080_v13 = vld [vmem:[#allocation271_spill] sm:$0xff] }
 0x45b   : > { %v3370_v62 = vsel %vm1682_vm3, %v3306_v16, %v11079_v63  ;;  %v3368_v23 = vsel %vm1682_vm3, %v3304_v24, %v11080_v13  ;;  %v11081_v41 = vld [vmem:[#allocation273_spill] sm:$0xff]  ;;  %v11082_v57 = vld [vmem:[#allocation275_spill] sm:$0xff]  ;;  %v11085_v16 = vld [vmem:[#allocation280_spill] sm:$0xff]  ;;  %v8955_v13 = vpop.permute.xlu1 %3031 }
 0x45c   : > { %v3374_v17 = vsel %vm1682_vm3, %v3310_v25, %v11081_v41  ;;  %v3372_v47 = vsel %vm1682_vm3, %v3308_v32, %v11082_v57  ;;  %v11083_v3 = vld [vmem:[#allocation277_spill] sm:$0xff]  ;;  %v11084_v55 = vld [vmem:[#allocation279_spill] sm:$0xff]  ;;  %v3382_v22 = vsel %vm1682_vm3, %v3318_v53, %v11085_v16  ;;  %v11087_v63 = vld [vmem:[#allocation286_spill] sm:$0xff]  ;;  %v8971_v54 = vpop.permute.xlu0 %2999  ;;  %3182 = vrot.lane.b32.xlu1 %v8692_v59, %s5544_s5 }
 0x45d   : > { %v3378_v2 = vsel %vm1682_vm3, %v3314_v51, %v11083_v3  ;;  %v3376_v45 = vsel %vm1682_vm3, %v3312_v27, %v11084_v55  ;;  %v11086_v10 = vld [vmem:[#allocation281_spill] sm:$0xff]  ;;  %v3394_v24 = vsel %vm1715_vm4, %v3330_v49, %v11087_v63  ;;  %v11088_v25 = vld [vmem:[#allocation186_spill] sm:$0xff]  ;;  %v11089_v32 = vld [vmem:[#allocation287_spill] sm:$0xff] }
 0x45e   : > { %v3380_v31 = vsel %vm1682_vm3, %v3316_v8, %v11086_v10  ;;  %3087 = vrot.lane.b32.xlu0 %v11088_v25, %s5543_s4  ;;  %v3392_v51 = vsel %vm1715_vm4, %v3328_v46, %v11089_v32  ;;  %v11090_v41 = vld [vmem:[#allocation288_spill] sm:$0xff]  ;;  %v11091_v57 = vld [vmem:[#allocation289_spill] sm:$0xff]  ;;  %v11092_v3 = vld [vmem:[#allocation290_spill] sm:$0xff]  ;;  %v2981_v46 = vshrl.u32 %v8748_v52, 16 }
 0x45f   : > { %v3398_v27 = vsel %vm1715_vm4, %v3334_v40, %v11090_v41  ;;  %v3396_v53 = vsel %vm1715_vm4, %v3332_v44, %v11091_v57  ;;  %v3402_v8 = vsel %vm1715_vm4, %v3338_v21, %v11092_v3  ;;  %v11093_v55 = vld [vmem:[#allocation291_spill] sm:$0xff]  ;;  %v11094_v16 = vld [vmem:[#allocation292_spill] sm:$0xff]  ;;  %v11095_v63 = vld [vmem:[#allocation293_spill] sm:$0xff] }
 0x460   : > { %v3400_v49 = vsel %vm1715_vm4, %v3336_v9, %v11093_v55  ;;  %v3406_v10 = vsel %vm1715_vm4, %v3342_v12, %v11094_v16  ;;  %v3404_v25 = vsel %vm1715_vm4, %v3340_v38, %v11095_v63  ;;  %v11096_v40 = vld [vmem:[#allocation294_spill] sm:$0xff]  ;;  %v11097_v21 = vld [vmem:[#allocation295_spill] sm:$0xff]  ;;  %v11098_v9 = vld [vmem:[#allocation296_spill] sm:$0xff]  ;;  %3045 = vrot.lane.b32.xlu1 %v2981_v46, %s5542_s29 }
 0x461   : > { %v3410_v44 = vsel %vm1715_vm4, %v3346_v33, %v11096_v40  ;;  %v3408_v32 = vsel %vm1715_vm4, %v3344_v42, %v11097_v21  ;;  %v8982_v41 = vsel %vm1715_vm4, %v3350_v11, %v11098_v9  ;;  %v11099_v12 = vld [vmem:[#allocation297_spill] sm:$0xff]  ;;  %v11100_v57 = vld [vmem:[#allocation302_spill] sm:$0xff]  ;;  %v11101_v59 = vld [vmem:[#allocation303_spill] sm:$0xff]  ;;  %v8998_v11 = vpop.permute.xlu1 %2960 }
 0x462   : > { %v8986_v38 = vsel %vm1715_vm4, %v3348_v39, %v11099_v12  ;;  %v3426_v3 = vsel %vm1715_vm4, %v3362_v37, %v11100_v57  ;;  %v3424_v55 = vsel %vm1715_vm4, %v3360_v34, %v11101_v59  ;;  %v11102_v16 = vld [vmem:[#allocation304_spill] sm:$0xff]  ;;  %v11103_v63 = vld [vmem:[#allocation305_spill] sm:$0xff]  ;;  %3150 = vrot.lane.b32.xlu0 %v8743_v6, %s5544_s5  ;;  %v11104_v40 = vld [vmem:[#allocation306_spill] sm:$0xff] }
 0x463   : > { %v3430_v33 = vsel %vm1715_vm4, %v3366_v56, %v11102_v16  ;;  %v3428_v42 = vsel %vm1715_vm4, %v3364_v0, %v11103_v63  ;;  %v3434_v39 = vsel %vm1715_vm4, %v3370_v62, %v11104_v40  ;;  %v11105_v21 = vld [vmem:[#allocation307_spill] sm:$0xff]  ;;  %v11106_v9 = vld [vmem:[#allocation308_spill] sm:$0xff]  ;;  %v11107_v12 = vld [vmem:[#allocation309_spill] sm:$0xff]  ;;  %v9022_v40 = vpop.permute.xlu0 %2928 }
 0x464   : > { %v3432_v37 = vsel %vm1715_vm4, %v3368_v23, %v11105_v21  ;;  %v3438_v34 = vsel %vm1715_vm4, %v3374_v17, %v11106_v9  ;;  %v3436_v56 = vsel %vm1715_vm4, %v3372_v47, %v11107_v12  ;;  %v11108_v57 = vld [vmem:[#allocation310_spill] sm:$0xff]  ;;  %v11109_v59 = vld [vmem:[#allocation311_spill] sm:$0xff]  ;;  %v11110_v16 = vld [vmem:[#allocation189_spill] sm:$0xff]  ;;  %v3460_v9 = vsel %vm1748_vm5, %v3396_v53, %v8241_v35  ;;  %3117 = vrot.lane.b32.xlu1 %v8711_v61, %s5543_s4 }
 0x465   : > { %v9010_v0 = vsel %vm1715_vm4, %v3378_v2, %v11108_v57  ;;  %v3440_v6 = vsel %vm1715_vm4, %v3376_v45, %v11109_v59  ;;  %v9016_v63 = vsel %vm1715_vm4, %v3382_v22, %v11110_v16  ;;  %v11111_v62 = vld [vmem:[#allocation312_spill] sm:$0xff]  ;;  %v11112_v17 = vld [vmem:[#allocation198_spill] sm:$0xff]  ;;  %v11114_v21 = vld [vmem:[#allocation203_spill] sm:$0xff]  ;;  %v9051_v35 = vsel %vm1748_vm5, %v3410_v44, %v8263_v29 }
 0x466   : > { %v9020_v23 = vsel %vm1715_vm4, %v3380_v31, %v11111_v62  ;;  %v3458_v47 = vsel %vm1748_vm5, %v3394_v24, %v11112_v17  ;;  %v11113_v2 = vld [vmem:[#allocation202_spill] sm:$0xff]  ;;  %v3462_v22 = vsel %vm1748_vm5, %v3398_v27, %v11114_v21  ;;  %v3466_v31 = vsel %vm1748_vm5, %v3402_v8, %v8247_v20  ;;  %v11116_v59 = vld [vmem:[#allocation153_spill] sm:$0xff]  ;;  %v9047_v27 = vpop.permute.xlu1 %3035  ;;  %v11128_v21 = vld [vmem:[#allocation348_spill] sm:$0xff] }
 0x467   : > { %v3456_v45 = vsel %vm1748_vm5, %v3392_v51, %v11113_v2  ;;  %v11115_v12 = vld [vmem:[#allocation206_spill] sm:$0xff]  ;;  %v3470_v16 = vsel %vm1748_vm5, %v3406_v10, %v11116_v59  ;;  %v9043_v24 = vsel %vm1748_vm5, %v3404_v25, %v8257_v50  ;;  %v11117_v51 = vld [vmem:[#allocation272_spill] sm:$0xff]  ;;  %v9055_v20 = vsel %vm1748_vm5, %v3408_v32, %v8265_v14  ;;  %v9073_v10 = vpop.permute.xlu0 %3003 }
 0x468   : > { %v3464_v57 = vsel %vm1748_vm5, %v3400_v49, %v11115_v12  ;;  %3013 = vrot.lane.b32.xlu0 %v11117_v51, %s5542_s29  ;;  %v3490_v53 = vsel %vm1748_vm5, %v3426_v3, %v8295_v1  ;;  %v3488_v50 = vsel %vm1748_vm5, %v3424_v55, %v8297_v15  ;;  %v3494_v8 = vsel %vm1748_vm5, %v3430_v33, %v8304_v26  ;;  %v5375_v1 = vld [vmem:[%s10333_s1 + $0x30] sm:$0x3f]   ;;  %v11126_v62 = vld [vmem:[#allocation346_spill] sm:$0xff]  ;;  %v5420_v59 = vld [vmem:[%s5650_s10 + $0x21c] sm:$0xff]   ;;  %s4685_s29 = sshll.u32 %s175_s28, 7 }
 0x469   : > { %v3492_v49 = vsel %vm1748_vm5, %v3428_v42, %v8306_v58  ;;  %v9067_v29 = vsel %vm1748_vm5, %v3434_v39, %v8312_v5  ;;  %v9071_v14 = vsel %vm1748_vm5, %v3432_v37, %v8314_v43  ;;  %v9082_v58 = vsel %vm1748_vm5, %v3438_v34, %v8320_v4  ;;  %v11118_v15 = vld [vmem:[#allocation319_spill] sm:$0xff]  ;;  %v11119_v4 = vld [vmem:[#allocation180_spill] sm:$0xff]  ;;  %5177 = vmatprep.subr.msk.bf16.mxu0 %vm4223_vm1, %v5375_v1  ;;  %v11124_v37 = vld [vmem:[#allocation337_spill] sm:$0xff]  ;;  %s10228_s9 = scalar_lea.vmem [#allocation2], %s4685_s29 }
 0x46a   : > { %v9086_v5 = vsel %vm1748_vm5, %v3436_v56, %v11118_v15  ;;  %v9090_v43 = vsel %vm1748_vm5, %v3440_v6, %v8330_v60  ;;  %v3522_v26 = vsel %vm1781_vm6, %v3458_v47, %v8360_v18  ;;  %v3520_v61 = vsel %vm1781_vm6, %v3456_v45, %v8362_v36  ;;  %v9102_v44 = vpop.permute.xlu1 %3107  ;;  %5178 = vmatprep.subr.msk.bf16.mxu1 %vm4223_vm1, %v5375_v1  ;;  %v11121_v55 = vld [vmem:[#allocation335_spill] sm:$0xff]  ;;  %v11125_v56 = vld [vmem:[#allocation338_spill] sm:$0xff]  ;;  %v9138_v45 = vld [vmem:[%s5650_s10 + $0x284] ss:$0 sps:$4 sm:$0x11]  }
 0x46b   : > { %v9098_v25 = vsel %vm1781_vm6, %v3462_v22, %v8368_v7  ;;  %v4225_v32 = vsel %vm4223_vm1, %v5375_v1, 0  ;;  %v3524_v60 = vsel %vm1781_vm6, %v3460_v9, %v8370_v19  ;;  %v9108_v18 = vsel %vm1781_vm6, %v3466_v31, %v8376_v48  ;;  %v11120_v7 = vld [vmem:[#allocation218_spill] sm:$0xff]  ;;  %v11122_v19 = vld [vmem:[#allocation336_spill] sm:$0xff]  ;;  %v9122_v39 = vpop.permute.xlu0 %3075  ;;  %v11127_v47 = vld [vmem:[#allocation347_spill] sm:$0xff] }
 0x46c   : > { %3085 = vrot.lane.b32.xlu0 %v11119_v4, %s5543_s4  ;;  %v9112_v36 = vsel %vm1781_vm6, %v3464_v57, %v8378_v28  ;;  %5118 = vmatpush3.bf16.msra.mxu0 %v4225_v32  ;;  %v9116_v3 = vsel %vm1781_vm6, %v3470_v16, %v11120_v7  ;;  %v3554_v33 = vsel %vm1781_vm6, %v3490_v53, %v11121_v55  ;;  %v11123_v48 = vld [vmem:[#allocation410_spill] sm:$0xff]  ;;  %v11129_v9 = vld [vmem:[#allocation349_spill] sm:$0xff]  ;;  %v11131_v53 = vld [vmem:[#allocation351_spill] sm:$0xff]  ;;  %vm4095_vm1 = vcmask 523264  }
 0x46d   : > { %v3552_v42 = vsel %vm1781_vm6, %v3488_v50, %v11122_v19  ;;  %3186 = vrot.lane.b32.xlu1 %v11123_v48, %s5544_s5  ;;  %5170 = vmatpush3.bf16.msra.mxu1 %v4225_v32  ;;  %v5376_v28 = vld [vmem:[%s10333_s1 + $0x28] sm:$0xff]   ;;  %v3558_v34 = vsel %vm1781_vm6, %v3494_v8, %v11124_v37  ;;  %v3556_v6 = vsel %vm1781_vm6, %v3492_v49, %v11125_v56  ;;  %v11132_v8 = vld [vmem:[#allocation352_spill] sm:$0xff]  ;;  %v11133_v1 = vld [vmem:[#allocation353_spill] sm:$0xff] }
 0x46e   : > { %v3616_v17 = vsel %vm1814_vm7, %v3552_v42, %v11126_v62  ;;  %v3584_v2 = vsel %vm1814_vm7, %v3520_v61, %v11127_v47  ;;  %v3620_v22 = vsel %vm1814_vm7, %v3556_v6, %v11128_v21  ;;  %v3588_v31 = vsel %vm1814_vm7, %v3524_v60, %v11129_v9  ;;  %v11130_v12 = vld [vmem:[#allocation350_spill] sm:$0xff]  ;;  %v9148_v16 = vpop.permute.xlu1 %2964  ;;  %5119 = vmatprep.subr.bf16.mxu0 %v5376_v28  ;;  %v11134_v61 = vld [vmem:[#allocation191_spill] sm:$0xff]  ;;  %v11136_v7 = vld [vmem:[#allocation356_spill] sm:$0xff] }
 0x46f   : > { %v3680_v57 = vsel %vm10447_vm8, %v3616_v17, %v11130_v12  ;;  %v3648_v50 = vsel %vm10447_vm8, %v3584_v2, %v11131_v53  ;;  %v3618_v49 = vsel %vm1814_vm7, %v3554_v33, %v11132_v8  ;;  %v3586_v15 = vsel %vm1814_vm7, %v3522_v26, %v11133_v1  ;;  %5164 = vmatprep.subr.bf16.mxu1 %v5376_v28  ;;  %v11135_v32 = vld [vmem:[#allocation355_spill] sm:$0xff]  ;;  %v9162_v19 = vpop.permute.xlu0 %2932  ;;  %v5377_v26 = vld [vmem:[%s10333_s1 + $0x20] sm:$0xff]   ;;  %v11139_v56 = vld [vmem:[#allocation360_spill] sm:$0xff] }
 0x470   : > { %3154 = vrot.lane.b32.xlu0 %v5420_v59, %s5544_s5  ;;  %5120 = vmatpush3.bf16.msra.mxu0 %v5376_v28  ;;  %v3684_v4 = vsel %vm10447_vm8, %v3620_v22, %v11134_v61  ;;  %v3744_v60 = vsel %vm10446_vm9, %v3680_v57, %v11135_v32  ;;  %v3712_v55 = vsel %vm10446_vm9, %v3648_v50, %v11136_v7  ;;  %v11137_v42 = vld [vmem:[#allocation407_spill] sm:$0xff]  ;;  %v11140_v62 = vshll.u32 %v11123_v48, 16  ;;  %v11141_v2 = vld [vmem:[#allocation262_spill] sm:$0xff]  ;;  %v11143_v9 = vld [vmem:[#allocation224_spill] sm:$0xff] }
 0x471   : > { %3255 = vrot.lane.b32.xlu1 %v11137_v42, %s5545_s6  ;;  %5171 = vmatpush3.bf16.msra.mxu1 %v5376_v28  ;;  %v11138_v33 = vld [vmem:[#allocation359_spill] sm:$0xff]  ;;  %v3650_v6 = vsel %vm10447_vm8, %v3586_v15, %v11139_v56  ;;  %v3193_v47 = vshll.u32 %v9138_v45, 16  ;;  %v3748_v21 = vsel %vm10446_vm9, %v3684_v4, %v11141_v2  ;;  %v3776_v12 = vsel %vm1913_vm10, %v3712_v55, %v11143_v9  ;;  %v11144_v57 = vld [vmem:[#allocation274_spill] sm:$0xff]  ;;  %v11145_v53 = vld [vmem:[#allocation260_spill] sm:$0xff] }
 0x472   : > { %v3682_v37 = vsel %vm10447_vm8, %v3618_v49, %v11138_v33  ;;  %v3190_v17 = vrot.slane %v11140_v62, 1  ;;  %v11142_v22 = vld [vmem:[#allocation243_spill] sm:$0xff]  ;;  %v9184_v59 = vpop.permute.xlu1 %3033  ;;  %5121 = vmatprep.subr.bf16.mxu0 %v5377_v26  ;;  %v11146_v8 = vld [vmem:[#allocation364_spill] sm:$0xff]  ;;  %v11147_v1 = vld [vmem:[#allocation365_spill] sm:$0xff]  ;;  %5165 = vmatprep.subr.bf16.mxu1 %v5377_v26 }
 0x473   : > { %v3808_v28 = vsel %vm1913_vm10, %v3744_v60, %v11142_v22  ;;  %v3746_v50 = vsel %vm10446_vm9, %v3682_v37, %v11145_v53  ;;  %v3714_v49 = vsel %vm10446_vm9, %v3650_v6, %v11146_v8  ;;  %v3812_v15 = vsel %vm1913_vm10, %v3748_v21, %v11147_v1  ;;  %v11148_v61 = vld [vmem:[#allocation367_spill] sm:$0xff]  ;;  %v11149_v32 = vld [vmem:[#allocation368_spill] sm:$0xff]  ;;  %v9202_v42 = vpop.permute.xlu0 %3001  ;;  %v11151_v33 = vld [vmem:[#allocation205_spill] sm:$0xff] }
 0x474   : > { %3223 = vrot.lane.b32.xlu0 %v11144_v57, %s5545_s6  ;;  %5122 = vmatpush3.bf16.msra.mxu0 %v5377_v26  ;;  %v9194_v4 = vsel %vm1946_vm11, %v3808_v28, %v11148_v61  ;;  %v9198_v60 = vsel %vm1946_vm11, %v3776_v12, %v11149_v32  ;;  %v11150_v7 = vld [vmem:[#allocation371_spill] sm:$0xff]  ;;  %v5378_v37 = vld [vmem:[%s10333_s1 + $0x18] sm:$0xff]   ;;  %v11153_v62 = vld [vmem:[#allocation266_spill] sm:$0xff]  ;;  %v11154_v21 = vshrl.u32 %v11123_v48, 16  ;;  %v3195_v28 = vrot.slane %v3193_v47, 1 }
 0x475   : > { %v3810_v55 = vsel %vm1913_vm10, %v3746_v50, %v11150_v7  ;;  %3121 = vrot.lane.b32.xlu1 %v11151_v33, %s5543_s4  ;;  %5172 = vmatpush3.bf16.msra.mxu1 %v5377_v26  ;;  %v11152_v56 = vld [vmem:[#allocation372_spill] sm:$0xff]  ;;  %v9213_v2 = vsel %vm1946_vm11, %v3812_v15, %v11153_v62  ;;  %v11155_v9 = vld [vmem:[#allocation354_spill] sm:$0xff]  ;;  %v11156_v57 = vld [vmem:[#allocation227_spill] sm:$0xff]  ;;  %v3905_v15 = vshll.u32 %v9198_v60, 16 }
 0x476   : > { %v3778_v6 = vsel %vm1913_vm10, %v3714_v49, %v11152_v56  ;;  %v3191_v22 = vor.u32 %v3190_v17, %v11154_v21  ;;  %v3652_v12 = vsel %vm10447_vm8, %v3588_v31, %v11155_v9  ;;  %v3874_v26 = vsel %vm1946_vm11, %v3810_v55, %v11156_v57  ;;  %v11157_v53 = vld [vmem:[#allocation376_spill] sm:$0xff]  ;;  %v11158_v8 = vld [vmem:[#allocation182_spill] sm:$0xff]  ;;  %v9225_v49 = vpop.permute.xlu1 %3111  ;;  %5123 = vmatprep.subr.bf16.mxu0 %v5378_v37  ;;  %v11159_v1 = vld [vmem:[#allocation357_spill] sm:$0xff] }
 0x477   : > { %v3842_v50 = vsel %vm1946_vm11, %v3778_v6, %v11157_v53  ;;  %v3622_v48 = vsel %vm1814_vm7, %v3558_v34, %v11159_v1  ;;  %v11160_v17 = vld [vmem:[#allocation361_spill] sm:$0xff]  ;;  %v3985_v31 = vshll.u32 %v9194_v4, 16  ;;  %5166 = vmatprep.subr.bf16.mxu1 %v5378_v37  ;;  %v11161_v61 = vld [vmem:[#allocation326_spill] sm:$0xff]  ;;  %v3995_v56 = vshll.u32 %v9213_v2, 16  ;;  %v9243_v6 = vpop.permute.xlu0 %3079  ;;  %v5379_v62 = vld [vmem:[%s10333_s1 + $0x10] sm:$0xff]  }
 0x478   : > { %3089 = vrot.lane.b32.xlu0 %v11158_v8, %s5543_s4  ;;  %v3716_v47 = vsel %vm10446_vm9, %v3652_v12, %v11160_v17  ;;  %5124 = vmatpush3.bf16.msra.mxu0 %v5378_v37  ;;  %v9236_v32 = vsel %vm1781_vm6, %v9043_v24, %v11161_v61  ;;  %v11162_v7 = vld [vmem:[#allocation362_spill] sm:$0xff]  ;;  %v11164_v24 = vld [vmem:[#allocation369_spill] sm:$0xff]  ;;  %v3989_v9 = vshll.u32 %v3874_v26, 16  ;;  %v3909_v12 = vshll.u32 %v3842_v50, 16  ;;  %v11165_v53 = vld [vmem:[#allocation339_spill] sm:$0xff]  ;;  %s4962_s4 = sshll.u32 %s5522_s16, 8 }
 0x479   : > { %v3686_v55 = vsel %vm10447_vm8, %v3622_v48, %v11162_v7  ;;  %v11163_v33 = vld [vmem:[#allocation366_spill] sm:$0xff]  ;;  %3184 = vrot.lane.b32.xlu1 %v8748_v52, %s5544_s5  ;;  %5173 = vmatpush3.bf16.msra.mxu1 %v5378_v37  ;;  %v3196_v57 = vsel %vm485_vm0, %v3191_v22, %v3195_v28  ;;  %v3562_v8 = vsel %vm1781_vm6, %v9067_v29, %v11165_v53  ;;  %v11166_v1 = vld [vmem:[#allocation373_spill] sm:$0xff]  ;;  %v3987_v28 = vrot.slane %v3985_v31, 1  ;;  %s4593_s8 = sadd.s32 %s4962_s4, %s4961_s7  ;;  %s4596_s16 = sshll.u32 %s10228_s9, 4  ;;  %s10276_s16 = int_to_ptr.vmem [resolvable:$true] %s4596_s16 }
 0x47a   : > { %v3780_v34 = vsel %vm1913_vm10, %v3716_v47, %v11163_v33  ;;  %v3750_v21 = vsel %vm10446_vm9, %v3686_v55, %v11164_v24  ;;  %v11167_v37 = vld [vmem:[#allocation374_spill] sm:$0xff]  ;;  %v11168_v47 = vld [vmem:[#allocation208_spill] sm:$0xff]  ;;  %v9264_v61 = vpop.permute.xlu1 %3174  ;;  %5125 = vmatprep.subr.bf16.mxu0 %v5379_v62  ;;  %v3907_v50 = vrot.slane %v3905_v15, 1  ;;  %v11170_v29 = vld [vmem:[#allocation377_spill] sm:$0xff]  ;;  %5167 = vmatprep.subr.bf16.mxu1 %v5379_v62  ;;  %v3997_v53 = vrot.slane %v3995_v56, 1  ;;  %s4963_s15 = sshll.u32 %s4593_s8, 6 }
 0x47b   : > { %v9258_v48 = vsel %vm1946_vm11, %v3780_v34, %v11166_v1  ;;  %v3814_v17 = vsel %vm1913_vm10, %v3750_v21, %v11167_v37  ;;  %v11169_v26 = vld [vmem:[#allocation358_spill] sm:$0xff]  ;;  %v11171_v55 = vld [vmem:[#allocation340_spill] sm:$0xff]  ;;  %v11172_v34 = vld [vmem:[#allocation363_spill] sm:$0xff]  ;;  %v3983_v21 = vshrl.u32 %v9194_v4, 16  ;;  %v9277_v1 = vpop.permute.xlu0 %3142  ;;  %v3903_v31 = vshrl.u32 %v9198_v60, 16  ;;  %s10274_s24 = scalar_lea.hbm %s10335_s3, %s4963_s15 }
 0x47c   : > { %3152 = vrot.lane.b32.xlu0 %v11168_v47, %s5544_s5  ;;  %v3590_v22 = vsel %vm1814_vm7, %v9098_v25, %v11169_v26  ;;  %v3878_v7 = vsel %vm1946_vm11, %v3814_v17, %v11170_v29  ;;  %5126 = vmatpush3.bf16.msra.mxu0 %v5379_v62  ;;  %v3560_v33 = vsel %vm1781_vm6, %v9071_v14, %v11171_v55  ;;  %v5380_v25 = vld [vmem:[%s10333_s1 + $0x8] sm:$0xff]   ;;  %v3915_v15 = vshll.u32 %v9258_v48, 16  ;;  %v11173_v17 = vld [vmem:[#allocation341_spill] sm:$0xff] }
 0x47d   : > { %v3654_v24 = vsel %vm10447_vm8, %v3590_v22, %v11172_v34  ;;  %3259 = vrot.lane.b32.xlu1 %v3196_v57, %s5545_s6  ;;  %5174 = vmatpush3.bf16.msra.mxu1 %v5379_v62  ;;  %v3991_v14 = vrot.slane %v3989_v9, 1  ;;  %v3911_v37 = vrot.slane %v3909_v12, 1  ;;  %v3566_v4 = vsel %vm1781_vm6, %v9082_v58, %v11173_v17  ;;  %v11174_v56 = vld [vmem:[#allocation370_spill] sm:$0xff]  ;;  %v11176_v9 = vld [vmem:[#allocation375_spill] sm:$0xff]  ;;  %v11194_v52 = vld [vmem:[#allocation393_spill] sm:$0xff] }
 0x47e   : > { %v3718_v47 = vsel %vm10446_vm9, %v3654_v24, %v11174_v56  ;;  %v3993_v57 = vshrl.u32 %v9213_v2, 16  ;;  %v3999_v62 = vshll.u32 %v3878_v7, 16  ;;  %v11175_v26 = vld [vmem:[#allocation278_spill] sm:$0xff]  ;;  %v9293_v22 = vpop.permute.xlu1 %3037  ;;  %5127 = vmatprep.subr.bf16.mxu0 %v5380_v25  ;;  %v3988_v60 = vor.u32 %v3987_v28, %v3983_v21  ;;  %5168 = vmatprep.subr.bf16.mxu1 %v5380_v25 }
 0x47f   : > { %v3908_v29 = vor.u32 %v3907_v50, %v3903_v31  ;;  %v3782_v12 = vsel %vm1913_vm10, %v3718_v47, %v11176_v9  ;;  %v11177_v58 = vld [vmem:[#allocation342_spill] sm:$0xff]  ;;  %v9307_v28 = vpop.permute.xlu0 %3005  ;;  %v5381_v50 = vld [vmem:[%s10333_s1] sm:$0xff]   ;;  %v11180_v47 = vld [vmem:[#allocation379_spill] sm:$0xff] }
 0x480   : > { %3227 = vrot.lane.b32.xlu0 %v11175_v26, %s5545_s6  ;;  %5128 = vmatpush3.bf16.msra.mxu0 %v5380_v25  ;;  %v3564_v55 = vsel %vm1781_vm6, %v9086_v5, %v11177_v58  ;;  %v9300_v2 = vor.u32 %v3997_v53, %v3993_v57  ;;  %v11178_v34 = vld [vmem:[#allocation378_spill] sm:$0xff]  ;;  %v9314_v5 = vrot.slane %v3915_v15, 1  ;;  %v3992_v31 = vsel %vm485_vm0, %v3988_v60, %v3991_v14  ;;  %v11181_v57 = vld [vmem:[#allocation380_spill] sm:$0xff]  ;;  %v11182_v9 = vld [vmem:[#allocation381_spill] sm:$0xff] }
 0x481   : > { %v9305_v24 = vsel %vm1946_vm11, %v3782_v12, %v11178_v34  ;;  %3188 = vrot.lane.b32.xlu1 %v9138_v45, %s5544_s5  ;;  %5175 = vmatpush3.bf16.msra.mxu1 %v5380_v25  ;;  %v11179_v21 = vld [vmem:[#allocation210_spill] sm:$0xff]  ;;  %v9320_v17 = vsel %vm485_vm0, %v3908_v29, %v3911_v37  ;;  %v9322_v56 = vrot.slane %v3999_v62, 1  ;;  %v3592_v25 = vsel %vm1814_vm7, %v9112_v36, %v11180_v47  ;;  %v5421_v12 = vld [vmem:[%s5650_s10 + $0x224] ss:$0 sps:$4 sm:$0x11]   ;;  %v11183_v37 = vld [vmem:[#allocation264_spill] sm:$0xff] }
 0x482   : > { %v3624_v53 = vsel %vm1814_vm7, %v3560_v33, %v11179_v21  ;;  %v3628_v26 = vsel %vm1814_vm7, %v3564_v55, %v11181_v57  ;;  %v3596_v15 = vsel %vm1814_vm7, %v9236_v32, %v11182_v9  ;;  %v9334_v33 = vpop.permute.xlu1 %3109  ;;  %5129 = vmatprep.subr.bf16.mxu0 %v5381_v50  ;;  %v3919_v14 = vshll.u32 %v9305_v24, 16  ;;  %v11184_v60 = vld [vmem:[#allocation382_spill] sm:$0xff]  ;;  %v11185_v29 = vld [vmem:[#allocation383_spill] sm:$0xff]  ;;  %5169 = vmatprep.subr.bf16.mxu1 %v5381_v50  ;;  %v11186_v32 = vld [vmem:[#allocation384_spill] sm:$0xff] }
 0x483   : > { %v3688_v62 = vsel %vm10447_vm8, %v3624_v53, %v11183_v37  ;;  %v3656_v36 = vsel %vm10447_vm8, %v3592_v25, %v11184_v60  ;;  %v3626_v58 = vsel %vm1814_vm7, %v3562_v8, %v11185_v29  ;;  %v3594_v55 = vsel %vm1814_vm7, %v9108_v18, %v11186_v32  ;;  %v11187_v34 = vld [vmem:[#allocation385_spill] sm:$0xff]  ;;  %v11188_v47 = vld [vmem:[#allocation387_spill] sm:$0xff]  ;;  %v9350_v57 = vpop.permute.xlu0 %3077  ;;  %v11189_v53 = vld [vmem:[#allocation386_spill] sm:$0xff] }
 0x484   : > { %3156 = vrot.lane.b32.xlu0 %v5421_v12, %s5544_s5  ;;  %5130 = vmatpush3.bf16.msra.mxu0 %v5381_v50  ;;  %v3692_v21 = vsel %vm10447_vm8, %v3628_v26, %v11187_v34  ;;  %v3752_v24 = vsel %vm10446_vm9, %v3688_v62, %v11188_v47  ;;  %v3197_v8 = vshrl.u32 %v9138_v45, 16  ;;  %v3660_v25 = vsel %vm10447_vm8, %v3596_v15, %v11189_v53  ;;  %v11190_v9 = vld [vmem:[#allocation388_spill] sm:$0xff]  ;;  %v11191_v12 = vld [vmem:[#allocation390_spill] sm:$0xff]  ;;  %v11193_v60 = vld [vmem:[#allocation207_spill] sm:$0xff]  ;;  %s5551_s5 = smov 64  }
 0x485   : > { %3257 = vrot.lane.b32.xlu1 %v2981_v46, %s5545_s6  ;;  %5176 = vmatpush3.bf16.msra.mxu1 %v5381_v50  ;;  %v3720_v18 = vsel %vm10446_vm9, %v3656_v36, %v11190_v9  ;;  %v3690_v26 = vsel %vm10447_vm8, %v3626_v58, %v11191_v12  ;;  %v11192_v37 = vld [vmem:[#allocation230_spill] sm:$0xff]  ;;  %v3630_v29 = vsel %vm1814_vm7, %v3566_v4, %v11193_v60  ;;  %v11195_v45 = vld [vmem:[#allocation268_spill] sm:$0xff]  ;;  %v11196_v32 = vld [vmem:[#allocation399_spill] sm:$0xff] }
 0x486   : > { %v3816_v62 = vsel %vm1913_vm10, %v3752_v24, %v11192_v37  ;;  %v3784_v46 = vsel %vm1913_vm10, %v3720_v18, %v11194_v52  ;;  %v3754_v50 = vsel %vm10446_vm9, %v3690_v26, %v11195_v45  ;;  %v9374_v36 = vpop.permute.xlu1 %3178  ;;  %v11197_v58 = vld [vmem:[#allocation391_spill] sm:$0xff]  ;;  %v11198_v47 = vld [vmem:[#allocation270_spill] sm:$0xff]  ;;  %v11199_v24 = vld [vmem:[#allocation400_spill] sm:$0xff] }
 0x487   : > { %v3880_v15 = vsel %vm1946_vm11, %v3816_v62, %v11196_v32  ;;  %v3658_v34 = vsel %vm10447_vm8, %v3594_v55, %v11197_v58  ;;  %v3756_v4 = vsel %vm10446_vm9, %v3692_v21, %v11198_v47  ;;  %v3848_v53 = vsel %vm1946_vm11, %v3784_v46, %v11199_v24  ;;  %v11200_v9 = vld [vmem:[#allocation403_spill] sm:$0xff]  ;;  %v11201_v12 = vld [vmem:[#allocation389_spill] sm:$0xff]  ;;  %v11202_v37 = vld [vmem:[#allocation396_spill] sm:$0xff]  ;;  %v9393_v21 = vpop.permute.xlu0 %3146 }
 0x488   : > { %3225 = vrot.lane.b32.xlu0 %v11117_v51, %s5545_s6  ;;  %v3818_v18 = vsel %vm1913_vm10, %v3754_v50, %v11200_v9  ;;  %v3598_v26 = vsel %vm1814_vm7, %v9116_v3, %v11201_v12  ;;  %v3722_v51 = vsel %vm10446_vm9, %v3658_v34, %v11202_v37  ;;  %v11203_v62 = vld [vmem:[#allocation397_spill] sm:$0xff]  ;;  %v11204_v55 = vld [vmem:[#allocation411_spill] sm:$0xff]  ;;  %v11205_v46 = vld [vmem:[#allocation394_spill] sm:$0xff]  ;;  %v4005_v50 = vshll.u32 %v3880_v15, 16 }
 0x489   : > { %v3820_v60 = vsel %vm1913_vm10, %v3756_v4, %v11203_v62  ;;  %v3882_v52 = vsel %vm1946_vm11, %v3818_v18, %v11204_v55  ;;  %3261 = vrot.lane.b32.xlu1 %v3197_v8, %s5545_s6  ;;  %v3694_v45 = vsel %vm10447_vm8, %v3630_v29, %v11205_v46  ;;  %v11206_v32 = vld [vmem:[#allocation404_spill] sm:$0xff]  ;;  %v11207_v58 = vld [vmem:[#allocation405_spill] sm:$0xff]  ;;  %v3925_v24 = vshll.u32 %v3848_v53, 16  ;;  %v11212_v62 = vld [vmem:[#allocation395_spill] sm:$0xff] }
 0x48a   : > { %v3786_v3 = vsel %vm1913_vm10, %v3722_v51, %v11206_v32  ;;  %v3884_v34 = vsel %vm1946_vm11, %v3820_v60, %v11207_v58  ;;  %v11208_v47 = vld [vmem:[#allocation392_spill] sm:$0xff]  ;;  %v11209_v9 = vld [vmem:[#allocation401_spill] sm:$0xff]  ;;  %v3248_v29 = vpop.permute.xlu1 %3247  ;;  %v3662_v51 = vsel %vm10447_vm8, %v3598_v26, %v11212_v62  ;;  %v11213_v55 = vld [vmem:[#allocation398_spill] sm:$0xff]  ;;  %v4009_v32 = vshll.u32 %v3882_v52, 16 }
 0x48b   : > { %v3724_v4 = vsel %vm10446_vm9, %v3660_v25, %v11208_v47  ;;  %v3758_v18 = vsel %vm10446_vm9, %v3694_v45, %v11209_v9  ;;  %v11210_v12 = vld [vmem:[#allocation412_spill] sm:$0xff]  ;;  %v11215_v58 = vld [vmem:[#allocation402_spill] sm:$0xff]  ;;  %v4015_v47 = vshll.u32 %v3884_v34, 16  ;;  %v3216_v7 = vpop.permute.xlu0 %3215  ;;  %v3921_v26 = vrot.slane %v3919_v14, 1  ;;  %v11218_v62 = vld [vmem:[#allocation409_spill] sm:$0xff] }
 0x48c   : > { %v3850_v8 = vsel %vm1946_vm11, %v3786_v3, %v11210_v12  ;;  %v11211_v37 = vld [vmem:[#allocation276_spill] sm:$0xff]  ;;  %v3788_v60 = vsel %vm1913_vm10, %v3724_v4, %v11213_v55  ;;  %v3726_v45 = vsel %vm10446_vm9, %v3662_v51, %v11215_v58  ;;  %v11216_v9 = vld [vmem:[#allocation406_spill] sm:$0xff]  ;;  %v11217_v12 = vld [vmem:[#allocation201_spill] sm:$0xff]  ;;  %v4007_v4 = vrot.slane %v4005_v50, 1 }
 0x48d   : > { %3229 = vrot.lane.b32.xlu0 %v11211_v37, %s5545_s6  ;;  %v11214_v46 = vld [vmem:[#allocation408_spill] sm:$0xff]  ;;  %v3852_v3 = vsel %vm1946_vm11, %v3788_v60, %v11216_v9  ;;  %4079 = vrot.lane.b32.xlu1 %v3992_v31, %s5551_s5  ;;  %v3929_v52 = vshll.u32 %v3850_v8, 16  ;;  %v11219_v55 = vshrl.u32 %v9258_v48, 16  ;;  %v4002_v31 = vsel %vm485_vm0, %v9300_v2, %v9322_v56  ;;  %v11221_v48 = vld [vmem:[#allocation314_spill] sm:$0xff]  ;;  %s5552_s6 = smov [#allocation2]  }
 0x48e   : > { %v3822_v25 = vsel %vm1913_vm10, %v3758_v18, %v11214_v46  ;;  %v3790_v18 = vsel %vm1913_vm10, %v3726_v45, %v11218_v62  ;;  %v3927_v46 = vrot.slane %v3925_v24, 1  ;;  %v11220_v58 = vld [vmem:[#allocation204_spill] sm:$0xff]  ;;  %v4003_v14 = vshrl.u32 %v3880_v15, 16  ;;  %v11222_v24 = vld [vmem:[#allocation343_spill] sm:$0xff]  ;;  %s5446_s29 = sshll.u32 %s5552_s6, 4  ;;  %s5447_s29 = int_to_ptr.vmem [resolvable:$false] %s5446_s29 }
 0x48f   : > { %v3886_v37 = vsel %vm1946_vm11, %v3822_v25, %v11217_v12  ;;  %v3918_v51 = vor.u32 %v9314_v5, %v11219_v55  ;;  %v3854_v60 = vsel %vm1946_vm11, %v3790_v18, %v11220_v58  ;;  %v9432_v25 = vpop.permute.xlu1 %3113  ;;  %v3935_v50 = vshll.u32 %v3852_v3, 16  ;;  %v9443_v62 = vpop.permute.xlu0 %3081  ;;  %v11224_v58 = vld [vmem:[#allocation209_spill] sm:$0xff]  ;;  %s5448_s7 = scalar_lea.vmem %s5447_s29, 4096  ;;  %p5449_p2 = scmp.lt.s32.totalorder %s10276_s16, %s5447_s29 }
 0x490   : > { %v4011_v8 = vrot.slane %v4009_v32, 1  ;;  %v4019_v45 = vshll.u32 %v3886_v37, 16  ;;  %v3476_v5 = vsel %vm1748_vm5, %v8986_v38, %v11221_v48  ;;  %v3568_v9 = vsel %vm1781_vm6, %v9090_v43, %v11222_v24  ;;  %v11223_v32 = vld [vmem:[#allocation328_spill] sm:$0xff] }
 0x491   : > { %4063 = vrot.lane.b32.xlu0 %v9320_v17, %s5551_s5  ;;  %v3923_v12 = vshrl.u32 %v3848_v53, 16  ;;  %v4017_v17 = vrot.slane %v4015_v47, 1  ;;  %4081 = vrot.lane.b32.xlu1 %v4002_v31, %s5551_s5  ;;  %v4008_v18 = vor.u32 %v4007_v4, %v4003_v14  ;;  %v3931_v2 = vrot.slane %v3929_v52, 1 }
 0x492   : > { %v3939_v56 = vshll.u32 %v3854_v60, 16  ;;  %v3922_v15 = vsel %vm485_vm0, %v3918_v51, %v3921_v26  ;;  %v3536_v37 = vsel %vm1781_vm6, %v9055_v20, %v11223_v32  ;;  %v4013_v55 = vshrl.u32 %v3884_v34, 16  ;;  %v11225_v60 = vld [vmem:[#allocation211_spill] sm:$0xff] }
 0x493   : > { %v3928_v38 = vor.u32 %v3927_v46, %v3923_v12  ;;  %v3632_v43 = vsel %vm1814_vm7, %v3568_v9, %v11224_v58  ;;  %v3177_v53 = vpop.permute.xlu1 %3176  ;;  %v3937_v47 = vrot.slane %v3935_v50, 1  ;;  %v4021_v48 = vrot.slane %v4019_v45, 1  ;;  %v3145_v46 = vpop.permute.xlu0 %3144  ;;  %v11227_v45 = vld [vmem:[#allocation330_spill] sm:$0xff] }
 0x494   : > { %v3696_v4 = vsel %vm10447_vm8, %v3632_v43, %v8955_v13  ;;  %v4012_v52 = vsel %vm485_vm0, %v4008_v18, %v4011_v8  ;;  %v4018_v26 = vor.u32 %v4017_v17, %v4013_v55  ;;  %v3933_v51 = vshrl.u32 %v3852_v3, 16  ;;  %v11226_v8 = vld [vmem:[#allocation313_spill] sm:$0xff]  ;;  %v11228_v18 = vld [vmem:[#allocation320_spill] sm:$0xff] }
 0x495   : > { %4065 = vrot.lane.b32.xlu0 %v3922_v15, %s5551_s5  ;;  %v3600_v20 = vsel %vm1814_vm7, %v3536_v37, %v11225_v60  ;;  %v3760_v34 = vsel %vm10446_vm9, %v3696_v4, %v9102_v44  ;;  %4083 = vrot.lane.b32.xlu1 %v4012_v52, %s5551_s5  ;;  %v3941_v31 = vrot.slane %v3939_v56, 1  ;;  %v3932_v50 = vsel %vm485_vm0, %v3928_v38, %v3931_v2  ;;  %v11229_v2 = vld [vmem:[#allocation321_spill] sm:$0xff]  ;;  %v11231_v38 = vld [vmem:[#allocation327_spill] sm:$0xff] }
 0x496   : > { %v3664_v14 = vsel %vm10447_vm8, %v3600_v20, %v8971_v54  ;;  %v3824_v13 = vsel %vm1913_vm10, %v3760_v34, %v9264_v61  ;;  %v3478_v3 = vsel %vm1748_vm5, %v8982_v41, %v11226_v8  ;;  %v3540_v24 = vsel %vm1781_vm6, %v3476_v5, %v11227_v45  ;;  %v11233_v55 = vld [vmem:[#allocation345_spill] sm:$0xff] }
 0x497   : > { %v3728_v44 = vsel %vm10446_vm9, %v3664_v14, %v9122_v39  ;;  %v3888_v9 = vsel %vm1946_vm11, %v3824_v13, %v3248_v29  ;;  %v3252_v54 = vpop.permute.xlu1 %3251  ;;  %v3938_v12 = vor.u32 %v3937_v47, %v3933_v51  ;;  %v3604_v61 = vsel %vm1814_vm7, %v3540_v24, %v8934_v30  ;;  %v3220_v15 = vpop.permute.xlu0 %3219  ;;  %v11230_v30 = vld [vmem:[#allocation322_spill] sm:$0xff]  ;;  %v11235_v52 = vld [vmem:[#allocation329_spill] sm:$0xff] }
 0x498   : > { %v3792_v17 = vsel %vm1913_vm10, %v3728_v44, %v9277_v1  ;;  %v4022_v41 = vsel %vm485_vm0, %v4018_v26, %v4021_v48  ;;  %v3506_v5 = vsel %vm1748_vm5, %v9010_v0, %v11228_v18  ;;  %v3510_v39 = vsel %vm1748_vm5, %v9016_v63, %v11229_v2  ;;  %v11236_v18 = vld [vmem:[#allocation344_spill] sm:$0xff] }
 0x499   : > { %4067 = vrot.lane.b32.xlu0 %v3932_v50, %s5551_s5  ;;  %v3668_v29 = vsel %vm10447_vm8, %v3604_v61, %v9073_v10  ;;  %v3856_v56 = vsel %vm1946_vm11, %v3792_v17, %v3216_v7  ;;  %4085 = vrot.lane.b32.xlu1 %v4022_v41, %s5551_s5  ;;  %v3508_v1 = vsel %vm1748_vm5, %v9020_v23, %v11230_v30  ;;  %v4025_v0 = vshll.u32 %v3888_v9, 16  ;;  %v11232_v10 = vld [vmem:[#allocation221_spill] sm:$0xff] }
 0x49a   : > { %v3732_v32 = vsel %vm10446_vm9, %v3668_v29, %v9243_v6  ;;  %v3942_v37 = vsel %vm485_vm0, %v3938_v12, %v3941_v31  ;;  %v3538_v63 = vsel %vm1781_vm6, %v9051_v35, %v11231_v38  ;;  %v3570_v7 = vsel %vm1781_vm6, %v3506_v5, %v11232_v10  ;;  %v11234_v6 = vld [vmem:[#allocation212_spill] sm:$0xff] }
 0x49b   : > { %v3572_v58 = vsel %vm1781_vm6, %v3508_v1, %v11233_v55  ;;  %v3796_v43 = vsel %vm1913_vm10, %v3732_v32, %v9393_v21  ;;  %v3181_v23 = vpop.permute.xlu1 %3180  ;;  %v3634_v48 = vsel %vm1814_vm7, %v3570_v7, %v8998_v11  ;;  %v3945_v4 = vshll.u32 %v3856_v56, 16  ;;  %v3149_v20 = vpop.permute.xlu0 %3148  ;;  %v5422_v1 = vld [vmem:[%s5650_s10 + $0x198] sm:$0xff]   ;;  %v11238_v55 = vld [vmem:[#allocation283_spill] sm:$0xff] }
 0x49c   : > { %v3636_v47 = vsel %vm1814_vm7, %v3572_v58, %v11234_v6  ;;  %v3860_v35 = vsel %vm1946_vm11, %v3796_v43, %v3220_v15  ;;  %v3542_v26 = vsel %vm1781_vm6, %v3478_v3, %v11235_v52  ;;  %v3602_v51 = vsel %vm1814_vm7, %v3538_v63, %v9022_v40  ;;  %v11237_v32 = vld [vmem:[#allocation240_spill] sm:$0xff]  ;;  %v11239_v6 = vld [vmem:[#allocation194_spill] sm:$0xff] }
 0x49d   : > { %4069 = vrot.lane.b32.xlu0 %v3942_v37, %s5551_s5  ;;  %v3700_v21 = vsel %vm10447_vm8, %v3636_v47, %v9047_v27  ;;  %v3698_v60 = vsel %vm10447_vm8, %v3634_v48, %v9184_v59  ;;  %v3606_v34 = vsel %vm1814_vm7, %v3542_v26, %v9162_v19  ;;  %v3666_v11 = vsel %vm10447_vm8, %v3602_v51, %v9202_v42 }
 0x49e   : > { %v3762_v31 = vsel %vm10446_vm9, %v3698_v60, %v9334_v33  ;;  %v4027_v14 = vrot.slane %v4025_v0, 1  ;;  %v3764_v40 = vsel %vm10446_vm9, %v3700_v21, %v9225_v49  ;;  %v3730_v27 = vsel %vm10446_vm9, %v3666_v11, %v9350_v57 }
 0x49f   : > { %v3826_v13 = vsel %vm1913_vm10, %v3762_v31, %v3177_v53  ;;  %v3955_v59 = vshll.u32 %v3860_v35, 16  ;;  %v3250_v50 = vpop.permute.xlu1 %3249  ;;  %v3828_v19 = vsel %vm1913_vm10, %v3764_v40, %v9374_v36  ;;  %v4023_v8 = vshrl.u32 %v3888_v9, 16  ;;  %v3218_v57 = vpop.permute.xlu0 %3217  ;;  %v5423_v31 = vld [vmem:[%s5650_s10 + $0x138] sm:$0xff]  }
 0x4a0   : > { %v3947_v3 = vrot.slane %v3945_v4, 1  ;;  %v3890_v42 = vsel %vm1946_vm11, %v3826_v13, %v3250_v50  ;;  %v3670_v33 = vsel %vm10447_vm8, %v3606_v34, %v9307_v28  ;;  %v3794_v45 = vsel %vm1913_vm10, %v3730_v27, %v3145_v46  ;;  %v11242_v27 = vld [vmem:[#allocation257_spill] sm:$0xff] }
 0x4a1   : > { %v3892_v49 = vsel %vm1946_vm11, %v3828_v19, %v3252_v54  ;;  %v4029_v24 = vshll.u32 %v3890_v42, 16  ;;  %v4028_v44 = vor.u32 %v4027_v14, %v4023_v8  ;;  %v3943_v53 = vshrl.u32 %v3856_v56, 16  ;;  %v11241_v14 = vld [vmem:[#allocation220_spill] sm:$0xff]  ;;  %v11243_v19 = vld [vmem:[#allocation299_spill] sm:$0xff]  ;;  %v11244_v42 = vld [vmem:[#allocation242_spill] sm:$0xff] }
 0x4a2   : > { %v3734_v12 = vsel %vm10446_vm9, %v3670_v33, %v9443_v62  ;;  %v3858_v36 = vsel %vm1946_vm11, %v3794_v45, %v3218_v57  ;;  %v3957_v9 = vrot.slane %v3955_v59, 1  ;;  %v3574_v46 = vsel %vm1781_vm6, %v3510_v39, %v11236_v18  ;;  %v11245_v45 = vld [vmem:[#allocation316_spill] sm:$0xff]  ;;  %v11246_v57 = vld [vmem:[#allocation285_spill] sm:$0xff] }
 0x4a3   : > { %v3798_v61 = vsel %vm1913_vm10, %v3734_v12, %v3149_v20  ;;  %v4031_v17 = vrot.slane %v4029_v24, 1  ;;  %v3949_v41 = vshll.u32 %v3858_v36, 16  ;;  %v3222_v28 = vpop.permute.xlu1 %3221  ;;  %v3948_v54 = vor.u32 %v3947_v3, %v3943_v53  ;;  %v2900_v62 = vpop.permute.xlu0 %2899  ;;  %v5424_v3 = vld [vmem:[%s5650_s10 + $0x1a4] sm:$0xff]   ;;  %v11247_v53 = vld [vmem:[#allocation332_spill] sm:$0xff] }
 0x4a4   : > { %v4035_v5 = vshll.u32 %v3892_v49, 16  ;;  %v3862_v2 = vsel %vm1946_vm11, %v3798_v61, %v3222_v28  ;;  %v3953_v29 = vshrl.u32 %v3860_v35, 16  ;;  %v3320_v0 = vsel %vm1649_vm2, %v5422_v1, %v11237_v32  ;;  %v11240_v35 = vld [vmem:[#allocation323_spill] sm:$0xff]  ;;  %v11248_v36 = vld [vmem:[#allocation197_spill] sm:$0xff] }
 0x4a5   : > { %v3951_v56 = vrot.slane %v3949_v41, 1  ;;  %v3959_v15 = vshll.u32 %v3862_v2, 16  ;;  %v4032_v30 = vsel %vm485_vm0, %v4028_v44, %v4031_v17  ;;  %v3638_v37 = vsel %vm1814_vm7, %v3574_v46, %v9148_v16  ;;  %v11249_v41 = vld [vmem:[#allocation325_spill] sm:$0xff] }
 0x4a6   : > { %4087 = vrot.lane.b32.xlu1 %v4032_v30, %s5551_s5  ;;  %v3702_v39 = vsel %vm10447_vm8, %v3638_v37, %v9293_v22  ;;  %v3958_v38 = vor.u32 %v3957_v9, %v3953_v29  ;;  %v3384_v58 = vsel %vm1682_vm3, %v3320_v0, %v11238_v55  ;;  %v4037_v47 = vrot.slane %v4035_v5, 1  ;;  %v5425_v55 = vld [vmem:[%s5650_s10 + $0x18] sm:$0xff]  }
 0x4a7   : > { %v3961_v63 = vrot.slane %v3959_v15, 1  ;;  %v3952_v10 = vsel %vm485_vm0, %v3948_v54, %v3951_v56  ;;  %v2904_v7 = vpop.permute.xlu1 %2903  ;;  %v3766_v43 = vsel %vm10446_vm9, %v3702_v39, %v9432_v25  ;;  %v3448_v16 = vsel %vm1715_vm4, %v3384_v58, %v11239_v6  ;;  %v3254_v48 = vpop.permute.xlu0 %3253  ;;  %v11250_v58 = vld [vmem:[#allocation5_spill] sm:$0xff] }
 0x4a8   : > { %4071 = vrot.lane.b32.xlu0 %v3952_v10, %s5551_s5  ;;  %v3830_v22 = vsel %vm1913_vm10, %v3766_v43, %v3181_v23  ;;  %v3512_v52 = vsel %vm1748_vm5, %v3448_v16, %v11240_v35  ;;  %v4033_v51 = vshrl.u32 %v3892_v49, 16  ;;  %v3288_v40 = vsel %vm1649_vm2, %v5423_v31, %v11241_v14  ;;  %v5426_v6 = vld [vmem:[%s5650_s10] sm:$0xff]   ;;  %v11251_v16 = vld [vmem:[#allocation6_spill] sm:$0xff] }
 0x4a9   : > { %v3962_v4 = vsel %vm485_vm0, %v3958_v38, %v3961_v63  ;;  %v3894_v26 = vsel %vm1946_vm11, %v3830_v22, %v3254_v48  ;;  %v3576_v25 = vsel %vm1781_vm6, %v3512_v52, %v2900_v62  ;;  %v3352_v13 = vsel %vm1682_vm3, %v3288_v40, %v11242_v27  ;;  %v5427_v48 = vld [vmem:[%s5650_s10 + $0x24] sm:$0xff]   ;;  %v5428_v52 = vld [vmem:[%s5650_s10 + $0xc] sm:$0xff]   ;;  %v5432_v27 = vld [vmem:[%s5650_s10 + $0x78] sm:$0xff]  }
 0x4aa   : > { %v4039_v21 = vshll.u32 %v3894_v26, 16  ;;  %v4038_v23 = vor.u32 %v4037_v47, %v4033_v51  ;;  %v3416_v8 = vsel %vm1715_vm4, %v3352_v13, %v11243_v19  ;;  %v3324_v33 = vsel %vm1649_vm2, %v5424_v3, %v11244_v42  ;;  %v11253_v26 = vld [vmem:[#allocation8_spill] sm:$0xff]  ;;  %v5431_v31 = vld [vmem:[%s5650_s10 + $0x84] sm:$0xff]   ;;  %v11257_v13 = vld [vmem:[#allocation15_spill] sm:$0xff] }
 0x4ab   : > { %v2967_v60 = vpop.permute.xlu1 %2966  ;;  %v2935_v11 = vpop.permute.xlu0 %2934  ;;  %v3480_v49 = vsel %vm1748_vm5, %v3416_v8, %v11245_v45  ;;  %v3388_v44 = vsel %vm1682_vm3, %v3324_v33, %v11246_v57  ;;  %v1655_v43 = vsel %vm1649_vm2, %v5425_v55, %v11250_v58  ;;  %v1651_v47 = vsel %vm1649_vm2, %v5426_v6, %v11251_v16  ;;  %v11256_v14 = vld [vmem:[#allocation14_spill] sm:$0xff]  ;;  %v11258_v19 = vld [vmem:[#allocation20_spill] sm:$0xff]  ;;  %v11259_v3 = vld [vmem:[#allocation21_spill] sm:$0xff] }
 0x4ac   : > { %4073 = vrot.lane.b32.xlu0 %v3962_v4, %s5551_s5  ;;  %v9569_v20 = vsel %vm1814_vm7, %v3576_v25, %v2967_v60  ;;  %v4041_v34 = vrot.slane %v4039_v21, 1  ;;  %v3544_v12 = vsel %vm1781_vm6, %v3480_v49, %v11247_v53  ;;  %v3452_v9 = vsel %vm1715_vm4, %v3388_v44, %v11248_v36  ;;  %v11252_v4 = vld [vmem:[#allocation7_spill] sm:$0xff]  ;;  %v11254_v21 = vld [vmem:[#allocation12_spill] sm:$0xff]  ;;  %v11260_v45 = vld [vmem:[#allocation22_spill] sm:$0xff] }
 0x4ad   : > { %v3608_v61 = vsel %vm1814_vm7, %v3544_v12, %v2935_v11  ;;  %v3516_v28 = vsel %vm1748_vm5, %v3452_v9, %v11249_v41  ;;  %v1657_v35 = vsel %vm1649_vm2, %v5427_v48, %v11252_v4  ;;  %v1653_v51 = vsel %vm1649_vm2, %v5428_v52, %v11253_v26  ;;  %v5429_v25 = vld [vmem:[%s5650_s10 + $0x6c] sm:$0xff]   ;;  %v11262_v53 = vld [vmem:[#allocation28_spill] sm:$0xff]  ;;  %v11263_v36 = vld [vmem:[#allocation29_spill] sm:$0xff] }
 0x4ae   : > { %v4042_v59 = vsel %vm485_vm0, %v4038_v23, %v4041_v34  ;;  %v3580_v46 = vsel %vm1781_vm6, %v3516_v28, %v2904_v7  ;;  %v1669_v60 = vsel %vm1649_vm2, %v5429_v25, %v11254_v21  ;;  %v5430_v23 = vld [vmem:[%s5650_s10 + $0x60] sm:$0xff]   ;;  %v1673_v40 = vsel %vm1649_vm2, %v5431_v31, %v11256_v14  ;;  %v11261_v57 = vld [vmem:[#allocation23_spill] sm:$0xff]  ;;  %v11270_v4 = vld [vmem:[#allocation44_spill] sm:$0xff] }
 0x4af   : > { %v9577_v50 = vpop.permute.xlu1 %2938  ;;  %4089 = vrot.lane.b32.xlu1 %v4042_v59, %s5551_s5  ;;  %v9587_v24 = vpop.permute.xlu0 %2901  ;;  %v11255_v34 = vld [vmem:[#allocation13_spill] sm:$0xff]  ;;  %v1671_v59 = vsel %vm1649_vm2, %v5432_v27, %v11257_v13  ;;  %v1686_v8 = vsel %vm1682_vm3, %v1653_v51, %v11258_v19  ;;  %v1684_v42 = vsel %vm1682_vm3, %v1651_v47, %v11259_v3  ;;  %v1690_v49 = vsel %vm1682_vm3, %v1657_v35, %v11260_v45  ;;  %v11265_v41 = vld [vmem:[#allocation31_spill] sm:$0xff]  ;;  %v11272_v51 = vld [vmem:[#allocation46_spill] sm:$0xff] }
 0x4b0   : > { %v1667_v11 = vsel %vm1649_vm2, %v5430_v23, %v11255_v34  ;;  %v1688_v44 = vsel %vm1682_vm3, %v1655_v43, %v11261_v57  ;;  %v1702_v12 = vsel %vm1682_vm3, %v1669_v60, %v11262_v53  ;;  %v1704_v28 = vsel %vm1682_vm3, %v1671_v59, %v11265_v41  ;;  %v11267_v55 = vld [vmem:[#allocation37_spill] sm:$0xff]  ;;  %v11268_v43 = vld [vmem:[#allocation38_spill] sm:$0xff]  ;;  %v11269_v47 = vld [vmem:[#allocation39_spill] sm:$0xff] }
 0x4b1   : > { %v1700_v9 = vsel %vm1682_vm3, %v1667_v11, %v11263_v36  ;;  %v1717_v58 = vsel %vm1715_vm4, %v1684_v42, %v11267_v55  ;;  %v1723_v16 = vsel %vm1715_vm4, %v1690_v49, %v11268_v43  ;;  %v1721_v48 = vsel %vm1715_vm4, %v1688_v44, %v11269_v47  ;;  %v11271_v52 = vld [vmem:[#allocation45_spill] sm:$0xff]  ;;  %v11273_v21 = vld [vmem:[#allocation47_spill] sm:$0xff]  ;;  %v11274_v23 = vld [vmem:[#allocation52_spill] sm:$0xff] }
 0x4b2   : > { %v1735_v35 = vsel %vm1715_vm4, %v1702_v12, %v11270_v4  ;;  %v1733_v26 = vsel %vm1715_vm4, %v1700_v9, %v11271_v52  ;;  %v1737_v60 = vsel %vm1715_vm4, %v1704_v28, %v11273_v21  ;;  %v11275_v11 = vld [vmem:[#allocation53_spill] sm:$0xff]  ;;  %v11277_v13 = vld [vmem:[#allocation55_spill] sm:$0xff]  ;;  %v11278_v19 = vld [vmem:[#allocation60_spill] sm:$0xff] }
 0x4b3   : > { %v3008_v17 = vpop.permute.xlu1 %3007  ;;  %v2971_v54 = vpop.permute.xlu0 %2970  ;;  %v1750_v31 = vsel %vm1748_vm5, %v1717_v58, %v11275_v11  ;;  %v1754_v59 = vsel %vm1748_vm5, %v1721_v48, %v11277_v13  ;;  %v11279_v3 = vld [vmem:[#allocation61_spill] sm:$0xff]  ;;  %v11280_v45 = vld [vmem:[#allocation62_spill] sm:$0xff]  ;;  %v11281_v57 = vld [vmem:[#allocation63_spill] sm:$0xff] }
 0x4b4   : > { %v9599_v18 = vsel %vm10447_vm8, %v3608_v61, %v3008_v17  ;;  %v9603_v5 = vsel %vm1814_vm7, %v3580_v46, %v2971_v54  ;;  %v11264_v61 = vld [vmem:[#allocation30_spill] sm:$0xff]  ;;  %v11266_v46 = vld [vmem:[#allocation36_spill] sm:$0xff]  ;;  %v1766_v42 = vsel %vm1748_vm5, %v1733_v26, %v11279_v3  ;;  %v1770_v44 = vsel %vm1748_vm5, %v1737_v60, %v11281_v57  ;;  %v11283_v36 = vld [vmem:[#allocation69_spill] sm:$0xff] }
 0x4b5   : > { %v1706_v17 = vsel %vm1682_vm3, %v1673_v40, %v11264_v61  ;;  %v1719_v54 = vsel %vm1715_vm4, %v1686_v8, %v11266_v46  ;;  %v11276_v40 = vld [vmem:[#allocation54_spill] sm:$0xff]  ;;  %v1768_v8 = vsel %vm1748_vm5, %v1735_v35, %v11278_v19  ;;  %v11282_v53 = vld [vmem:[#allocation68_spill] sm:$0xff]  ;;  %v1783_v9 = vsel %vm1781_vm6, %v1750_v31, %v11283_v36  ;;  %v11285_v28 = vld [vmem:[#allocation71_spill] sm:$0xff] }
 0x4b6   : > { %v1739_v25 = vsel %vm1715_vm4, %v1706_v17, %v11272_v51  ;;  %v1752_v34 = vsel %vm1748_vm5, %v1719_v54, %v11274_v23  ;;  %v1756_v27 = vsel %vm1748_vm5, %v1723_v16, %v11276_v40  ;;  %v11284_v17 = vld [vmem:[#allocation70_spill] sm:$0xff]  ;;  %v1787_v46 = vsel %vm1781_vm6, %v1754_v59, %v11285_v28  ;;  %v11286_v54 = vld [vmem:[#allocation76_spill] sm:$0xff]  ;;  %v11287_v58 = vld [vmem:[#allocation77_spill] sm:$0xff] }
 0x4b7   : > { %v9605_v2 = vpop.permute.xlu1 %2905  ;;  %v9607_v29 = vpop.permute.xlu0 %3039  ;;  %v1772_v49 = vsel %vm1748_vm5, %v1739_v25, %v11280_v45  ;;  %v1785_v12 = vsel %vm1781_vm6, %v1752_v34, %v11282_v53  ;;  %v1789_v41 = vsel %vm1781_vm6, %v1756_v27, %v11284_v17  ;;  %v1801_v55 = vsel %vm1781_vm6, %v1768_v8, %v11286_v54  ;;  %v11288_v16 = vld [vmem:[#allocation78_spill] sm:$0xff]  ;;  %v11289_v48 = vld [vmem:[#allocation79_spill] sm:$0xff]  ;;  %v11290_v35 = vld [vmem:[#allocation84_spill] sm:$0xff] }
 0x4b8   : > { %v1799_v43 = vsel %vm1781_vm6, %v1766_v42, %v11287_v58  ;;  %v1805_v47 = vsel %vm1781_vm6, %v1772_v49, %v11288_v16  ;;  %v1803_v4 = vsel %vm1781_vm6, %v1770_v44, %v11289_v48  ;;  %v1818_v52 = vsel %vm1814_vm7, %v1785_v12, %v11290_v35  ;;  %v11291_v26 = vld [vmem:[#allocation85_spill] sm:$0xff]  ;;  %v11292_v21 = vld [vmem:[#allocation86_spill] sm:$0xff]  ;;  %v11293_v23 = vld [vmem:[#allocation87_spill] sm:$0xff] }
 0x4b9   : > { %v1816_v51 = vsel %vm1814_vm7, %v1783_v9, %v11291_v26  ;;  %v1822_v60 = vsel %vm1814_vm7, %v1789_v41, %v11292_v21  ;;  %v1820_v34 = vsel %vm1814_vm7, %v1787_v46, %v11293_v23  ;;  %v11294_v11 = vld [vmem:[#allocation95_spill] sm:$0xff]  ;;  %v11295_v40 = vld [vmem:[#allocation97_spill] sm:$0xff]  ;;  %v11296_v13 = vld [vmem:[#allocation100_spill] sm:$0xff] }
 0x4ba   : > { %v1834_v31 = vsel %vm1814_vm7, %v1801_v55, %v11294_v11  ;;  %v1832_v27 = vsel %vm1814_vm7, %v1799_v43, %v11295_v40  ;;  %v1838_v59 = vsel %vm1814_vm7, %v1805_v47, %v11296_v13  ;;  %v11297_v19 = vld [vmem:[#allocation102_spill] sm:$0xff]  ;;  %v11298_v3 = vld [vmem:[#allocation115_spill] sm:$0xff]  ;;  %v11299_v45 = vld [vmem:[#allocation117_spill] sm:$0xff] }
 0x4bb   : > { %v9609_v56 = vpop.permute.xlu1 %2968  ;;  %v9611_v15 = vpop.permute.xlu0 %2936  ;;  %v1836_v8 = vsel %vm1814_vm7, %v1803_v4, %v11297_v19  ;;  %v1851_v42 = vsel %vm10447_vm8, %v1818_v52, %v11298_v3  ;;  %v1849_v49 = vsel %vm10447_vm8, %v1816_v51, %v11299_v45  ;;  %v11300_v44 = vld [vmem:[#allocation118_spill] sm:$0xff]  ;;  %v11301_v12 = vld [vmem:[#allocation119_spill] sm:$0xff]  ;;  %v11304_v46 = vld [vmem:[#allocation124_spill] sm:$0xff] }
 0x4bc   : > { %v1855_v53 = vsel %vm10447_vm8, %v1822_v60, %v11300_v44  ;;  %v1853_v36 = vsel %vm10447_vm8, %v1820_v34, %v11301_v12  ;;  %v11302_v9 = vld [vmem:[#allocation122_spill] sm:$0xff]  ;;  %v11303_v41 = vld [vmem:[#allocation123_spill] sm:$0xff]  ;;  %v1871_v54 = vsel %vm10447_vm8, %v1838_v59, %v11304_v46  ;;  %v11305_v55 = vld [vmem:[#allocation125_spill] sm:$0xff] }
 0x4bd   : > { %v1867_v17 = vsel %vm10447_vm8, %v1834_v31, %v11302_v9  ;;  %v1865_v28 = vsel %vm10447_vm8, %v1832_v27, %v11303_v41  ;;  %v1869_v58 = vsel %vm10447_vm8, %v1836_v8, %v11305_v55  ;;  %v11306_v43 = vld [vmem:[#allocation128_spill] sm:$0xff]  ;;  %v11307_v47 = vld [vmem:[#allocation129_spill] sm:$0xff]  ;;  %v11308_v35 = vld [vmem:[#allocation130_spill] sm:$0xff] }
 0x4be   : > { %v1884_v16 = vsel %vm10446_vm9, %v1851_v42, %v11306_v43  ;;  %v1882_v48 = vsel %vm10446_vm9, %v1849_v49, %v11307_v47  ;;  %v9775_v52 = vsel %vm10446_vm9, %v1855_v53, %v11308_v35  ;;  %v11309_v26 = vld [vmem:[#allocation131_spill] sm:$0xff]  ;;  %v11310_v21 = vld [vmem:[#allocation134_spill] sm:$0xff]  ;;  %v11312_v11 = vld [vmem:[#allocation136_spill] sm:$0xff] }
 0x4bf   : > { %v9613_v62 = vpop.permute.xlu1 %3043  ;;  %v9615_v30 = vpop.permute.xlu0 %3011  ;;  %v1886_v51 = vsel %vm10446_vm9, %v1853_v36, %v11309_v26  ;;  %v1900_v60 = vsel %vm10446_vm9, %v1867_v17, %v11310_v21  ;;  %v11311_v23 = vld [vmem:[#allocation135_spill] sm:$0xff]  ;;  %v9785_v31 = vsel %vm10446_vm9, %v1871_v54, %v11312_v11  ;;  %v11313_v40 = vld [vmem:[#allocation137_spill] sm:$0xff]  ;;  %v11314_v13 = vld [vmem:[#allocation142_spill] sm:$0xff] }
 0x4c0   : > { %v1898_v34 = vsel %vm10446_vm9, %v1865_v28, %v11311_v23  ;;  %v1902_v27 = vsel %vm10446_vm9, %v1869_v58, %v11313_v40  ;;  %v1915_v59 = vsel %vm1913_vm10, %v1882_v48, %v11314_v13  ;;  %v11315_v19 = vld [vmem:[#allocation148_spill] sm:$0xff]  ;;  %v11316_v42 = vld [vmem:[#allocation141_spill] sm:$0xff]  ;;  %v11317_v49 = vld [vmem:[#allocation147_spill] sm:$0xff] }
 0x4c1   : > { %v1931_v8 = vsel %vm1913_vm10, %v1898_v34, %v11315_v19  ;;  %v1917_v45 = vsel %vm1913_vm10, %v1884_v16, %v11316_v42  ;;  %v1933_v44 = vsel %vm1913_vm10, %v1900_v60, %v11317_v49  ;;  %v11318_v53 = vld [vmem:[#allocation155_spill] sm:$0xff]  ;;  %v11319_v36 = vld [vmem:[#allocation161_spill] sm:$0xff]  ;;  %v11320_v17 = vld [vmem:[#allocation144_spill] sm:$0xff] }
 0x4c2   : > { %v1948_v12 = vsel %vm1946_vm11, %v1915_v59, %v11318_v53  ;;  %v1964_v9 = vsel %vm1946_vm11, %v1931_v8, %v11319_v36  ;;  %v9803_v41 = vsel %vm1913_vm10, %v1886_v51, %v11320_v17  ;;  %v11321_v28 = vld [vmem:[#allocation160_spill] sm:$0xff]  ;;  %v11322_v54 = vld [vmem:[#allocation167_spill] sm:$0xff]  ;;  %v11323_v58 = vld [vmem:[#allocation173_spill] sm:$0xff] }
 0x4c3   : > { %v9617_v1 = vpop.permute.xlu1 %3115  ;;  %v9619_v32 = vpop.permute.xlu0 %3083  ;;  %v1966_v46 = vsel %vm1946_vm11, %v1933_v44, %v11321_v28  ;;  %v1981_v55 = vsel %vm1979_vm12, %v1948_v12, %v11322_v54  ;;  %v1997_v43 = vsel %vm1979_vm12, %v1964_v9, %v11323_v58  ;;  %v11324_v47 = vld [vmem:[#allocation150_spill] sm:$0xff]  ;;  %v11325_v35 = vld [vmem:[#allocation172_spill] sm:$0xff]  ;;  %v11326_v51 = vld [vmem:[#allocation179_spill] sm:$0xff] }
 0x4c4   : > { %v9815_v48 = vsel %vm1913_vm10, %v1902_v27, %v11324_v47  ;;  %v1999_v26 = vsel %vm1979_vm12, %v1966_v46, %v11325_v35  ;;  %v2014_v21 = vsel %vm2012_vm13, %v1981_v55, %v11326_v51  ;;  %v11327_v60 = vld [vmem:[#allocation43_spill] sm:$0xff]  ;;  %v11328_v34 = vld [vmem:[#allocation154_spill] sm:$0xff]  ;;  %v5433_v53 = vld [vmem:[%s5650_s10 + $0x140] ss:$0 sps:$4 sm:$0x11]  }
 0x4c5   : > { %v2030_v23 = vsel %vm2012_vm13, %v1997_v43, %v11327_v60  ;;  %v9825_v11 = vsel %vm1946_vm11, %v1917_v45, %v11328_v34  ;;  %v11329_v40 = vld [vmem:[#allocation58_spill] sm:$0xff]  ;;  %v11331_v19 = vld [vmem:[#allocation51_spill] sm:$0xff]  ;;  %v5436_v55 = vld [vmem:[%s5650_s10 + $0x1a0] ss:$0 sps:$4 sm:$0x11]  }
 0x4c6   : > { %v9829_v13 = vsel %vm2012_vm13, %v1999_v26, %v11329_v40  ;;  %v11330_v27 = vld [vmem:[#allocation18_spill] sm:$0xff]  ;;  %v2063_v8 = vsel %vm2045_vm14, %v2030_v23, %v11331_v19  ;;  %v11333_v45 = vld [vmem:[#allocation219_spill] sm:$0xff]  ;;  %v11337_v35 = vld [vmem:[#allocation241_spill] sm:$0xff] }
 0x4c7   : > { %v9621_v0 = vpop.permute.xlu1 %2972  ;;  %v9623_v37 = vpop.permute.xlu0 %2940  ;;  %v9833_v59 = vsel %vm2045_vm14, %v2014_v21, %v11330_v27  ;;  %v11332_v49 = vld [vmem:[#allocation94_spill] sm:$0xff]  ;;  %v3290_v12 = vsel %vm1649_vm2, %v5433_v53, %v11333_v45  ;;  %v11335_v46 = vld [vmem:[#allocation223_spill] sm:$0xff]  ;;  %v11338_v51 = vld [vmem:[#allocation256_spill] sm:$0xff]  ;;  %v3704_v45 = vsel %vm10447_vm8, %v9569_v20, %v9607_v29 }
 0x4c8   : > { %v9841_v44 = vsel %vm2078_vm15, %v2063_v8, %v11332_v49  ;;  %v5434_v36 = vld [vmem:[%s5650_s10 + $0x14c] ss:$0 sps:$4 sm:$0x11]   ;;  %v5435_v28 = vld [vmem:[%s5650_s10 + $0x144] sm:$0xff]   ;;  %v11336_v58 = vld [vmem:[#allocation239_spill] sm:$0xff]  ;;  %v3354_v21 = vsel %vm1682_vm3, %v3290_v12, %v11338_v51 }
 0x4c9   : > { %v11334_v9 = vld [vmem:[#allocation222_spill] sm:$0xff]  ;;  %v3292_v54 = vsel %vm1649_vm2, %v5435_v28, %v11335_v46  ;;  %v3322_v43 = vsel %vm1649_vm2, %v5436_v55, %v11336_v58  ;;  %v11340_v40 = vld [vmem:[#allocation259_spill] sm:$0xff]  ;;  %v11342_v49 = vld [vmem:[#allocation284_spill] sm:$0xff] }
 0x4ca   : > { %v3294_v17 = vsel %vm1649_vm2, %v5434_v36, %v11334_v9  ;;  %v5437_v47 = vld [vmem:[%s5650_s10 + $0x1ac] ss:$0 sps:$4 sm:$0x11]   ;;  %v3356_v27 = vsel %vm1682_vm3, %v3292_v54, %v11340_v40  ;;  %v11344_v9 = vld [vmem:[#allocation300_spill] sm:$0xff]  ;;  %v11345_v28 = vld [vmem:[#allocation301_spill] sm:$0xff]  ;;  %v3768_v54 = vsel %vm10446_vm9, %v3704_v45, %v9617_v1  ;;  %v3736_v1 = vsel %vm10446_vm9, %v9599_v18, %v9619_v32 }
 0x4cb   : > { %v9625_v39 = vpop.permute.xlu1 %3041  ;;  %v9627_v38 = vpop.permute.xlu0 %3009  ;;  %v3326_v26 = vsel %vm1649_vm2, %v5437_v47, %v11337_v35  ;;  %v11339_v60 = vld [vmem:[#allocation258_spill] sm:$0xff]  ;;  %v3420_v46 = vsel %vm1715_vm4, %v3356_v27, %v11345_v28  ;;  %v11347_v47 = vld [vmem:[#allocation195_spill] sm:$0xff]  ;;  %v11349_v51 = vld [vmem:[#allocation317_spill] sm:$0xff]  ;;  %v3708_v32 = vsel %vm10447_vm8, %v9603_v5, %v9613_v62 }
 0x4cc   : > { %v3358_v23 = vsel %vm1682_vm3, %v3294_v17, %v11339_v60  ;;  %v11341_v19 = vld [vmem:[#allocation282_spill] sm:$0xff]  ;;  %v3390_v53 = vsel %vm1682_vm3, %v3326_v26, %v11342_v49  ;;  %v11348_v20 = vld [vmem:[#allocation315_spill] sm:$0xff]  ;;  %v11352_v49 = vld [vmem:[#allocation324_spill] sm:$0xff] }
 0x4cd   : > { %v3386_v8 = vsel %vm1682_vm3, %v3322_v43, %v11341_v19  ;;  %v11343_v36 = vld [vmem:[#allocation298_spill] sm:$0xff]  ;;  %v3422_v17 = vsel %vm1715_vm4, %v3358_v23, %v11344_v9  ;;  %v3454_v35 = vsel %vm1715_vm4, %v3390_v53, %v11347_v47  ;;  %v11351_v19 = vld [vmem:[#allocation96_spill] sm:$0xff]  ;;  %v11355_v28 = vld [vmem:[#allocation333_spill] sm:$0xff] }
 0x4ce   : > { %v3418_v12 = vsel %vm1715_vm4, %v3354_v21, %v11343_v36  ;;  %v11346_v58 = vld [vmem:[#allocation190_spill] sm:$0xff]  ;;  %v3486_v21 = vsel %vm1748_vm5, %v3422_v17, %v11349_v51  ;;  %v3518_v53 = vsel %vm1748_vm5, %v3454_v35, %v11352_v49 }
 0x4cf   : > { %v9629_v63 = vpop.permute.xlu1 %3119  ;;  %v3450_v43 = vsel %vm1715_vm4, %v3386_v8, %v11346_v58  ;;  %v3482_v29 = vsel %vm1748_vm5, %v3418_v12, %v11348_v20  ;;  %v11350_v60 = vld [vmem:[#allocation318_spill] sm:$0xff]  ;;  %v11354_v12 = vld [vmem:[#allocation331_spill] sm:$0xff] }
 0x4d0   : > { %v9631_v10 = vpop.permute.xlu0 %3087  ;;  %v3484_v23 = vsel %vm1748_vm5, %v3420_v46, %v11350_v60  ;;  %v3514_v8 = vsel %vm1748_vm5, %v3450_v43, %v11351_v19  ;;  %v3546_v9 = vsel %vm1781_vm6, %v3482_v29, %v11354_v12  ;;  %v3550_v46 = vsel %vm1781_vm6, %v3486_v21, %v11355_v28 }
 0x4d1   : > { %v3582_v43 = vsel %vm1781_vm6, %v3518_v53, %v9605_v2 }
 0x4d2   : > { %v3646_v2 = vsel %vm1814_vm7, %v3582_v43, %v9621_v0 }
 0x4d3   : > { %v9633_v7 = vpop.permute.xlu1 %3182 }
 0x4d4   : > { %v9641_v22 = vpop.permute.xlu0 %3150  ;;  %v3832_v26 = vsel %vm1913_vm10, %v3768_v54, %v9633_v7  ;;  %v11353_v7 = vld [vmem:[#allocation334_spill] sm:$0xff] }
 0x4d5   : > { %v3548_v45 = vsel %vm1781_vm6, %v3484_v23, %v11353_v7  ;;  %v3800_v36 = vsel %vm1913_vm10, %v3736_v1, %v9641_v22  ;;  %v3772_v22 = vsel %vm10446_vm9, %v3708_v32, %v9629_v63 }
 0x4d6   : > { %v3612_v18 = vsel %vm1814_vm7, %v3548_v45, %v9577_v50  ;;  %v3578_v50 = vsel %vm1781_vm6, %v3514_v8, %v9587_v24  ;;  %v3610_v24 = vsel %vm1814_vm7, %v3546_v9, %v9611_v15 }
 0x4d7   : > { %v9665_v33 = vpop.permute.xlu1 %3045  ;;  %v3676_v54 = vsel %vm10447_vm8, %v3612_v18, %v9615_v30  ;;  %v3642_v30 = vsel %vm1814_vm7, %v3578_v50, %v9609_v56  ;;  %v3614_v56 = vsel %vm1814_vm7, %v3550_v46, %v9623_v37 }
 0x4d8   : > { %v3740_v5 = vsel %vm10446_vm9, %v3676_v54, %v9631_v10  ;;  %v3706_v10 = vsel %vm10447_vm8, %v3642_v30, %v9625_v39  ;;  %v3710_v0 = vsel %vm10447_vm8, %v3646_v2, %v9665_v33  ;;  %v11359_v30 = vld [vmem:[#allocation66_spill] sm:$0xff] }
 0x4da   : > { %v9683_v6 = vpop.permute.xlu0 %3013 }
 0x4db   : > { %v9701_v14 = vpop.permute.xlu1 %3117 }
 0x4dc   : > { %v3770_v29 = vsel %vm10446_vm9, %v3706_v10, %v9701_v14 }
 0x4de   : > { %v9719_v61 = vpop.permute.xlu0 %3085 }
 0x4df   : > { %v9737_v25 = vpop.permute.xlu1 %3186 }
 0x4e0   : > { %v3836_v62 = vsel %vm1913_vm10, %v3772_v22, %v9737_v25 }
 0x4e2   : > { %v9755_v57 = vpop.permute.xlu0 %3154 }
 0x4e3   : > { %v3256_v4 = vpop.permute.xlu1 %3255  ;;  %v3804_v63 = vsel %vm1913_vm10, %v3740_v5, %v9755_v57  ;;  %v3674_v57 = vsel %vm10447_vm8, %v3610_v24, %v9627_v38  ;;  %v3678_v38 = vsel %vm10447_vm8, %v3614_v56, %v9683_v6  ;;  %vm10448_vm8 = vcmask 883712   ;;  %v11361_v24 = vld [vmem:[#allocation107_spill] sm:$0xff] }
 0x4e4   : > { %v3896_v40 = vsel %vm1946_vm11, %v3832_v26, %v3256_v4  ;;  %v3738_v39 = vsel %vm10446_vm9, %v3674_v57, %v9719_v61  ;;  %v11362_v56 = vld [vmem:[#allocation163_spill] sm:$0xff]  ;;  %v11363_v57 = vld [vmem:[#allocation178_spill] sm:$0xff] }
 0x4e5   : > { %v4045_v58 = vshll.u32 %v3896_v40, 16  ;;  %v4043_v60 = vshrl.u32 %v3896_v40, 16 }
 0x4e6   : > { %v3224_v3 = vpop.permute.xlu0 %3223 }
 0x4e7   : > { %v9811_v16 = vpop.permute.xlu1 %3121  ;;  %v3864_v4 = vsel %vm1946_vm11, %v3800_v36, %v3224_v3  ;;  %v4047_v15 = vrot.slane %v4045_v58, 1 }
 0x4e8   : > { %v3965_v47 = vshll.u32 %v3864_v4, 16  ;;  %v3963_v14 = vshrl.u32 %v3864_v4, 16  ;;  %v3774_v61 = vsel %vm10446_vm9, %v3710_v0, %v9811_v16 }
 0x4e9   : > { %v4048_v8 = vor.u32 %v4047_v15, %v4043_v60  ;;  %v11367_v60 = vld [vmem:[#allocation185_spill] sm:$0xff] }
 0x4ea   : > { %v9837_v42 = vpop.permute.xlu0 %3089  ;;  %v3967_v23 = vrot.slane %v3965_v47, 1 }
 0x4eb   : > { %v3185_v34 = vpop.permute.xlu1 %3184 }
 0x4ec   : > { %v3834_v26 = vsel %vm1913_vm10, %v3770_v29, %v3185_v34  ;;  %v3742_v34 = vsel %vm10446_vm9, %v3678_v38, %v9837_v42  ;;  %v3968_v36 = vor.u32 %v3967_v23, %v3963_v14  ;;  %vm11357_vm9 = vcmask 490496   ;;  %v11364_v29 = vld [vmem:[#allocation104_spill] sm:$0xff]  ;;  %v11369_v14 = vld [vmem:[#allocation59_spill] sm:$0xff] }
 0x4ee   : > { %v3153_v55 = vpop.permute.xlu0 %3152 }
 0x4ef   : > { %v3260_v27 = vpop.permute.xlu1 %3259 }
 0x4f0   : > { %v3900_v35 = vsel %vm1946_vm11, %v3836_v62, %v3260_v27  ;;  %v3802_v27 = vsel %vm1913_vm10, %v3738_v39, %v3153_v55  ;;  %v11358_v62 = vld [vmem:[#allocation166_spill] sm:$0xff]  ;;  %v11365_v39 = vld [vmem:[#allocation175_spill] sm:$0xff] }
 0x4f1   : > { %v4055_v51 = vshll.u32 %v3900_v35, 16  ;;  %v4053_v12 = vshrl.u32 %v3900_v35, 16 }
 0x4f2   : > { %v3228_v17 = vpop.permute.xlu0 %3227 }
 0x4f3   : > { %v3189_v3 = vpop.permute.xlu1 %3188  ;;  %v3868_v25 = vsel %vm1946_vm11, %v3804_v63, %v3228_v17  ;;  %v4057_v49 = vrot.slane %v4055_v51, 1  ;;  %v11356_v17 = vld [vmem:[#allocation187_spill] sm:$0xff]  ;;  %v11360_v63 = vld [vmem:[#allocation92_spill] sm:$0xff]  ;;  %v11366_v51 = vld [vmem:[#allocation93_spill] sm:$0xff] }
 0x4f4   : > { %v3975_v37 = vshll.u32 %v3868_v25, 16  ;;  %v3838_v53 = vsel %vm1913_vm10, %v3774_v61, %v3189_v3  ;;  %v2129_v28 = vsel %vm11357_vm9, %v9841_v44, %v11356_v17  ;;  %v3973_v46 = vshrl.u32 %v3868_v25, 16  ;;  %v11371_v61 = vld [vmem:[#allocation149_spill] sm:$0xff] }
 0x4f5   : > { %v4058_v22 = vor.u32 %v4057_v49, %v4053_v12  ;;  %v1983_v3 = vsel %vm1979_vm12, %v9825_v11, %v11358_v62  ;;  %v2065_v44 = vsel %vm2045_vm14, %v9829_v13, %v11359_v30  ;;  %v2080_v47 = vsel %vm2078_vm15, %v9833_v59, %v11360_v63 }
 0x4f6   : > { %v3157_v20 = vpop.permute.xlu0 %3156  ;;  %v3977_v55 = vrot.slane %v3975_v37, 1  ;;  %v2113_v2 = vsel %vm11357_vm9, %v2080_v47, %v11361_v24  ;;  %v1968_v13 = vsel %vm1946_vm11, %v9815_v48, %v11362_v56  ;;  %v2016_v59 = vsel %vm2012_vm13, %v1983_v3, %v11363_v57  ;;  %v11386_v3 = vld [vmem:[#allocation98_spill] sm:$0xff]  ;;  %v11389_v24 = vld [vmem:[#allocation113_spill] sm:$0xff]  ;;  %v11392_v57 = vld [vmem:[#allocation112_spill] sm:$0xff] }
 0x4f7   : > { %v3258_v21 = vpop.permute.xlu1 %3257  ;;  %v3806_v18 = vsel %vm1913_vm10, %v3742_v34, %v3157_v20  ;;  %v2098_v15 = vsel %vm2078_vm15, %v2065_v44, %v11364_v29  ;;  %v1937_v34 = vsel %vm1913_vm10, %v9785_v31, %v11371_v61  ;;  %v11387_v44 = vld [vmem:[#allocation168_spill] sm:$0xff]  ;;  %v11388_v47 = vld [vmem:[#allocation82_spill] sm:$0xff]  ;;  %v11401_v61 = vld [vmem:[#allocation65_spill] sm:$0xff] }
 0x4f8   : > { %v3898_v1 = vsel %vm1946_vm11, %v3834_v26, %v3258_v21  ;;  %v3978_v10 = vor.u32 %v3977_v55, %v3973_v46  ;;  %v2001_v26 = vsel %vm1979_vm12, %v1968_v13, %v11365_v39  ;;  %v2049_v21 = vsel %vm2045_vm14, %v2016_v59, %v11366_v51  ;;  %v11377_v55 = vld [vmem:[#allocation11_spill] sm:$0xff]  ;;  %v11391_v56 = vld [vmem:[#allocation26_spill] sm:$0xff]  ;;  %v11395_v51 = vld [vmem:[#allocation188_spill] sm:$0xff] }
 0x4f9   : > { %v4049_v19 = vshll.u32 %v3898_v1, 16  ;;  %v2131_v23 = vsel %vm11357_vm9, %v2098_v15, %v11367_v60  ;;  %v11368_v1 = vld [vmem:[#allocation157_spill] sm:$0xff]  ;;  %v11394_v39 = vld [vmem:[#allocation34_spill] sm:$0xff] }
 0x4fa   : > { %v3226_v33 = vpop.permute.xlu0 %3225  ;;  %v1952_v38 = vsel %vm1946_vm11, %v9803_v41, %v11368_v1  ;;  %v11393_v15 = vld [vmem:[#allocation33_spill] sm:$0xff] }
 0x4fb   : > { %v3866_v40 = vsel %vm1946_vm11, %v3802_v27, %v3226_v33  ;;  %v4051_v7 = vrot.slane %v4049_v19, 1  ;;  %v3262_v6 = vpop.permute.xlu1 %3261  ;;  %v2034_v27 = vsel %vm2012_vm13, %v2001_v26, %v11369_v14  ;;  %v11370_v19 = vld [vmem:[#allocation114_spill] sm:$0xff]  ;;  %v11398_v1 = vld [vmem:[#allocation49_spill] sm:$0xff]  ;;  %v11399_v14 = vld [vmem:[#allocation140_spill] sm:$0xff] }
 0x4fc   : > { %v3969_v45 = vshll.u32 %v3866_v40, 16  ;;  %v3902_v9 = vsel %vm1946_vm11, %v3838_v53, %v3262_v6  ;;  %v2082_v33 = vsel %vm2078_vm15, %v2049_v21, %v11370_v19  ;;  %v11372_v40 = vld [vmem:[#allocation169_spill] sm:$0xff]  ;;  %v11373_v53 = vld [vmem:[#allocation67_spill] sm:$0xff] }
 0x4fd   : > { %v4059_v16 = vshll.u32 %v3902_v9, 16  ;;  %v4052_v42 = vsel %vm485_vm0, %v4048_v8, %v4051_v7  ;;  %v1985_v49 = vsel %vm1979_vm12, %v1952_v38, %v11372_v40  ;;  %v2067_v41 = vsel %vm2045_vm14, %v2034_v27, %v11373_v53  ;;  %v11374_v7 = vld [vmem:[#allocation116_spill] sm:$0xff]  ;;  %v11402_v40 = vld [vmem:[#allocation103_spill] sm:$0xff] }
 0x4fe   : > { %v3971_v32 = vrot.slane %v3969_v45, 1  ;;  %4091 = vrot.lane.b32.xlu1 %v4052_v42, %s5551_s5  ;;  %v2018_v9 = vsel %vm2012_vm13, %v1985_v49, %v11377_v55  ;;  %v11380_v42 = vld [vmem:[#allocation174_spill] sm:$0xff] }
 0x4ff   : > { %v3230_v4 = vpop.permute.xlu0 %3229  ;;  %v4061_v58 = vrot.slane %v4059_v16, 1  ;;  %v4080_v5 = vpop.permute.xlu1 %4079  ;;  %v11379_v16 = vld [vmem:[#allocation143_spill] sm:$0xff] }
 0x500   : > { %v3870_v54 = vsel %vm1946_vm11, %v3806_v18, %v3230_v4  ;;  %v3972_v43 = vsel %vm485_vm0, %v3968_v36, %v3971_v32  ;;  %v4113_v35 = vsel %vm4095_vm1, %v2129_v28, %v4080_v5  ;;  %v11376_v36 = vld [vmem:[#allocation162_spill] sm:$0xff]  ;;  %v11378_v18 = vld [vmem:[#allocation101_spill] sm:$0xff]  ;;  %v1921_v4 = vsel %vm1913_vm10, %v9775_v52, %v11379_v16  ;;  %v11381_v28 = vld [vmem:[#allocation19_spill] sm:$0xff] }
 0x501   : > { %v3979_v50 = vshll.u32 %v3870_v54, 16  ;;  %4075 = vrot.lane.b32.xlu0 %v3972_v43, %s5551_s5  ;;  %5147 = vmatprep.mubr.msk.bf16.mxu1 %vm10448_vm8, %v4113_v35  ;;  %v4062_v11 = vsel %vm485_vm0, %v4058_v22, %v4061_v58  ;;  %v1970_v12 = vsel %vm1946_vm11, %v1937_v34, %v11376_v36  ;;  %v2100_v31 = vsel %vm2078_vm15, %v2067_v41, %v11378_v18  ;;  %v11382_v54 = vld [vmem:[#allocation192_spill] sm:$0xff]  ;;  %v11385_v5 = vld [vmem:[#allocation74_spill] sm:$0xff]  ;;  %v11403_v41 = vld [vmem:[#allocation41_spill] sm:$0xff] }
 0x502   : > { %4093 = vrot.lane.b32.xlu1 %v4062_v11, %s5551_s5  ;;  %v2003_v17 = vsel %vm1979_vm12, %v1970_v12, %v11380_v42  ;;  %v2051_v46 = vsel %vm2045_vm14, %v2018_v9, %v11381_v28  ;;  %v11405_v12 = vld [vmem:[#allocation57_spill] sm:$0xff]  ;;  %v11406_v9 = vld [vmem:[#allocation108_spill] sm:$0xff] }
 0x503   : > { %v3981_v25 = vrot.slane %v3979_v50, 1  ;;  %v4064_v20 = vpop.permute.xlu0 %4063  ;;  %v4082_v37 = vpop.permute.xlu1 %4081  ;;  %v11384_v50 = vld [vmem:[#allocation156_spill] sm:$0xff]  ;;  %v2036_v62 = vsel %vm2012_vm13, %v2003_v17, %v11385_v5  ;;  %v2084_v52 = vsel %vm2078_vm15, %v2051_v46, %v11386_v3  ;;  %v11409_v17 = vld [vmem:[#allocation127_spill] sm:$0xff]  ;;  %v11416_v3 = vld [vmem:[#allocation121_spill] sm:$0xff] }
 0x504   : > { %v4097_v0 = vsel %vm4095_vm1, %v2113_v2, %v4064_v20  ;;  %v4115_v8 = vsel %vm4095_vm1, %v2131_v23, %v4082_v37  ;;  %v1954_v43 = vsel %vm1946_vm11, %v1921_v4, %v11384_v50  ;;  %v2069_v35 = vsel %vm2045_vm14, %v2036_v62, %v11388_v47  ;;  %v11390_v20 = vld [vmem:[#allocation17_spill] sm:$0xff]  ;;  %v5439_v23 = vld [vmem:[%s5650_s10 + $0x30] sm:$0xff]   ;;  %v11411_v46 = vld [vmem:[#allocation24_spill] sm:$0xff] }
 0x505   : > { %5131 = vmatprep.mubr.msk.bf16.mxu0 %vm10448_vm8, %v4097_v0  ;;  %v3982_v48 = vsel %vm485_vm0, %v3978_v10, %v3981_v25  ;;  %vm11375_vm0 = vmmov %vm11357_vm9  ;;  %5148 = vmatmul.mubr.msk.bf16.vlgmr.msra.gmra.mxu1 %vm10448_vm8, %v4115_v8  ;;  %v1987_v63 = vsel %vm1979_vm12, %v1954_v43, %v11387_v44  ;;  %v5438_v25 = vld [vmem:[%s5650_s10 + $0x90] sm:$0xff]   ;;  %v2102_v59 = vsel %vm2078_vm15, %v2069_v35, %v11392_v57  ;;  %v11408_v4 = vld [vmem:[#allocation73_spill] sm:$0xff] }
 0x506   : > { %4077 = vrot.lane.b32.xlu0 %v3982_v48, %s5551_s5  ;;  %v2115_v45 = vsel %vm11375_vm0, %v2082_v33, %v11374_v7  ;;  %vm11383_vm9 = vmmov %vm11375_vm0  ;;  %v2117_v2 = vsel %vm11375_vm0, %v2084_v52, %v11389_v24  ;;  %v1675_v11 = vsel %vm1649_vm2, %v5438_v25, %v11390_v20  ;;  %v2020_v13 = vsel %vm2012_vm13, %v1987_v63, %v11391_v56  ;;  %v11397_v48 = vld [vmem:[#allocation10_spill] sm:$0xff]  ;;  %v11400_v33 = vld [vmem:[#allocation25_spill] sm:$0xff] }
 0x507   : > { %v4066_v6 = vpop.permute.xlu0 %4065  ;;  %v2133_v22 = vsel %vm11383_vm9, %v2100_v31, %v11382_v54  ;;  %v4084_v58 = vpop.permute.xlu1 %4083  ;;  %v1708_v0 = vsel %vm1682_vm3, %v1675_v11, %v11393_v15  ;;  %v2053_v26 = vsel %vm2045_vm14, %v2020_v13, %v11394_v39  ;;  %vm11396_vm9 = vmmov %vm11375_vm0  ;;  %v1659_v37 = vsel %vm1649_vm2, %v5439_v23, %v11397_v48  ;;  %v5440_v31 = vld [vmem:[%s5650_s10 + $0x3c] sm:$0xff]   ;;  %v11413_v50 = vld [vmem:[#allocation139_spill] sm:$0xff] }
 0x508   : > { %v4099_v32 = vsel %vm4095_vm1, %v2115_v45, %v4066_v6  ;;  %v4117_v30 = vsel %vm4095_vm1, %v2133_v22, %v4084_v58  ;;  %v2135_v21 = vsel %vm11396_vm9, %v2102_v59, %v11395_v51  ;;  %v1741_v38 = vsel %vm1715_vm4, %v1708_v0, %v11398_v1  ;;  %v11404_v45 = vld [vmem:[#allocation81_spill] sm:$0xff]  ;;  %v11415_v5 = vld [vmem:[#allocation40_spill] sm:$0xff]  ;;  %v11425_v57 = vld [vmem:[#allocation146_spill] sm:$0xff] }
 0x509   : > { %5132 = vmatmul.mubr.msk.bf16.vlgmr.msra.gmra.mxu0 %vm10448_vm8, %v4099_v32  ;;  %5151 = vmatprep.mubr.msk.bf16.mxu1 %vm10448_vm8, %v4117_v30  ;;  %v2086_v27 = vsel %vm2078_vm15, %v2053_v26, %v11399_v14  ;;  %v1692_v8 = vsel %vm1682_vm3, %v1659_v37, %v11400_v33  ;;  %v1774_v34 = vsel %vm1748_vm5, %v1741_v38, %v11401_v61  ;;  %v11407_v32 = vld [vmem:[#allocation9_spill] sm:$0xff]  ;;  %vm11410_vm9 = vcmask 228352   ;;  %v11418_v30 = vld [vmem:[#allocation152_spill] sm:$0xff]  ;;  %v11430_v23 = vld [vmem:[#allocation75_spill] sm:$0xff] }
 0x50a   : > { %v2119_v49 = vsel %vm11375_vm0, %v2086_v27, %v11402_v40  ;;  %v1725_v7 = vsel %vm1715_vm4, %v1692_v8, %v11403_v41  ;;  %v1807_v6 = vsel %vm1781_vm6, %v1774_v34, %v11404_v45  ;;  %v1661_v16 = vsel %vm1649_vm2, %v5440_v31, %v11407_v32  ;;  %v11412_v22 = vld [vmem:[#allocation89_spill] sm:$0xff]  ;;  %v11419_v63 = vld [vmem:[#allocation56_spill] sm:$0xff]  ;;  %v11434_v27 = vld [vmem:[#allocation171_spill] sm:$0xff] }
 0x50b   : > { %v4068_v10 = vpop.permute.xlu0 %4067  ;;  %v4086_v60 = vpop.permute.xlu1 %4085  ;;  %v1758_v55 = vsel %vm1748_vm5, %v1725_v7, %v11405_v12  ;;  %v1840_v18 = vsel %vm1814_vm7, %v1807_v6, %v11406_v9  ;;  %v1694_v54 = vsel %vm1682_vm3, %v1661_v16, %v11411_v46  ;;  %vm11414_vm0 = vcmask 261120   ;;  %v11420_v35 = vld [vmem:[#allocation133_spill] sm:$0xff]  ;;  %v11423_v20 = vld [vmem:[#allocation16_spill] sm:$0xff]  ;;  %v11435_v33 = vld [vmem:[#allocation83_spill] sm:$0xff] }
 0x50c   : > { %v4101_v29 = vsel %vm4095_vm1, %v2117_v2, %v4068_v10  ;;  %v4119_v19 = vsel %vm4095_vm1, %v2135_v21, %v4086_v60  ;;  %v1791_v42 = vsel %vm1781_vm6, %v1758_v55, %v11408_v4  ;;  %v1873_v28 = vsel %vm11410_vm9, %v1840_v18, %v11409_v17  ;;  %v11422_v2 = vld [vmem:[#allocation165_spill] sm:$0xff]  ;;  %v11424_v56 = vld [vmem:[#allocation72_spill] sm:$0xff]  ;;  %v11429_v21 = vld [vmem:[#allocation159_spill] sm:$0xff] }
 0x50d   : > { %5135 = vmatprep.mubr.msk.bf16.mxu0 %vm10448_vm8, %v4101_v29  ;;  %5152 = vmatmul.mubr.msk.bf16.gmra.mxu1 %vm10448_vm8, %v4119_v19  ;;  %v1824_v58 = vsel %vm1814_vm7, %v1791_v42, %v11412_v22  ;;  %v1906_v43 = vsel %vm11414_vm0, %v1873_v28, %v11413_v50  ;;  %v1727_v62 = vsel %vm1715_vm4, %v1694_v54, %v11415_v5  ;;  %v5441_v25 = vld [vmem:[%s5650_s10 + $0x9c] sm:$0xff]   ;;  %v11440_v7 = vld [vmem:[#allocation99_spill] sm:$0xff]  ;;  %v11447_v17 = vld [vmem:[#allocation158_spill] sm:$0xff]  ;;  %s5442_s10 = scalar_lea.vmem %s10276_s16, 2048 }
 0x50e   : > { %v1939_v44 = vsel %vm1913_vm10, %v1906_v43, %v11418_v30  ;;  %v1760_v47 = vsel %vm1748_vm5, %v1727_v62, %v11419_v63  ;;  %v1677_v11 = vsel %vm1649_vm2, %v5441_v25, %v11423_v20  ;;  %v11426_v29 = vld [vmem:[#allocation177_spill] sm:$0xff]  ;;  %v11427_v0 = vld [vmem:[#allocation32_spill] sm:$0xff]  ;;  %v11443_v9 = vld [vmem:[#allocation35_spill] sm:$0xff]  ;;  %p5443_p13 = scmp.ne.s32.totalorder %s10276_s16, %s5442_s10  ;;  %p5450_p4 = scmp.lt.s32.totalorder %s5448_s7, %s5442_s10 }
 0x50f   : > { %v4070_v53 = vpop.permute.xlu0 %4069  ;;  %v1972_v10 = vsel %vm1946_vm11, %v1939_v44, %v11422_v2  ;;  %v1793_v13 = vsel %vm1781_vm6, %v1760_v47, %v11424_v56  ;;  %v1710_v39 = vsel %vm1682_vm3, %v1677_v11, %v11427_v0  ;;  %v11428_v26 = vld [vmem:[#allocation88_spill] sm:$0xff]  ;;  %vm11438_vm3 = vmmov %vm11414_vm0  ;;  %v11442_v12 = vld [vmem:[#allocation145_spill] sm:$0xff] }
 0x510   : > { %v4103_v36 = vsel %vm4095_vm1, %v2119_v49, %v4070_v53  ;;  %v2005_v15 = vsel %vm1979_vm12, %v1972_v10, %v11426_v29  ;;  %v1826_v51 = vsel %vm1814_vm7, %v1793_v13, %v11428_v26  ;;  %v11431_v37 = vld [vmem:[#allocation48_spill] sm:$0xff]  ;;  %v11439_v53 = vld [vmem:[#allocation27_spill] sm:$0xff]  ;;  %v11446_v4 = vld [vmem:[#allocation105_spill] sm:$0xff]  ;;  %p5444_p0 = pnand %p5443_p13, %p5624_p3  ;;  %p5451_p5 = por %p5450_p4, %p5449_p2 }
 0x511   : > { %5136 = vmatmul.mubr.msk.bf16.gmra.mxu0 %vm10448_vm8, %v4103_v36  ;;  %vm11417_vm8 = vmmov %vm11410_vm9  ;;  %v2038_v48 = vsel %vm2012_vm13, %v2005_v15, %v11430_v23  ;;  %v1743_v1 = vsel %vm1715_vm4, %v1710_v39, %v11431_v37  ;;  %v11432_v38 = vld [vmem:[#allocation120_spill] sm:$0xff]  ;;  %vm11445_vm4 = vcmask 490496   ;;  %v11448_v46 = vld [vmem:[#allocation106_spill] sm:$0xff] }
 0x512   : > { %v1857_v52 = vsel %vm11417_vm8, %v1824_v58, %v11416_v3  ;;  %vm11421_vm9 = vmmov %vm11414_vm0  ;;  %v2071_v8 = vsel %vm2045_vm14, %v2038_v48, %v11435_v33  ;;  %v11436_v61 = vld [vmem:[#allocation64_spill] sm:$0xff]  ;;  %v11449_v58 = vld [vmem:[#allocation126_spill] sm:$0xff]  ;;  %p5445_p1 = pneg %p5444_p0 }
 0x513   : > { %v1890_v24 = vsel %vm11421_vm9, %v1857_v52, %v11420_v35  ;;  %vm11433_vm2 = vmmov %vm11417_vm8  ;;  %v1776_v34 = vsel %vm1748_vm5, %v1743_v1, %v11436_v61  ;;  %v11437_v40 = vld [vmem:[#allocation132_spill] sm:$0xff]  ;;  %v2104_v45 = vsel %vm2078_vm15, %v2071_v8, %v11440_v7  ;;  %v11451_v43 = vld [vmem:[#allocation170_spill] sm:$0xff]  ;;  %vm11454_vm8 = vcmask 883712  }
 0x514   : > { %v1923_v59 = vsel %vm1913_vm10, %v1890_v24, %v11425_v57  ;;  %v1859_v14 = vsel %vm11433_vm2, %v1826_v51, %v11432_v38  ;;  %v11441_v6 = vld [vmem:[#allocation80_spill] sm:$0xff]  ;;  %vm11450_vm5 = vmmov %vm11433_vm2  ;;  %v11452_v62 = vld [vmem:[#allocation181_spill] sm:$0xff]  ;;  %p5452_p6 = pnand %p5451_p5, %p5445_p1 }
 0x515   : > { %v1956_v60 = vsel %vm1946_vm11, %v1923_v59, %v11429_v21  ;;  %v1892_v49 = vsel %vm11438_vm3, %v1859_v14, %v11437_v40  ;;  %v1809_v36 = vsel %vm1781_vm6, %v1776_v34, %v11441_v6  ;;  %v11444_v31 = vld [vmem:[#allocation196_spill] sm:$0xff]  ;;  %vm11453_vm6 = vmmov %vm11445_vm4  ;;  %v11455_v30 = vld [vmem:[#allocation138_spill] sm:$0xff] }
 0x516   : > { %v1989_v19 = vsel %vm1979_vm12, %v1956_v60, %v11434_v27  ;;  %v1925_v55 = vsel %vm1913_vm10, %v1892_v49, %v11442_v12  ;;  %v2137_v32 = vsel %vm11445_vm4, %v2104_v45, %v11444_v31  ;;  %v1842_v42 = vsel %vm1814_vm7, %v1809_v36, %v11446_v4  ;;  %vm11456_vm7 = vmmov %vm11414_vm0  ;;  %v11457_v63 = vld [vmem:[#allocation42_spill] sm:$0xff]  ;;  %v11458_v24 = vld [vmem:[#allocation151_spill] sm:$0xff] }
 0x517   : > { %v2022_v41 = vsel %vm2012_vm13, %v1989_v19, %v11439_v53  ;;  %v1958_v28 = vsel %vm1946_vm11, %v1925_v55, %v11447_v17  ;;  %v1875_v50 = vsel %vm11450_vm5, %v1842_v42, %v11449_v58  ;;  %v11459_v10 = vld [vmem:[#allocation50_spill] sm:$0xff]  ;;  %vm11460_vm0 = vmmov %vm11454_vm8  ;;  %v11461_v20 = vld [vmem:[#allocation164_spill] sm:$0xff] }
 0x518   : > { %v2055_v18 = vsel %vm2045_vm14, %v2022_v41, %v11443_v9  ;;  %v4088_v16 = vpop.permute.xlu1 %4087  ;;  %v1991_v5 = vsel %vm1979_vm12, %v1958_v28, %v11451_v43  ;;  %v1908_v44 = vsel %vm11456_vm7, %v1875_v50, %v11455_v30  ;;  %v11462_v56 = vld [vmem:[#allocation90_spill] sm:$0xff]  ;;  %v11463_v57 = vld [vmem:[#allocation176_spill] sm:$0xff]  ;;  %vm11465_vm9 = vmmov %vm11445_vm4 }
 0x519   : > { %v2088_v54 = vsel %vm2078_vm15, %v2055_v18, %v11448_v46  ;;  %v4121_v22 = vsel %vm4095_vm1, %v2137_v32, %v4088_v16  ;;  %v2024_v47 = vsel %vm2012_vm13, %v1991_v5, %v11457_v63  ;;  %v1941_v2 = vsel %vm1913_vm10, %v1908_v44, %v11458_v24  ;;  %v11464_v29 = vld [vmem:[#allocation110_spill] sm:$0xff]  ;;  %v11466_v39 = vld [vmem:[#allocation91_spill] sm:$0xff]  ;;  %vm11468_vm10 = vmmov %vm11460_vm0 }
 0x51a   : > { %v2121_v3 = vsel %vm11453_vm6, %v2088_v54, %v11452_v62  ;;  %v4072_v52 = vpop.permute.xlu0 %4071  ;;  %5155 = vmatprep.mubr.msk.bf16.mxu1 %vm11454_vm8, %v4121_v22  ;;  %v2057_v25 = vsel %vm2045_vm14, %v2024_v47, %v11459_v10  ;;  %v1974_v11 = vsel %vm1946_vm11, %v1941_v2, %v11461_v20  ;;  %v11467_v21 = vld [vmem:[#allocation111_spill] sm:$0xff]  ;;  %v11469_v23 = vld [vmem:[#allocation109_spill] sm:$0xff]  ;;  %vm11471_vm11 = vmmov %vm11445_vm4 }
 0x51b   : > { %v4105_v35 = vsel %vm4095_vm1, %v2121_v3, %v4072_v52  ;;  %v2090_v13 = vsel %vm2078_vm15, %v2057_v25, %v11462_v56  ;;  %v2007_v59 = vsel %vm1979_vm12, %v1974_v11, %v11463_v57  ;;  %v11470_v37 = vld [vmem:[#allocation193_spill] sm:$0xff]  ;;  %vm11472_vm12 = vmmov %vm11460_vm0  ;;  %v11473_v19 = vld [vmem:[#allocation200_spill] sm:$0xff] }
 0x51c   : > { %5139 = vmatprep.mubr.msk.bf16.mxu0 %vm11460_vm0, %v4105_v35  ;;  %v2123_v15 = vsel %vm11465_vm9, %v2090_v13, %v11464_v29  ;;  %v2040_v26 = vsel %vm2012_vm13, %v2007_v59, %v11466_v39  ;;  %vm11474_vm13 = vmmov %vm11460_vm0  ;;  %v11475_v61 = vld [vmem:[#allocation184_spill] sm:$0xff]  ;;  %v11477_v49 = vld [vmem:[#allocation199_spill] sm:$0xff] }
 0x51d   : > { %v2073_v60 = vsel %vm2045_vm14, %v2040_v26, %v11467_v21  ;;  %vm11476_vm14 = vmmov %vm11460_vm0  ;;  %v11479_v7 = vld [vmem:[#allocation183_spill] sm:$0xff]  ;;  %v10214_v6 = vld [vmem:[%s10334_s2] ss:$0 sm:$0xff] }
 0x51e   : > { %v4074_v0 = vpop.permute.xlu0 %4073  ;;  %v2106_v48 = vsel %vm2078_vm15, %v2073_v60, %v11469_v23  ;;  %vm11478_vm15 = vmmov %vm11460_vm0 }
 0x51f   : > { %v4107_v51 = vsel %vm4095_vm1, %v2123_v15, %v4074_v0  ;;  %v2139_v1 = vsel %vm11471_vm11, %v2106_v48, %v11470_v37  ;;  %vm11480_vm2 = vmmov %vm11460_vm0 }
 0x520   : > { %5140 = vmatmul.mubr.msk.bf16.gmra.mxu0 %vm11468_vm10, %v4107_v51 }
 0x521   : > { %v4090_v38 = vpop.permute.xlu1 %4089 }
 0x522   : > { %v4123_v14 = vsel %vm4095_vm1, %v2139_v1, %v4090_v38 }
 0x523   : > { %5156 = vmatmul.mubr.msk.bf16.gmra.mxu1 %vm11472_vm12, %v4123_v14 }
 0x570   : > { %v4092_v27 = vpop.permute.xlu1 %4091 }
 0x571   : > { %v4125_v33 = vsel %vm4095_vm1, %v11473_v19, %v4092_v27 }
 0x572   : > { %5159 = vmatprep.mubr.msk.bf16.mxu1 %vm11474_vm13, %v4125_v33 }
 0x573   : > { %v4076_v8 = vpop.permute.xlu0 %4075 }
 0x574   : > { %v4109_v34 = vsel %vm4095_vm1, %v11475_v61, %v4076_v8  ;;  %v4094_v40 = vpop.permute.xlu1 %4093 }
 0x575   : > { %5143 = vmatprep.mubr.msk.bf16.mxu0 %vm11476_vm14, %v4109_v34  ;;  %v4127_v53 = vsel %vm4095_vm1, %v11477_v49, %v4094_v40 }
 0x576   : > { %5160 = vmatmul.mubr.msk.bf16.gmra.mxu1 %vm11478_vm15, %v4127_v53 }
 0x578   : > { %v4078_v41 = vpop.permute.xlu0 %4077 }
 0x579   : > { %v4111_v45 = vsel %vm4095_vm1, %v11479_v7, %v4078_v41 }
 0x57a   : > { %5144 = vmatmul.mubr.msk.bf16.gmra.mxu0 %vm11480_vm2, %v4111_v45 }
 0x5c5   : > { %v5149_v36 = vpop.f32.mrf.mxu1 }
 0x5c6   : > { %v4334_v55 = vadd.f32 %v5149_v36, %v10214_v6 }
 0x5c7   : > { %v4325_v9 = vpop.f32.mrf.mxu1 }
 0x5c8   : > { %v4326_v32 = vadd.f32 %v10214_v6, %v4325_v9  ;;  %v4406_v42 = vmax.f32 %v4334_v55, 0.0 }
 0x5c9   : > { %v5133_v12 = vpop.f32.mrf.mxu0  ;;  %v5150_v16 = vpop.f32.mrf.mxu1 }
 0x5ca   : > { %v4270_v18 = vadd.f32 %v5133_v12, %v10214_v6  ;;  %v4337_v4 = vadd.f32 %v5150_v16, %v10214_v6  ;;  %v4404_v43 = vmax.f32 %v4326_v32, 0.0 }
 0x5cb   : > { %v4261_v31 = vpop.f32.mrf.mxu0  ;;  %v4328_v28 = vpop.f32.mrf.mxu1 }
 0x5cc   : > { %v4262_v46 = vadd.f32 %v10214_v6, %v4261_v31  ;;  %v4407_v22 = vmax.f32 %v4337_v4, 0.0  ;;  %v4329_v58 = vadd.f32 %v10214_v6, %v4328_v28  ;;  %v4390_v50 = vmax.f32 %v4270_v18, 0.0 }
 0x5cd   : > { %v5134_v17 = vpop.f32.mrf.mxu0  ;;  %v5153_v62 = vpop.f32.mrf.mxu1 }
 0x5ce   : > { %v4273_v54 = vadd.f32 %v5134_v17, %v10214_v6  ;;  %v5047_v52 = vpack.c.bf16 %v4407_v22, %v4406_v42  ;;  %v4405_v44 = vmax.f32 %v4329_v58, 0.0  ;;  %v4350_v47 = vadd.f32 %v5153_v62, %v10214_v6 }
 0x5cf   : > { %v4264_v5 = vpop.f32.mrf.mxu0  ;;  %v4341_v35 = vpop.f32.mrf.mxu1  ;;  %v4388_v24 = vmax.f32 %v4262_v46, 0.0 }
 0x5d0   : > { %v4391_v3 = vmax.f32 %v4273_v54, 0.0  ;;  %v4265_v30 = vadd.f32 %v10214_v6, %v4264_v5  ;;  %5087 = vst [vmem:[%s10228_s9 + $0x48] sm:$0xff] %v5047_v52   ;;  %v5042_v25 = vpack.c.bf16 %v4405_v44, %v4404_v43  ;;  %v4342_v56 = vadd.f32 %v10214_v6, %v4341_v35 }
 0x5d1   : > { %v5137_v63 = vpop.f32.mrf.mxu0  ;;  %v5154_v13 = vpop.f32.mrf.mxu1  ;;  %v4410_v29 = vmax.f32 %v4350_v47, 0.0 }
 0x5d2   : > { %v5007_v2 = vpack.c.bf16 %v4391_v3, %v4390_v50  ;;  %v4389_v10 = vmax.f32 %v4265_v30, 0.0  ;;  %v4286_v20 = vadd.f32 %v5137_v63, %v10214_v6  ;;  %5086 = vst [vmem:[%s10228_s9 + $0x40] sm:$0xff] %v5042_v25   ;;  %v4353_v59 = vadd.f32 %v5154_v13, %v10214_v6 }
 0x5d3   : > { %v4277_v11 = vpop.f32.mrf.mxu0  ;;  %v4344_v0 = vpop.f32.mrf.mxu1  ;;  %v4408_v23 = vmax.f32 %v4342_v56, 0.0 }
 0x5d4   : > { %5079 = vst [vmem:[%s10228_s9 + $0x8] sm:$0xff] %v5007_v2   ;;  %v5002_v57 = vpack.c.bf16 %v4389_v10, %v4388_v24  ;;  %v4278_v39 = vadd.f32 %v10214_v6, %v4277_v11  ;;  %v4411_v51 = vmax.f32 %v4353_v59, 0.0  ;;  %v4345_v21 = vadd.f32 %v10214_v6, %v4344_v0 }
 0x5d5   : > { %v5138_v15 = vpop.f32.mrf.mxu0  ;;  %v4394_v60 = vmax.f32 %v4286_v20, 0.0 }
 0x5d6   : > { %5003 = vst [vmem:[%s10228_s9] sm:$0xff] %v5002_v57   ;;  %v4289_v26 = vadd.f32 %v5138_v15, %v10214_v6  ;;  %v5057_v1 = vpack.c.bf16 %v4411_v51, %v4410_v29  ;;  %v4409_v14 = vmax.f32 %v4345_v21, 0.0  ;;  %v4392_v27 = vmax.f32 %v4278_v39, 0.0 }
 0x5d7   : > { %v4280_v48 = vpop.f32.mrf.mxu0 }
 0x5d8   : > { %v4395_v37 = vmax.f32 %v4289_v26, 0.0  ;;  %v4281_v38 = vadd.f32 %v10214_v6, %v4280_v48  ;;  %5089 = vst [vmem:[%s10228_s9 + $0x58] sm:$0xff] %v5057_v1   ;;  %v5052_v8 = vpack.c.bf16 %v4409_v14, %v4408_v23 }
 0x5da   : > { %v5017_v19 = vpack.c.bf16 %v4395_v37, %v4394_v60  ;;  %v4393_v33 = vmax.f32 %v4281_v38, 0.0  ;;  %5088 = vst [vmem:[%s10228_s9 + $0x50] sm:$0xff] %v5052_v8  }
 0x5dc   : > { %5081 = vst [vmem:[%s10228_s9 + $0x18] sm:$0xff] %v5017_v19   ;;  %v5012_v61 = vpack.c.bf16 %v4393_v33, %v4392_v27 }
 0x5de   : > { %5080 = vst [vmem:[%s10228_s9 + $0x10] sm:$0xff] %v5012_v61  }
 0x5e0   : > { %v5141_v34 = vpop.f32.mrf.mxu0 }
 0x5e1   : > { %v4302_v49 = vadd.f32 %v5141_v34, %v10214_v6 }
 0x5e2   : > { %v4293_v40 = vpop.f32.mrf.mxu0 }
 0x5e3   : > { %v4294_v53 = vadd.f32 %v10214_v6, %v4293_v40  ;;  %v5157_v7 = vpop.f32.mrf.mxu1  ;;  %v4398_v55 = vmax.f32 %v4302_v49, 0.0 }
 0x5e4   : > { %v5142_v41 = vpop.f32.mrf.mxu0  ;;  %v4366_v18 = vadd.f32 %v5157_v7, %v10214_v6 }
 0x5e5   : > { %v4305_v45 = vadd.f32 %v5142_v41, %v10214_v6  ;;  %v4357_v12 = vpop.f32.mrf.mxu1  ;;  %v4396_v32 = vmax.f32 %v4294_v53, 0.0 }
 0x5e6   : > { %v4296_v36 = vpop.f32.mrf.mxu0  ;;  %v4358_v17 = vadd.f32 %v10214_v6, %v4357_v12  ;;  %v4414_v54 = vmax.f32 %v4366_v18, 0.0 }
 0x5e7   : > { %v4399_v9 = vmax.f32 %v4305_v45, 0.0  ;;  %v4297_v31 = vadd.f32 %v10214_v6, %v4296_v36  ;;  %v5158_v16 = vpop.f32.mrf.mxu1 }
 0x5e8   : > { %v4369_v28 = vadd.f32 %v5158_v16, %v10214_v6  ;;  %v4412_v43 = vmax.f32 %v4358_v17, 0.0 }
 0x5e9   : > { %v5027_v4 = vpack.c.bf16 %v4399_v9, %v4398_v55  ;;  %v4397_v42 = vmax.f32 %v4297_v31, 0.0  ;;  %v4360_v46 = vpop.f32.mrf.mxu1 }
 0x5ea   : > { %v4415_v58 = vmax.f32 %v4369_v28, 0.0  ;;  %v4361_v50 = vadd.f32 %v10214_v6, %v4360_v46 }
 0x5eb   : > { %5083 = vst [vmem:[%s10228_s9 + $0x28] sm:$0xff] %v5027_v4   ;;  %v5022_v22 = vpack.c.bf16 %v4397_v42, %v4396_v32 }
 0x5ec   : > { %v5067_v5 = vpack.c.bf16 %v4415_v58, %v4414_v54  ;;  %v4413_v62 = vmax.f32 %v4361_v50, 0.0 }
 0x5ed   : > { %5082 = vst [vmem:[%s10228_s9 + $0x20] sm:$0xff] %v5022_v22  }
 0x5ee   : > { %5091 = vst [vmem:[%s10228_s9 + $0x68] sm:$0xff] %v5067_v5   ;;  %v5062_v3 = vpack.c.bf16 %v4413_v62, %v4412_v43 }
 0x5f0   : > { %5090 = vst [vmem:[%s10228_s9 + $0x60] sm:$0xff] %v5062_v3  }
 0x636   : > { %v5161_v52 = vpop.f32.mrf.mxu1 }
 0x637   : > { %v4382_v44 = vadd.f32 %v5161_v52, %v10214_v6 }
 0x638   : > { %v4373_v63 = vpop.f32.mrf.mxu1 }
 0x639   : > { %v4374_v24 = vadd.f32 %v10214_v6, %v4373_v63  ;;  %v4418_v25 = vmax.f32 %v4382_v44, 0.0 }
 0x63a   : > { %v5145_v30 = vpop.f32.mrf.mxu0  ;;  %v5162_v2 = vpop.f32.mrf.mxu1 }
 0x63b   : > { %v4318_v47 = vadd.f32 %v5145_v30, %v10214_v6  ;;  %v4385_v10 = vadd.f32 %v5162_v2, %v10214_v6  ;;  %v4416_v15 = vmax.f32 %v4374_v24, 0.0 }
 0x63c   : > { %v4309_v35 = vpop.f32.mrf.mxu0  ;;  %v4376_v11 = vpop.f32.mrf.mxu1 }
 0x63d   : > { %v4310_v56 = vadd.f32 %v10214_v6, %v4309_v35  ;;  %v4419_v57 = vmax.f32 %v4385_v10, 0.0  ;;  %v4377_v59 = vadd.f32 %v10214_v6, %v4376_v11  ;;  %v4402_v29 = vmax.f32 %v4318_v47, 0.0 }
 0x63e   : > { %v5146_v20 = vpop.f32.mrf.mxu0 }
 0x63f   : > { %v4321_v13 = vadd.f32 %v5146_v20, %v10214_v6  ;;  %v5077_v26 = vpack.c.bf16 %v4419_v57, %v4418_v25  ;;  %v4417_v21 = vmax.f32 %v4377_v59, 0.0  ;;  %v4400_v60 = vmax.f32 %v4310_v56, 0.0 }
 0x640   : > { %v4312_v0 = vpop.f32.mrf.mxu0 }
 0x641   : > { %v4403_v39 = vmax.f32 %v4321_v13, 0.0  ;;  %v4313_v51 = vadd.f32 %v10214_v6, %v4312_v0  ;;  %5093 = vst [vmem:[%s10228_s9 + $0x78] sm:$0xff] %v5077_v26   ;;  %v5072_v37 = vpack.c.bf16 %v4417_v21, %v4416_v15 }
 0x643   : > { %v5037_v23 = vpack.c.bf16 %v4403_v39, %v4402_v29  ;;  %v4401_v48 = vmax.f32 %v4313_v51, 0.0  ;;  %5092 = vst [vmem:[%s10228_s9 + $0x70] sm:$0xff] %v5072_v37  }
 0x645   : > { %5085 = vst [vmem:[%s10228_s9 + $0x38] sm:$0xff] %v5037_v23   ;;  %v5032_v1 = vpack.c.bf16 %v4401_v48, %v4400_v60 }
 0x647   : > { %5084 = vst [vmem:[%s10228_s9 + $0x30] sm:$0xff] %v5032_v1  }
 0x648   : > { %5455 = shalt.err (!%p5452_p6)
}
 0x649   : > { %s5456_s9 = scalar_lea.hbm %s10274_s24, 2048  ;;  %s5460_s8 = scalar_lea.hbm %s10335_s3, 32768 }
 0x64a   : > { %p5457_p7 = scmp.ne.s32.totalorder %s10274_s24, %s5456_s9  ;;  %p5461_p11 = scmp.lt.s32.totalorder %s10274_s24, %s10335_s3 }
 0x64b   : > { %p5462_p12 = scmp.lt.s32.totalorder %s5460_s8, %s5456_s9 }
 0x64c   : > { %p5458_p9 = pnand %p5457_p7, %p5624_p3 }
 0x64d   : > { %p5463_p13 = por %p5462_p12, %p5461_p11 }
 0x64e   : > { %p5459_p10 = pneg %p5458_p9 }
 0x650   : > { %p5464_p0 = pnand %p5463_p13, %p5459_p10 }
 0x652   : > { %5467 = shalt.err (!%p5464_p0)
}
 0x653   : > { %5180 = dma.vmem_to_hbm [thread:$0]  (%p5624_p3), %s10276_s16, 2048, %s10274_s24, %s4581_s27, %s5551_s5, %s5551_s5, %s5536_s11  }
 0x654 PF: > { %p5186_p1 = scmp.ge.s32.totalorder %s5534_s19, 2  ;;  %s4611_s21 = sand.u32 1, %s5506_s12  }
 0x655   : > { %s4612_s10 = scalar_lea.sflag [#allocation3], %s4611_s21 }
 0x656   : > { %p5183_p2 = pnand %p5186_p1, %p5633_p8 }
 0x658   : > { %p5184_p4 = pneg %p5183_p2 }
 0x65a   : > { %5501 = dma.done.wait (%p5184_p4), %s4612_s10, 2048  }
 0x65b   : > { %5503 = vsyncadd (%p5184_p4), %s4612_s10, 4294965248  ;;  %s16_s19 = sadd.s32 1, %s5534_s19   ;;  %s11481_s12 = smov %s5510_s13 }
 0x65c   : > { %p13_p5 = scmp.ge.s32.totalorder %s16_s19, 18   ;;  %s11482_s13 = smov %s5514_s14 }
 0x65d   : > { %s11483_s14 = smov %s5642_s30  ;;  %s11484_s15 = smov %s5526_s17 }
 0x65e   : > { %s11485_s16 = smov %s5530_s18  ;;  %s11486_s17 = smov %s11489_s22 }
 0x65f   : > { %s11487_s18 = smov %s11493_s23  ;;  %15 = sbr.rel (!%p13_p5) target bundleno = 5 (0x5), region = 70 }
 0x664   :  { %4617 = vsyncpa [#allocation3], 1 }
 0x665   :  { %4619 = vsyncpa [#allocation3 + $0x1], 1 }

</bundles_post_ra>
